<compile_context>
chip_gen: v7x
topology: tpu7x:2x2x1
jax: 0.10.0
libtpu: 0.0.40
codegen_flags: <defaults>
</compile_context>

<pallas_src>
import jax
import jax.numpy as jnp
from jax.experimental import pallas as pl
from jax.experimental.pallas import tpu as pltpu


def _attn_kernel(score_h_ref, x_ref, mask_ref, wx_ref, o_ref):
    # score_h_ref: (B, 1)    f32, resident  -- hidden @ W[:, :H].T + bias (hoisted)
    # x_ref:       (B, TS, H) VMEM          -- sequence tile of whole_input
    # mask_ref:    (B, TS)    VMEM          -- mask tile (pre-transposed/cast in wrapper)
    # wx_ref:      (1, H)     VMEM          -- W[:, H:] (whole_input half of the concat)
    # o_ref:       (B, TS)    VMEM
    # Accumulate the H reduction in f32 so bf16 inputs keep parity with torch.
    prod = x_ref[...].astype(jnp.float32) * wx_ref[...].astype(jnp.float32)
    x_score = jnp.sum(prod, axis=-1)                       # (B, TS)  f32
    logits = x_score + score_h_ref[...]                    # (B, TS) + (B, 1) broadcast
    weights = jax.nn.sigmoid(logits) * mask_ref[...].astype(jnp.float32)
    o_ref[...] = weights.astype(o_ref.dtype)


def _tpu_generation():
    """Best-effort TPU generation from the device kind string (None if unknown)."""
    try:
        kind = jax.devices()[0].device_kind.lower()
    except Exception:
        return None
    for g in ("7", "6", "5", "4", "3"):
        if g in kind:
            return int(g)
    return None


def _pick_ts(B, S, H, itemsize, budget_bytes, min_steps):
    """Largest sequence-tile size whose double-buffered footprint fits the budget,
    has at least `min_steps` grid steps, and (preferably) keeps stores lane-dense."""
    per_s = 2 * B * (H + 2) * itemsize            # 2 bufs * (x + mask + out) per seq elem
    max_ts = max(1, budget_bytes // per_s)
    divisors = [d for d in range(1, S + 1) if S % d == 0]
    viable = [d for d in divisors if (S // d) >= min_steps]
    if not viable:
        viable = divisors
    in_budget = [d for d in viable if d <= max_ts]
    cands = in_budget if in_budget else [min(viable)]
    lane_dense = [d for d in cands if d % 128 == 0 or d == S]
    return max(lane_dense) if lane_dense else max(cands)


def attn_forward(hidden, whole_input, input_mask, weight, bias, *, ts=None):
    """Pallas forward. Returns (B, 1, S) matching the PyTorch module."""
    B, S, H = whole_input.shape
    assert hidden.shape == (B, H)
    assert input_mask.shape == (S, B)
    assert weight.shape == (1, 2 * H)
    assert bias.shape == (1,)

    dtype = whole_input.dtype
    itemsize = jnp.dtype(dtype).itemsize
    gen = _tpu_generation()

    # Generation-aware VMEM budgeting (v7x: 64 MiB physical; v5e/v6e: 128 MiB).
    vmem_cap = (48 << 20) if gen == 7 else (96 << 20)
    if ts is None:
        # On v7x keep >= 2 even, lane-dense grid steps so both TensorCores get work.
        min_steps = 2 if (gen is not None and gen >= 7 and S % 256 == 0) else 1
        ts = _pick_ts(B, S, H, itemsize, vmem_cap // 2, min_steps)
    assert S % ts == 0
    grid = (S // ts,)

    # Hoist the "hidden" half of Linear(cat(hidden, x)) + bias out of the loop.
    wh = weight[:, :H].astype(jnp.float32)                 # (1, H)
    wx = weight[:, H:]                                     # (1, H)
    score_h = (hidden.astype(jnp.float32) @ wh[0])[:, None] + bias.astype(jnp.float32)[0]
    score_h = score_h.astype(jnp.float32)                  # (B, 1)

    mask_bs = input_mask.T.astype(dtype)                   # glue: (S, B) -> (B, S), lane-dense

    # Explicit VMEM limit: double-buffered tiles + resident inputs, with headroom.
    tile_bytes = 2 * (B * ts * H * itemsize                # x
                      + B * ts * itemsize                  # mask
                      + B * ts * itemsize                  # out
                      + B * 4                              # score_h
                      + H * itemsize)                      # wx
    vmem_limit = int(min(vmem_cap, max(32 << 20, 4 * tile_bytes)))

    out = pl.pallas_call(
        _attn_kernel,
        out_shape=jax.ShapeDtypeStruct((B, S), dtype),
        grid_spec=pltpu.PrefetchScalarGridSpec(
            num_scalar_prefetch=0,
            grid=grid,
            in_specs=[
                pl.BlockSpec((B, 1), lambda s: (0, 0)),          # hidden score (resident)
                pl.BlockSpec((B, ts, H), lambda s: (0, s, 0)),   # whole_input tile
                pl.BlockSpec((B, ts), lambda s: (0, s)),         # mask tile
                pl.BlockSpec((1, H), lambda s: (0, 0)),          # W_input (resident)
            ],
            out_specs=pl.BlockSpec((B, ts), lambda s: (0, s)),
        ),
        compiler_params=pltpu.CompilerParams(
            dimension_semantics=("parallel",),
            vmem_limit_bytes=vmem_limit),
    )(score_h, whole_input, mask_bs, wx)

    return out[:, None, :]                                 # (B, 1, S)


def attn_ref(hidden, whole_input, input_mask, weight, bias):
    """Pure-JAX reference mirroring the PyTorch forward exactly."""
    B, S, H = whole_input.shape
    h_exp = jnp.broadcast_to(hidden[:, None, :], (B, S, H))
    cat = jnp.concatenate([h_exp, whole_input], axis=2)    # (B, S, 2H)
    logits = cat @ weight[0] + bias[0]                     # (B, S)
    w = jax.nn.sigmoid(logits)[..., None]                  # (B, S, 1)
    w = input_mask.T[..., None].astype(w.dtype) * w
    return jnp.transpose(w, (0, 2, 1))                     # (B, 1, S)


if __name__ == "__main__":
    B, S, H = 4, 256, 128   # batch, sequence, hidden_size

    key = jax.random.PRNGKey(0)
    k_h, k_x, k_m, k_w, k_b = jax.random.split(key, 5)

    hidden = jax.random.normal(k_h, (B, H), dtype=jnp.float32)
    whole_input = jax.random.normal(k_x, (B, S, H), dtype=jnp.float32)
    input_mask = (jax.random.uniform(k_m, (S, B)) > 0.3).astype(jnp.float32)

    # Deterministic parameter init for nn.Linear(2H, 1): weight (1, 2H), bias (1,)
    weight = jax.random.normal(k_w, (1, 2 * H), dtype=jnp.float32) * 0.05
    bias = jax.random.normal(k_b, (1,), dtype=jnp.float32) * 0.05

    out = attn_forward(hidden, whole_input, input_mask, weight, bias)
    out = jax.block_until_ready(out)

    ref = attn_ref(hidden, whole_input, input_mask, weight, bias)

    assert out.shape == (B, 1, S), out.shape
    assert jnp.allclose(out, ref, atol=1e-5, rtol=1e-5), float(jnp.max(jnp.abs(out - ref)))

    print("KERNEL_OK")
</pallas_src>

<mosaic_0001>
module attributes {stable_mosaic.version = 11 : i64} {
  func.func @_attn_kernel(%arg0: i32, %arg1: memref<4x1xf32, #tpu.memory_space<vmem>>, %arg2: memref<4x256x128xf32, #tpu.memory_space<vmem>>, %arg3: memref<4x256xf32, #tpu.memory_space<vmem>>, %arg4: memref<1x128xf32, #tpu.memory_space<vmem>>, %arg5: memref<4x256xf32, #tpu.memory_space<vmem>>) attributes {dimension_semantics = [#tpu.dimension_semantics<parallel>], iteration_bounds = array<i64: 1>, scalar_prefetch = 0 : i64, scratch_operands = 0 : i64, tpu.core_type = #tpu.core_type<tc>, window_params = [{pipeline_mode = #tpu.pipeline_mode<synchronous>, transform_indices = @transform_0, window_bounds = array<i64: 4, 1>}, {transform_indices = @transform_1, window_bounds = array<i64: 4, 256, 128>}, {transform_indices = @transform_2, window_bounds = array<i64: 4, 256>}, {pipeline_mode = #tpu.pipeline_mode<synchronous>, transform_indices = @transform_3, window_bounds = array<i64: 1, 128>}, {transform_indices = @transform_4, window_bounds = array<i64: 4, 256>}]} {
    %c0 = arith.constant 0 : index
    %c0_0 = arith.constant 0 : index
    %c0_1 = arith.constant 0 : index
    %0 = vector.load %arg2[%c0, %c0_0, %c0_1] : memref<4x256x128xf32, #tpu.memory_space<vmem>>, vector<4x256x128xf32>
    %c0_2 = arith.constant 0 : index
    %c0_3 = arith.constant 0 : index
    %1 = vector.load %arg4[%c0_2, %c0_3] : memref<1x128xf32, #tpu.memory_space<vmem>>, vector<1x128xf32>
    %2 = vector.shape_cast %1 : vector<1x128xf32> to vector<1x1x128xf32>
    %3 = vector.broadcast %2 : vector<1x1x128xf32> to vector<4x256x128xf32>
    %4 = arith.mulf %0, %3 : vector<4x256x128xf32>
    %cst = arith.constant dense<0.000000e+00> : vector<4x256xf32>
    %5 = vector.multi_reduction <add>, %4, %cst [2] : vector<4x256x128xf32> to vector<4x256xf32>
    %c0_4 = arith.constant 0 : index
    %c0_5 = arith.constant 0 : index
    %6 = vector.load %arg1[%c0_4, %c0_5] : memref<4x1xf32, #tpu.memory_space<vmem>>, vector<4x1xf32>
    %7 = vector.broadcast %6 : vector<4x1xf32> to vector<4x256xf32>
    %8 = arith.addf %5, %7 : vector<4x256xf32>
    %9 = arith.negf %8 : vector<4x256xf32>
    %10 = math.exp %9 : vector<4x256xf32>
    %cst_6 = arith.constant 1.000000e+00 : f32
    %11 = vector.broadcast %cst_6 : f32 to vector<4x256xf32>
    %12 = arith.addf %11, %10 : vector<4x256xf32>
    %13 = arith.divf %11, %12 : vector<4x256xf32>
    %c0_7 = arith.constant 0 : index
    %c0_8 = arith.constant 0 : index
    %14 = vector.load %arg3[%c0_7, %c0_8] : memref<4x256xf32, #tpu.memory_space<vmem>>, vector<4x256xf32>
    %15 = arith.mulf %13, %14 : vector<4x256xf32>
    %c0_9 = arith.constant 0 : index
    %c0_10 = arith.constant 0 : index
    %16 = vector.load %arg5[%c0_9, %c0_10] : memref<4x256xf32, #tpu.memory_space<vmem>>, vector<4x256xf32>
    tpu.vector_store %arg5[%c0_9, %c0_10], %15 {strides = array<i32>} : memref<4x256xf32, #tpu.memory_space<vmem>>, vector<4x256xf32>,
    return
  }
  func.func @transform_0(%arg0: i32) -> (i32, i32) {
    %c0_i32 = arith.constant 0 : i32
    %c0_i32_0 = arith.constant 0 : i32
    %c0_i32_1 = arith.constant 0 : i32
    return %c0_i32, %c0_i32_0 : i32, i32
  }
  func.func @transform_1(%arg0: i32) -> (i32, i32, i32) {
    %c0_i32 = arith.constant 0 : i32
    %c0_i32_0 = arith.constant 0 : i32
    %c0_i32_1 = arith.constant 0 : i32
    return %c0_i32, %arg0, %c0_i32_0 : i32, i32, i32
  }
  func.func @transform_2(%arg0: i32) -> (i32, i32) {
    %c0_i32 = arith.constant 0 : i32
    %c0_i32_0 = arith.constant 0 : i32
    return %c0_i32, %arg0 : i32, i32
  }
  func.func @transform_3(%arg0: i32) -> (i32, i32) {
    %c0_i32 = arith.constant 0 : i32
    %c0_i32_0 = arith.constant 0 : i32
    %c0_i32_1 = arith.constant 0 : i32
    return %c0_i32, %c0_i32_0 : i32, i32
  }
  func.func @transform_4(%arg0: i32) -> (i32, i32) {
    %c0_i32 = arith.constant 0 : i32
    %c0_i32_0 = arith.constant 0 : i32
    return %c0_i32, %arg0 : i32, i32
  }
}

</mosaic_0001>

<bundles_post_ra>
// kernel: tpu_custom_call.1
= control target key start
LH: loop header
LB: loop body
LE: loop exit
PB: predicated region body
PF: predicated region fallthrough
CT: control target
= control target key end

     0   :  { %9 = vsyncpa [#allocation3], 0  ;;  %s6491_s0 = inlined_call_operand.vmem [shape: f32[4,1], index: 0, kind: input, shape index: {}]   ;;  %s6492_s1 = inlined_call_operand.hbm [shape: f32[4,256,128], index: 1, kind: input, shape index: {}]   ;;  %s6493_s2 = inlined_call_operand.vmem [shape: f32[4,256], index: 2, kind: input, shape index: {}]   ;;  %s6494_s3 = inlined_call_operand.vmem [shape: f32[1,128], index: 3, kind: input, shape index: {}]   ;;  %s6495_s4 = inlined_call_operand.hbm [shape: f32[4,256], index: 4, kind: output, shape index: {}]  }
   0x1   :  { %10 = vsyncpa [#allocation4], 0  ;;  %s4423_s15 = smov [#allocation2]   ;;  %s4375_s19 = scalar_lea.hbm %s6492_s1, 16384 }
   0x2   :  { %s18_s16 = sshll.u32 %s4423_s15, 4  ;;  %p4376_p0 = scmp.ne.s32.totalorder %s6492_s1, %s4375_s19  ;;  %s19_s16 = int_to_ptr.vmem [resolvable:$true] %s18_s16 }
   0x3   :  { %p4379_p1 = scmp.lt.u32.totalorder %s4375_s19, %s6492_s1 }
   0x5   :  { %p4381_p2 = pnand %p4379_p1, %p4376_p0 }
   0x7   :  { %4384 = shalt.err (!%p4381_p2)
}
   0x8   :  { %s4385_s24 = scalar_lea.vmem %s19_s16, 16384  ;;  %p4390_p4 = scmp.lt.s32.totalorder %s19_s16, %s19_s16 }
   0x9   :  { %p4386_p3 = scmp.ne.s32.totalorder %s19_s16, %s4385_s24  ;;  %p4391_p5 = scmp.lt.s32.totalorder %s4385_s24, %s4385_s24 }
   0xb   :  { %p4392_p6 = por %p4391_p5, %p4390_p4 }
   0xd   :  { %p4393_p7 = pnand %p4392_p6, %p4386_p3 }
   0xf   :  { %4396 = shalt.err (!%p4393_p7)
}
  0x10   :  { %s4424_s25 = smov 128   ;;  %s4425_s26 = smov 8  }
  0x11   :  { %24 = dma.hbm_to_vmem [thread:$0]  %s6492_s1, 16384, %s19_s16, [#allocation3], %s4424_s25, %s4424_s25, %s4425_s26  }
  0x12   :  { %4419 = dma.done.wait [#allocation3], 16384  }
  0x13   :  { %4420 = vsyncadd [#allocation3], 4294950912  ;;  %v34_v0 = vld [vmem:[#allocation2 + $0x10] sm:$0xff]  ;;  %v4468_v1 = vld [vmem:[%s6494_s3] ss:$0 sm:$0xff]  ;;  %vm3046_vm0 = vcmask 130112  }
  0x14   :  { %v32_v2 = vld [vmem:[#allocation2] sm:$0xff]  ;;  %v169_v3 = vmul.f32 %v4468_v1, %v34_v0  ;;  %v35_v5 = vld [vmem:[#allocation2 + $0x18] sm:$0xff]  ;;  %v33_v6 = vld [vmem:[#allocation2 + $0x8] sm:$0xff]  ;;  %vm3053_vm1 = vcmask 195712   ;;  %vm3060_vm2 = vcmask 261312   ;;  %vm3067_vm3 = vcmask 326912  }
  0x15   :  { %v167_v4 = vmul.f32 %v4468_v1, %v32_v2  ;;  %v170_v7 = vmul.f32 %v4468_v1, %v35_v5  ;;  %v168_v8 = vmul.f32 %v4468_v1, %v33_v6  ;;  %v37_v9 = vld [vmem:[#allocation2 + $0x28] sm:$0xff]  ;;  %v36_v10 = vld [vmem:[#allocation2 + $0x20] sm:$0xff]  ;;  %v39_v13 = vld [vmem:[#allocation2 + $0x38] sm:$0xff]  ;;  %vm3074_vm4 = vcmask 392512  }
  0x16   :  { %299 = vadd.xlane.f32.xlu1 %v169_v3  ;;  %v172_v11 = vmul.f32 %v4468_v1, %v37_v9  ;;  %v171_v12 = vmul.f32 %v4468_v1, %v36_v10  ;;  %v38_v14 = vld [vmem:[#allocation2 + $0x30] sm:$0xff]  ;;  %v174_v15 = vmul.f32 %v4468_v1, %v39_v13  ;;  %v41_v17 = vld [vmem:[#allocation2 + $0x48] sm:$0xff]  ;;  %v40_v18 = vld [vmem:[#allocation2 + $0x40] sm:$0xff]  ;;  %vm3081_vm5 = vcmask 458112  }
  0x17   :  { %295 = vadd.xlane.f32.xlu0 %v167_v4  ;;  %v173_v16 = vmul.f32 %v4468_v1, %v38_v14  ;;  %v176_v19 = vmul.f32 %v4468_v1, %v41_v17  ;;  %v175_v20 = vmul.f32 %v4468_v1, %v40_v18  ;;  %v43_v21 = vld [vmem:[#allocation2 + $0x58] sm:$0xff]  ;;  %v42_v22 = vld [vmem:[#allocation2 + $0x50] sm:$0xff]  ;;  %v45_v25 = vld [vmem:[#allocation2 + $0x68] sm:$0xff]  ;;  %vm3088_vm6 = vcmask 523712  }
  0x18   :  { %v178_v23 = vmul.f32 %v4468_v1, %v43_v21  ;;  %v177_v24 = vmul.f32 %v4468_v1, %v42_v22  ;;  %v44_v26 = vld [vmem:[#allocation2 + $0x60] sm:$0xff]  ;;  %v180_v27 = vmul.f32 %v4468_v1, %v45_v25  ;;  %v47_v29 = vld [vmem:[#allocation2 + $0x78] sm:$0xff]  ;;  %v46_v30 = vld [vmem:[#allocation2 + $0x70] sm:$0xff]  ;;  %vm3095_vm7 = vcmask 589312  }
  0x19   :  { %v179_v28 = vmul.f32 %v4468_v1, %v44_v26  ;;  %v182_v31 = vmul.f32 %v4468_v1, %v47_v29  ;;  %v181_v32 = vmul.f32 %v4468_v1, %v46_v30  ;;  %v49_v33 = vld [vmem:[#allocation2 + $0x88] sm:$0xff]  ;;  %v48_v34 = vld [vmem:[#allocation2 + $0x80] sm:$0xff]  ;;  %v51_v37 = vld [vmem:[#allocation2 + $0x98] sm:$0xff]  ;;  %vm3102_vm8 = vcmask 654912  }
  0x1a   :  { %301 = vadd.xlane.f32.xlu1 %v170_v7  ;;  %v184_v35 = vmul.f32 %v4468_v1, %v49_v33  ;;  %v183_v36 = vmul.f32 %v4468_v1, %v48_v34  ;;  %v50_v38 = vld [vmem:[#allocation2 + $0x90] sm:$0xff]  ;;  %v186_v39 = vmul.f32 %v4468_v1, %v51_v37  ;;  %v53_v41 = vld [vmem:[#allocation2 + $0xa8] sm:$0xff]  ;;  %v52_v42 = vld [vmem:[#allocation2 + $0xa0] sm:$0xff]  ;;  %vm3109_vm9 = vcmask 720512  }
  0x1b   :  { %297 = vadd.xlane.f32.xlu0 %v168_v8  ;;  %v185_v40 = vmul.f32 %v4468_v1, %v50_v38  ;;  %v188_v43 = vmul.f32 %v4468_v1, %v53_v41  ;;  %v187_v44 = vmul.f32 %v4468_v1, %v52_v42  ;;  %v55_v45 = vld [vmem:[#allocation2 + $0xb8] sm:$0xff]  ;;  %v54_v46 = vld [vmem:[#allocation2 + $0xb0] sm:$0xff]  ;;  %v57_v49 = vld [vmem:[#allocation2 + $0xc8] sm:$0xff]  ;;  %vm3116_vm10 = vcmask 786112  }
  0x1c   :  { %v190_v47 = vmul.f32 %v4468_v1, %v55_v45  ;;  %v189_v48 = vmul.f32 %v4468_v1, %v54_v46  ;;  %v56_v50 = vld [vmem:[#allocation2 + $0xc0] sm:$0xff]  ;;  %v192_v51 = vmul.f32 %v4468_v1, %v57_v49  ;;  %v59_v53 = vld [vmem:[#allocation2 + $0xd8] sm:$0xff]  ;;  %v58_v54 = vld [vmem:[#allocation2 + $0xd0] sm:$0xff]  ;;  %vm3123_vm11 = vcmask 851712  }
  0x1d   :  { %v191_v52 = vmul.f32 %v4468_v1, %v56_v50  ;;  %v194_v55 = vmul.f32 %v4468_v1, %v59_v53  ;;  %v193_v56 = vmul.f32 %v4468_v1, %v58_v54  ;;  %v61_v57 = vld [vmem:[#allocation2 + $0xe8] sm:$0xff]  ;;  %v60_v58 = vld [vmem:[#allocation2 + $0xe0] sm:$0xff]  ;;  %v63_v61 = vld [vmem:[#allocation2 + $0xf8] sm:$0xff]  ;;  %vm3130_vm12 = vcmask 917312  }
  0x1e   :  { %305 = vadd.xlane.f32.xlu1 %v172_v11  ;;  %v196_v59 = vmul.f32 %v4468_v1, %v61_v57  ;;  %v195_v60 = vmul.f32 %v4468_v1, %v60_v58  ;;  %v62_v62 = vld [vmem:[#allocation2 + $0xf0] sm:$0xff]  ;;  %v198_v63 = vmul.f32 %v4468_v1, %v63_v61  ;;  %v65_v2 = vld [vmem:[#allocation2 + $0x108] sm:$0xff]  ;;  %v64_v3 = vld [vmem:[#allocation2 + $0x100] sm:$0xff]  ;;  %vm3137_vm13 = vcmask 982912  }
  0x1f   :  { %303 = vadd.xlane.f32.xlu0 %v171_v12  ;;  %v197_v0 = vmul.f32 %v4468_v1, %v62_v62  ;;  %v200_v4 = vmul.f32 %v4468_v1, %v65_v2  ;;  %v199_v5 = vmul.f32 %v4468_v1, %v64_v3  ;;  %v67_v6 = vld [vmem:[#allocation2 + $0x118] sm:$0xff]  ;;  %v66_v7 = vld [vmem:[#allocation2 + $0x110] sm:$0xff]  ;;  %v69_v10 = vld [vmem:[#allocation2 + $0x128] sm:$0xff]  ;;  %vm3144_vm14 = vcmask 1048512  }
  0x20   :  { %v202_v8 = vmul.f32 %v4468_v1, %v67_v6  ;;  %v201_v9 = vmul.f32 %v4468_v1, %v66_v7  ;;  %v68_v11 = vld [vmem:[#allocation2 + $0x120] sm:$0xff]  ;;  %v204_v12 = vmul.f32 %v4468_v1, %v69_v10  ;;  %v71_v14 = vld [vmem:[#allocation2 + $0x138] sm:$0xff]  ;;  %v73_v18 = vld [vmem:[#allocation2 + $0x148] sm:$0xff]  ;;  %vm3699_vm15 = vcmask 1041409  }
  0x21   :  { %v203_v13 = vmul.f32 %v4468_v1, %v68_v11  ;;  %v75_v22 = vld [vmem:[#allocation2 + $0x158] sm:$0xff]  ;;  %v77_v26 = vld [vmem:[#allocation2 + $0x168] sm:$0xff] }
  0x22   :  { %309 = vadd.xlane.f32.xlu1 %v174_v15  ;;  %v70_v15 = vld [vmem:[#allocation2 + $0x130] sm:$0xff]  ;;  %v79_v30 = vld [vmem:[#allocation2 + $0x178] sm:$0xff]  ;;  %v81_v34 = vld [vmem:[#allocation2 + $0x188] sm:$0xff] }
  0x23   :  { %307 = vadd.xlane.f32.xlu0 %v173_v16  ;;  %v206_v16 = vmul.f32 %v4468_v1, %v71_v14  ;;  %v205_v17 = vmul.f32 %v4468_v1, %v70_v15  ;;  %v83_v38 = vld [vmem:[#allocation2 + $0x198] sm:$0xff]  ;;  %v85_v42 = vld [vmem:[#allocation2 + $0x1a8] sm:$0xff] }
  0x24   :  { %v87_v46 = vld [vmem:[#allocation2 + $0x1b8] sm:$0xff]  ;;  %v89_v50 = vld [vmem:[#allocation2 + $0x1c8] sm:$0xff] }
  0x25   :  { %v91_v54 = vld [vmem:[#allocation2 + $0x1d8] sm:$0xff]  ;;  %v93_v58 = vld [vmem:[#allocation2 + $0x1e8] sm:$0xff] }
  0x26   :  { %313 = vadd.xlane.f32.xlu1 %v176_v19  ;;  %v72_v19 = vld [vmem:[#allocation2 + $0x140] sm:$0xff]  ;;  %v95_v62 = vld [vmem:[#allocation2 + $0x1f8] sm:$0xff]  ;;  %v97_v3 = vld [vmem:[#allocation2 + $0x208] sm:$0xff] }
  0x27   :  { %311 = vadd.xlane.f32.xlu0 %v175_v20  ;;  %v208_v20 = vmul.f32 %v4468_v1, %v73_v18  ;;  %v207_v21 = vmul.f32 %v4468_v1, %v72_v19  ;;  %v99_v7 = vld [vmem:[#allocation2 + $0x218] sm:$0xff]  ;;  %v101_v11 = vld [vmem:[#allocation2 + $0x228] sm:$0xff] }
  0x28   :  { %v103_v15 = vld [vmem:[#allocation2 + $0x238] sm:$0xff]  ;;  %v105_v19 = vld [vmem:[#allocation2 + $0x248] sm:$0xff] }
  0x2a   :  { %317 = vadd.xlane.f32.xlu1 %v178_v23  ;;  %v74_v23 = vld [vmem:[#allocation2 + $0x150] sm:$0xff] }
  0x2b   :  { %315 = vadd.xlane.f32.xlu0 %v177_v24  ;;  %v210_v24 = vmul.f32 %v4468_v1, %v75_v22  ;;  %v209_v25 = vmul.f32 %v4468_v1, %v74_v23 }
  0x2e   :  { %321 = vadd.xlane.f32.xlu1 %v180_v27  ;;  %v76_v27 = vld [vmem:[#allocation2 + $0x160] sm:$0xff] }
  0x2f   :  { %319 = vadd.xlane.f32.xlu0 %v179_v28  ;;  %v212_v28 = vmul.f32 %v4468_v1, %v77_v26  ;;  %v211_v29 = vmul.f32 %v4468_v1, %v76_v27  ;;  %v106_v26 = vld [vmem:[#allocation2 + $0x250] sm:$0xff]  ;;  %v4426_v27 = vmov 0  }
  0x30   :  { %3860 = vset.pattern.permute.xlu0 %v4426_v27  ;;  %3861 = vset.pattern.permute.xlu1 %v4426_v27 }
  0x32   :  { %325 = vadd.xlane.f32.xlu1 %v182_v31  ;;  %v78_v31 = vld [vmem:[#allocation2 + $0x170] sm:$0xff] }
  0x33   :  { %323 = vadd.xlane.f32.xlu0 %v181_v32  ;;  %v214_v32 = vmul.f32 %v4468_v1, %v79_v30  ;;  %v213_v33 = vmul.f32 %v4468_v1, %v78_v31 }
  0x36   :  { %329 = vadd.xlane.f32.xlu1 %v184_v35  ;;  %v80_v35 = vld [vmem:[#allocation2 + $0x180] sm:$0xff] }
  0x37   :  { %327 = vadd.xlane.f32.xlu0 %v183_v36  ;;  %v216_v36 = vmul.f32 %v4468_v1, %v81_v34  ;;  %v215_v37 = vmul.f32 %v4468_v1, %v80_v35 }
  0x3a   :  { %333 = vadd.xlane.f32.xlu1 %v186_v39  ;;  %v82_v39 = vld [vmem:[#allocation2 + $0x190] sm:$0xff] }
  0x3b   :  { %331 = vadd.xlane.f32.xlu0 %v185_v40  ;;  %v218_v40 = vmul.f32 %v4468_v1, %v83_v38  ;;  %v217_v41 = vmul.f32 %v4468_v1, %v82_v39  ;;  %v111_v38 = vld [vmem:[#allocation2 + $0x278] sm:$0xff]  ;;  %v110_v39 = vld [vmem:[#allocation2 + $0x270] sm:$0xff] }
  0x3e   :  { %337 = vadd.xlane.f32.xlu1 %v188_v43  ;;  %v84_v43 = vld [vmem:[#allocation2 + $0x1a0] sm:$0xff] }
  0x3f   :  { %335 = vadd.xlane.f32.xlu0 %v187_v44  ;;  %v220_v44 = vmul.f32 %v4468_v1, %v85_v42  ;;  %v219_v45 = vmul.f32 %v4468_v1, %v84_v43 }
  0x42   :  { %341 = vadd.xlane.f32.xlu1 %v190_v47  ;;  %v86_v47 = vld [vmem:[#allocation2 + $0x1b0] sm:$0xff] }
  0x43   :  { %339 = vadd.xlane.f32.xlu0 %v189_v48  ;;  %v222_v48 = vmul.f32 %v4468_v1, %v87_v46  ;;  %v221_v49 = vmul.f32 %v4468_v1, %v86_v47 }
  0x46   :  { %345 = vadd.xlane.f32.xlu1 %v192_v51  ;;  %v88_v51 = vld [vmem:[#allocation2 + $0x1c0] sm:$0xff] }
  0x47   :  { %343 = vadd.xlane.f32.xlu0 %v191_v52  ;;  %v224_v52 = vmul.f32 %v4468_v1, %v89_v50  ;;  %v223_v53 = vmul.f32 %v4468_v1, %v88_v51  ;;  %v115_v50 = vld [vmem:[#allocation2 + $0x298] sm:$0xff]  ;;  %v114_v51 = vld [vmem:[#allocation2 + $0x290] sm:$0xff] }
  0x4a   :  { %349 = vadd.xlane.f32.xlu1 %v194_v55  ;;  %v90_v55 = vld [vmem:[#allocation2 + $0x1d0] sm:$0xff] }
  0x4b   :  { %347 = vadd.xlane.f32.xlu0 %v193_v56  ;;  %v226_v56 = vmul.f32 %v4468_v1, %v91_v54  ;;  %v225_v57 = vmul.f32 %v4468_v1, %v90_v55 }
  0x4e   :  { %353 = vadd.xlane.f32.xlu1 %v196_v59  ;;  %v92_v59 = vld [vmem:[#allocation2 + $0x1e0] sm:$0xff] }
  0x4f   :  { %351 = vadd.xlane.f32.xlu0 %v195_v60  ;;  %v228_v60 = vmul.f32 %v4468_v1, %v93_v58  ;;  %v227_v61 = vmul.f32 %v4468_v1, %v92_v59 }
  0x52   :  { %357 = vadd.xlane.f32.xlu1 %v198_v63  ;;  %v94_v63 = vld [vmem:[#allocation2 + $0x1f0] sm:$0xff] }
  0x53   :  { %355 = vadd.xlane.f32.xlu0 %v197_v0  ;;  %v230_v0 = vmul.f32 %v4468_v1, %v95_v62  ;;  %v229_v2 = vmul.f32 %v4468_v1, %v94_v63  ;;  %v119_v62 = vld [vmem:[#allocation2 + $0x2b8] sm:$0xff]  ;;  %v118_v63 = vld [vmem:[#allocation2 + $0x2b0] sm:$0xff] }
  0x56   :  { %361 = vadd.xlane.f32.xlu1 %v200_v4  ;;  %v96_v4 = vld [vmem:[#allocation2 + $0x200] sm:$0xff] }
  0x57   :  { %359 = vadd.xlane.f32.xlu0 %v199_v5  ;;  %v232_v5 = vmul.f32 %v4468_v1, %v97_v3  ;;  %v231_v6 = vmul.f32 %v4468_v1, %v96_v4 }
  0x5a   :  { %365 = vadd.xlane.f32.xlu1 %v202_v8  ;;  %v98_v8 = vld [vmem:[#allocation2 + $0x210] sm:$0xff] }
  0x5b   :  { %363 = vadd.xlane.f32.xlu0 %v201_v9  ;;  %v234_v9 = vmul.f32 %v4468_v1, %v99_v7  ;;  %v233_v10 = vmul.f32 %v4468_v1, %v98_v8 }
  0x5e   :  { %369 = vadd.xlane.f32.xlu1 %v204_v12  ;;  %v100_v12 = vld [vmem:[#allocation2 + $0x220] sm:$0xff] }
  0x5f   :  { %367 = vadd.xlane.f32.xlu0 %v203_v13  ;;  %v236_v13 = vmul.f32 %v4468_v1, %v101_v11  ;;  %v235_v14 = vmul.f32 %v4468_v1, %v100_v12  ;;  %v123_v11 = vld [vmem:[#allocation2 + $0x2d8] sm:$0xff]  ;;  %v122_v12 = vld [vmem:[#allocation2 + $0x2d0] sm:$0xff] }
  0x62   :  { %373 = vadd.xlane.f32.xlu1 %v206_v16  ;;  %v102_v16 = vld [vmem:[#allocation2 + $0x230] sm:$0xff] }
  0x63   :  { %371 = vadd.xlane.f32.xlu0 %v205_v17  ;;  %v238_v17 = vmul.f32 %v4468_v1, %v103_v15  ;;  %v237_v18 = vmul.f32 %v4468_v1, %v102_v16 }
  0x66   :  { %377 = vadd.xlane.f32.xlu1 %v208_v20  ;;  %v104_v20 = vld [vmem:[#allocation2 + $0x240] sm:$0xff] }
  0x67   :  { %375 = vadd.xlane.f32.xlu0 %v207_v21  ;;  %v240_v21 = vmul.f32 %v4468_v1, %v105_v19  ;;  %v239_v22 = vmul.f32 %v4468_v1, %v104_v20 }
  0x6a   :  { %381 = vadd.xlane.f32.xlu1 %v210_v24 }
  0x6b   :  { %379 = vadd.xlane.f32.xlu0 %v209_v25  ;;  %v107_v25 = vld [vmem:[#allocation2 + $0x258] sm:$0xff] }
  0x6e   :  { %385 = vadd.xlane.f32.xlu1 %v212_v28  ;;  %v242_v28 = vmul.f32 %v4468_v1, %v107_v25  ;;  %v127_v25 = vld [vmem:[#allocation2 + $0x2f8] sm:$0xff] }
  0x6f   :  { %383 = vadd.xlane.f32.xlu0 %v211_v29  ;;  %v241_v29 = vmul.f32 %v4468_v1, %v106_v26  ;;  %v126_v26 = vld [vmem:[#allocation2 + $0x2f0] sm:$0xff]  ;;  %v262_v27 = vmul.f32 %v4468_v1, %v127_v25  ;;  %v141_v25 = vld [vmem:[#allocation2 + $0x368] sm:$0xff] }
  0x72   :  { %389 = vadd.xlane.f32.xlu1 %v214_v32  ;;  %v109_v32 = vld [vmem:[#allocation2 + $0x268] sm:$0xff] }
  0x73   :  { %387 = vadd.xlane.f32.xlu0 %v213_v33  ;;  %v108_v33 = vld [vmem:[#allocation2 + $0x260] sm:$0xff]  ;;  %v244_v34 = vmul.f32 %v4468_v1, %v109_v32 }
  0x74   :  { %v243_v35 = vmul.f32 %v4468_v1, %v108_v33  ;;  %v129_v33 = vld [vmem:[#allocation2 + $0x308] sm:$0xff] }
  0x76   :  { %393 = vadd.xlane.f32.xlu1 %v216_v36 }
  0x77   :  { %391 = vadd.xlane.f32.xlu0 %v215_v37 }
  0x7a   :  { %397 = vadd.xlane.f32.xlu1 %v218_v40  ;;  %v246_v40 = vmul.f32 %v4468_v1, %v111_v38 }
  0x7b   :  { %395 = vadd.xlane.f32.xlu0 %v217_v41  ;;  %v245_v41 = vmul.f32 %v4468_v1, %v110_v39 }
  0x7e   :  { %401 = vadd.xlane.f32.xlu1 %v220_v44  ;;  %v113_v44 = vld [vmem:[#allocation2 + $0x288] sm:$0xff] }
  0x7f   :  { %399 = vadd.xlane.f32.xlu0 %v219_v45  ;;  %v112_v45 = vld [vmem:[#allocation2 + $0x280] sm:$0xff]  ;;  %v248_v46 = vmul.f32 %v4468_v1, %v113_v44  ;;  %v130_v44 = vld [vmem:[#allocation2 + $0x310] sm:$0xff] }
  0x80   :  { %v247_v47 = vmul.f32 %v4468_v1, %v112_v45 }
  0x82   :  { %405 = vadd.xlane.f32.xlu1 %v222_v48 }
  0x83   :  { %403 = vadd.xlane.f32.xlu0 %v221_v49 }
  0x86   :  { %409 = vadd.xlane.f32.xlu1 %v224_v52  ;;  %v250_v52 = vmul.f32 %v4468_v1, %v115_v50 }
  0x87   :  { %407 = vadd.xlane.f32.xlu0 %v223_v53  ;;  %v249_v53 = vmul.f32 %v4468_v1, %v114_v51  ;;  %v133_v51 = vld [vmem:[#allocation2 + $0x328] sm:$0xff] }
  0x8a   :  { %413 = vadd.xlane.f32.xlu1 %v226_v56  ;;  %v117_v56 = vld [vmem:[#allocation2 + $0x2a8] sm:$0xff] }
  0x8b   :  { %411 = vadd.xlane.f32.xlu0 %v225_v57  ;;  %v116_v57 = vld [vmem:[#allocation2 + $0x2a0] sm:$0xff]  ;;  %v252_v58 = vmul.f32 %v4468_v1, %v117_v56 }
  0x8c   :  { %v251_v59 = vmul.f32 %v4468_v1, %v116_v57 }
  0x8e   :  { %417 = vadd.xlane.f32.xlu1 %v228_v60 }
  0x8f   :  { %415 = vadd.xlane.f32.xlu0 %v227_v61 }
  0x92   :  { %421 = vadd.xlane.f32.xlu1 %v230_v0  ;;  %v254_v0 = vmul.f32 %v4468_v1, %v119_v62  ;;  %v134_v62 = vld [vmem:[#allocation2 + $0x330] sm:$0xff] }
  0x93   :  { %419 = vadd.xlane.f32.xlu0 %v229_v2  ;;  %v253_v2 = vmul.f32 %v4468_v1, %v118_v63 }
  0x96   :  { %425 = vadd.xlane.f32.xlu1 %v232_v5  ;;  %v121_v5 = vld [vmem:[#allocation2 + $0x2c8] sm:$0xff] }
  0x97   :  { %423 = vadd.xlane.f32.xlu0 %v231_v6  ;;  %v120_v6 = vld [vmem:[#allocation2 + $0x2c0] sm:$0xff]  ;;  %v256_v7 = vmul.f32 %v4468_v1, %v121_v5  ;;  %v137_v5 = vld [vmem:[#allocation2 + $0x348] sm:$0xff] }
  0x98   :  { %v255_v8 = vmul.f32 %v4468_v1, %v120_v6  ;;  %v136_v6 = vld [vmem:[#allocation2 + $0x340] sm:$0xff] }
  0x9a   :  { %429 = vadd.xlane.f32.xlu1 %v234_v9 }
  0x9b   :  { %427 = vadd.xlane.f32.xlu0 %v233_v10 }
  0x9e   :  { %433 = vadd.xlane.f32.xlu1 %v236_v13  ;;  %v258_v13 = vmul.f32 %v4468_v1, %v123_v11  ;;  %v271_v11 = vmul.f32 %v4468_v1, %v136_v6 }
  0x9f   :  { %431 = vadd.xlane.f32.xlu0 %v235_v14  ;;  %v257_v14 = vmul.f32 %v4468_v1, %v122_v12 }
  0xa2   :  { %437 = vadd.xlane.f32.xlu1 %v238_v17  ;;  %v125_v17 = vld [vmem:[#allocation2 + $0x2e8] sm:$0xff] }
  0xa3   :  { %435 = vadd.xlane.f32.xlu0 %v237_v18  ;;  %v4544_v23 = vpop.xlane.xlu1 %299  ;;  %v124_v18 = vld [vmem:[#allocation2 + $0x2e0] sm:$0xff]  ;;  %v260_v19 = vmul.f32 %v4468_v1, %v125_v17 }
  0xa4   :  { %v4546_v24 = vpop.xlane.xlu0 %295  ;;  %v259_v20 = vmul.f32 %v4468_v1, %v124_v18 }
  0xa6   :  { %441 = vadd.xlane.f32.xlu1 %v240_v21 }
  0xa7   :  { %439 = vadd.xlane.f32.xlu0 %v239_v22  ;;  %v4550_v30 = vpop.xlane.xlu1 %301 }
  0xa8   :  { %v4552_v31 = vpop.xlane.xlu0 %297 }
  0xaa   :  { %445 = vadd.xlane.f32.xlu1 %v242_v28  ;;  %v261_v28 = vmul.f32 %v4468_v1, %v126_v26  ;;  %v140_v26 = vld [vmem:[#allocation2 + $0x360] sm:$0xff] }
  0xab   :  { %443 = vadd.xlane.f32.xlu0 %v241_v29  ;;  %v4556_v36 = vpop.xlane.xlu1 %305 }
  0xac   :  { %v4558_v37 = vpop.xlane.xlu0 %303 }
  0xae   :  { %449 = vadd.xlane.f32.xlu1 %v244_v34  ;;  %v128_v34 = vld [vmem:[#allocation2 + $0x300] sm:$0xff] }
  0xaf   :  { %447 = vadd.xlane.f32.xlu0 %v243_v35  ;;  %v4562_v42 = vpop.xlane.xlu1 %309  ;;  %v264_v35 = vmul.f32 %v4468_v1, %v129_v33  ;;  %v263_v38 = vmul.f32 %v4468_v1, %v128_v34  ;;  %v143_v34 = vld [vmem:[#allocation2 + $0x378] sm:$0xff] }
  0xb0   :  { %v4564_v43 = vpop.xlane.xlu0 %307 }
  0xb2   :  { %453 = vadd.xlane.f32.xlu1 %v246_v40 }
  0xb3   :  { %451 = vadd.xlane.f32.xlu0 %v245_v41  ;;  %v4568_v48 = vpop.xlane.xlu1 %313  ;;  %v131_v41 = vld [vmem:[#allocation2 + $0x318] sm:$0xff] }
  0xb4   :  { %v4570_v49 = vpop.xlane.xlu0 %311  ;;  %v266_v45 = vmul.f32 %v4468_v1, %v131_v41  ;;  %v278_v41 = vmul.f32 %v4468_v1, %v143_v34 }
  0xb6   :  { %457 = vadd.xlane.f32.xlu1 %v248_v46  ;;  %v265_v46 = vmul.f32 %v4468_v1, %v130_v44 }
  0xb7   :  { %455 = vadd.xlane.f32.xlu0 %v247_v47  ;;  %v4574_v54 = vpop.xlane.xlu1 %317 }
  0xb8   :  { %v4576_v55 = vpop.xlane.xlu0 %315 }
  0xba   :  { %461 = vadd.xlane.f32.xlu1 %v250_v52  ;;  %v132_v52 = vld [vmem:[#allocation2 + $0x320] sm:$0xff] }
  0xbb   :  { %459 = vadd.xlane.f32.xlu0 %v249_v53  ;;  %v4580_v60 = vpop.xlane.xlu1 %321  ;;  %v268_v53 = vmul.f32 %v4468_v1, %v133_v51  ;;  %v267_v56 = vmul.f32 %v4468_v1, %v132_v52  ;;  %v144_v51 = vld [vmem:[#allocation2 + $0x380] sm:$0xff] }
  0xbc   :  { %v4582_v61 = vpop.xlane.xlu0 %319 }
  0xbe   :  { %465 = vadd.xlane.f32.xlu1 %v252_v58 }
  0xbf   :  { %463 = vadd.xlane.f32.xlu0 %v251_v59  ;;  %v4586_v3 = vpop.xlane.xlu1 %325  ;;  %v135_v59 = vld [vmem:[#allocation2 + $0x338] sm:$0xff] }
  0xc0   :  { %v4588_v4 = vpop.xlane.xlu0 %323  ;;  %v270_v63 = vmul.f32 %v4468_v1, %v135_v59 }
  0xc2   :  { %469 = vadd.xlane.f32.xlu1 %v254_v0  ;;  %v269_v0 = vmul.f32 %v4468_v1, %v134_v62  ;;  %v147_v62 = vld [vmem:[#allocation2 + $0x398] sm:$0xff] }
  0xc3   :  { %467 = vadd.xlane.f32.xlu0 %v253_v2  ;;  %v4592_v9 = vpop.xlane.xlu1 %329 }
  0xc4   :  { %v4594_v10 = vpop.xlane.xlu0 %327 }
  0xc6   :  { %473 = vadd.xlane.f32.xlu1 %v256_v7 }
  0xc7   :  { %471 = vadd.xlane.f32.xlu0 %v255_v8  ;;  %v4598_v15 = vpop.xlane.xlu1 %333  ;;  %v272_v8 = vmul.f32 %v4468_v1, %v137_v5 }
  0xc8   :  { %v4600_v16 = vpop.xlane.xlu0 %331 }
  0xca   :  { %477 = vadd.xlane.f32.xlu1 %v258_v13  ;;  %v139_v13 = vld [vmem:[#allocation2 + $0x358] sm:$0xff] }
  0xcb   :  { %475 = vadd.xlane.f32.xlu0 %v257_v14  ;;  %v4604_v21 = vpop.xlane.xlu1 %337  ;;  %v138_v14 = vld [vmem:[#allocation2 + $0x350] sm:$0xff]  ;;  %v274_v18 = vmul.f32 %v4468_v1, %v139_v13 }
  0xcc   :  { %v4606_v22 = vpop.xlane.xlu0 %335 }
  0xce   :  { %481 = vadd.xlane.f32.xlu1 %v260_v19  ;;  %v273_v19 = vmul.f32 %v4468_v1, %v138_v14 }
  0xcf   :  { %479 = vadd.xlane.f32.xlu0 %v259_v20  ;;  %v4610_v29 = vpop.xlane.xlu1 %341 }
  0xd0   :  { %v4612_v32 = vpop.xlane.xlu0 %339 }
  0xd2   :  { %485 = vadd.xlane.f32.xlu1 %v262_v27  ;;  %v276_v27 = vmul.f32 %v4468_v1, %v141_v25  ;;  %v151_v25 = vld [vmem:[#allocation2 + $0x3b8] sm:$0xff] }
  0xd3   :  { %483 = vadd.xlane.f32.xlu0 %v261_v28  ;;  %v4616_v39 = vpop.xlane.xlu1 %345  ;;  %v275_v28 = vmul.f32 %v4468_v1, %v140_v26  ;;  %v150_v26 = vld [vmem:[#allocation2 + $0x3b0] sm:$0xff] }
  0xd4   :  { %v4618_v40 = vpop.xlane.xlu0 %343  ;;  %v285_v34 = vmul.f32 %v4468_v1, %v150_v26  ;;  %v159_v26 = vld [vmem:[#allocation2 + $0x3f8] sm:$0xff] }
  0xd6   :  { %489 = vadd.xlane.f32.xlu1 %v264_v35  ;;  %v142_v35 = vld [vmem:[#allocation2 + $0x370] sm:$0xff] }
  0xd7   :  { %487 = vadd.xlane.f32.xlu0 %v263_v38  ;;  %v4622_v47 = vpop.xlane.xlu1 %349  ;;  %v277_v44 = vmul.f32 %v4468_v1, %v142_v35  ;;  %v153_v35 = vld [vmem:[#allocation2 + $0x3c8] sm:$0xff] }
  0xd8   :  { %v4624_v50 = vpop.xlane.xlu0 %347 }
  0xda   :  { %493 = vadd.xlane.f32.xlu1 %v266_v45 }
  0xdb   :  { %491 = vadd.xlane.f32.xlu0 %v265_v46  ;;  %v4628_v57 = vpop.xlane.xlu1 %353  ;;  %v145_v46 = vld [vmem:[#allocation2 + $0x388] sm:$0xff] }
  0xdc   :  { %v4630_v58 = vpop.xlane.xlu0 %351 }
  0xde   :  { %497 = vadd.xlane.f32.xlu1 %v268_v53  ;;  %v280_v53 = vmul.f32 %v4468_v1, %v145_v46  ;;  %v288_v46 = vmul.f32 %v4468_v1, %v153_v35  ;;  %v294_v35 = vmul.f32 %v4468_v1, %v159_v26 }
  0xdf   :  { %495 = vadd.xlane.f32.xlu0 %v267_v56  ;;  %v4634_v2 = vpop.xlane.xlu1 %357  ;;  %v279_v56 = vmul.f32 %v4468_v1, %v144_v51 }
  0xe0   :  { %v4636_v7 = vpop.xlane.xlu0 %355 }
  0xe2   :  { %501 = vadd.xlane.f32.xlu1 %v270_v63  ;;  %v146_v63 = vld [vmem:[#allocation2 + $0x390] sm:$0xff] }
  0xe3   :  { %499 = vadd.xlane.f32.xlu0 %v269_v0  ;;  %v4640_v12 = vpop.xlane.xlu1 %361  ;;  %v282_v0 = vmul.f32 %v4468_v1, %v147_v62  ;;  %v281_v5 = vmul.f32 %v4468_v1, %v146_v63 }
  0xe4   :  { %v4642_v17 = vpop.xlane.xlu0 %359 }
  0xe6   :  { %505 = vadd.xlane.f32.xlu1 %v272_v8  ;;  %v149_v8 = vld [vmem:[#allocation2 + $0x3a8] sm:$0xff] }
  0xe7   :  { %503 = vadd.xlane.f32.xlu0 %v271_v11  ;;  %v4646_v20 = vpop.xlane.xlu1 %365  ;;  %v148_v11 = vld [vmem:[#allocation2 + $0x3a0] sm:$0xff]  ;;  %v284_v14 = vmul.f32 %v4468_v1, %v149_v8  ;;  %v157_v8 = vld [vmem:[#allocation2 + $0x3e8] sm:$0xff] }
  0xe8   :  { %v4652_v38 = vpop.xlane.xlu0 %363 }
  0xea   :  { %509 = vadd.xlane.f32.xlu1 %v274_v18  ;;  %v283_v18 = vmul.f32 %v4468_v1, %v148_v11  ;;  %v156_v11 = vld [vmem:[#allocation2 + $0x3e0] sm:$0xff] }
  0xeb   :  { %507 = vadd.xlane.f32.xlu0 %v273_v19  ;;  %v4650_v33 = vpop.xlane.xlu1 %369 }
  0xec   :  { %v4658_v52 = vpop.xlane.xlu0 %367 }
  0xee   :  { %513 = vadd.xlane.f32.xlu1 %v276_v27 }
  0xef   :  { %511 = vadd.xlane.f32.xlu0 %v275_v28  ;;  %v4656_v45 = vpop.xlane.xlu1 %373  ;;  %v286_v28 = vmul.f32 %v4468_v1, %v151_v25  ;;  %v291_v25 = vmul.f32 %v4468_v1, %v156_v11 }
  0xf0   :  { %v4668_v13 = vpop.xlane.xlu0 %371 }
  0xf2   :  { %517 = vadd.xlane.f32.xlu1 %v278_v41  ;;  %v152_v41 = vld [vmem:[#allocation2 + $0x3c0] sm:$0xff] }
  0xf3   :  { %515 = vadd.xlane.f32.xlu0 %v277_v44  ;;  %v4662_v59 = vpop.xlane.xlu1 %377  ;;  %v287_v51 = vmul.f32 %v4468_v1, %v152_v41 }
  0xf4   :  { %v4674_v27 = vpop.xlane.xlu0 %375 }
  0xf6   :  { %521 = vadd.xlane.f32.xlu1 %v280_v53  ;;  %v155_v53 = vld [vmem:[#allocation2 + $0x3d8] sm:$0xff] }
  0xf7   :  { %519 = vadd.xlane.f32.xlu0 %v279_v56  ;;  %v4666_v6 = vpop.xlane.xlu1 %381  ;;  %v154_v56 = vld [vmem:[#allocation2 + $0x3d0] sm:$0xff]  ;;  %v290_v63 = vmul.f32 %v4468_v1, %v155_v53  ;;  %v6496_v53 = vlaneseq }
  0xf8   :  { %v4682_v62 = vpop.xlane.xlu0 %379 }
  0xfa   :  { %525 = vadd.xlane.f32.xlu1 %v282_v0  ;;  %v289_v0 = vmul.f32 %v4468_v1, %v154_v56 }
  0xfb   :  { %523 = vadd.xlane.f32.xlu0 %v281_v5  ;;  %v4672_v19 = vpop.xlane.xlu1 %385 }
  0xfe   :  { %529 = vadd.xlane.f32.xlu1 %v284_v14  ;;  %v4688_v14 = vpop.xlane.xlu0 %383 }
  0xff   :  { %527 = vadd.xlane.f32.xlu0 %v283_v18  ;;  %v4678_v44 = vpop.xlane.xlu1 %389  ;;  %v292_v18 = vmul.f32 %v4468_v1, %v157_v8 }
 0x100   :  { %6501 = vst [vmem:[#allocation8_spill] sm:$0xff] %v4678_v44 }
 0x102   :  { %533 = vadd.xlane.f32.xlu1 %v286_v28  ;;  %v158_v28 = vld [vmem:[#allocation2 + $0x3f0] sm:$0xff] }
 0x103   :  { %531 = vadd.xlane.f32.xlu0 %v285_v34  ;;  %v4686_v5 = vpop.xlane.xlu1 %393  ;;  %v293_v41 = vmul.f32 %v4468_v1, %v158_v28  ;;  %v4715_v1 = vld [vmem:[%s6493_s2] sm:$0xff] }
 0x104   :  { %6502 = vst [vmem:[#allocation9_spill] sm:$0xff] %v4686_v5 }
 0x106   :  { %537 = vadd.xlane.f32.xlu1 %v288_v46  ;;  %v4696_v46 = vpop.xlane.xlu0 %387 }
 0x107   :  { %535 = vadd.xlane.f32.xlu0 %v287_v51  ;;  %v4692_v34 = vpop.xlane.xlu1 %397 }
 0x108   :  { %6503 = vst [vmem:[#allocation10_spill] sm:$0xff] %v4692_v34 }
 0x10a   :  { %541 = vadd.xlane.f32.xlu1 %v290_v63  ;;  %v4700_v56 = vpop.xlane.xlu0 %391  ;;  %v4703_v63 = vshrl.u32 %v6496_v53, 7 }
 0x10b   :  { %539 = vadd.xlane.f32.xlu0 %v289_v0  ;;  %v4698_v51 = vpop.xlane.xlu1 %401  ;;  %6505 = vst [vmem:[#allocation12_spill] sm:$0xff] %v4700_v56 }
 0x10c   :  { %6504 = vst [vmem:[#allocation11_spill] sm:$0xff] %v4698_v51  ;;  %6506 = vst [vmem:[#allocation13_spill] sm:$0xff] %v4703_v63  ;;  %v4708_v8 = vsub.s32 0, %v4703_v63  ;;  %v4740_v51 = vcombine.high %v4715_v1, %v4715_v1 }
 0x10e   :  { %545 = vadd.xlane.f32.xlu1 %v292_v18  ;;  %v4710_v11 = vpop.xlane.xlu0 %395 }
 0x10f   :  { %543 = vadd.xlane.f32.xlu0 %v291_v25  ;;  %v4705_v0 = vpop.xlane.xlu1 %405  ;;  %6508 = vst [vmem:[#allocation15_spill] sm:$0xff] %v4710_v11  ;;  %v1478_v25 = vrot.slane %v4715_v1, %v4708_v8 }
 0x110   :  { %6507 = vst [vmem:[#allocation14_spill] sm:$0xff] %v4705_v0 }
 0x112   :  { %549 = vadd.xlane.f32.xlu1 %v294_v35  ;;  %v4721_v26 = vpop.xlane.xlu0 %399  ;;  %v551_v35 = vld [vmem:[%s6491_s0] sm:$0xf]  ;;  %s4427_s0 = smov [#allocation5]  }
 0x113   :  { %547 = vadd.xlane.f32.xlu0 %v293_v41  ;;  %v4717_v18 = vpop.xlane.xlu1 %409  ;;  %6510 = vst [vmem:[#allocation17_spill] sm:$0xff] %v4721_v26  ;;  %s3717_s2 = sshll.u32 %s4427_s0, 4  ;;  %s3718_s2 = int_to_ptr.vmem [resolvable:$true] %s3717_s2 }
 0x114   :  { %6509 = vst [vmem:[#allocation16_spill] sm:$0xff] %v4717_v18  ;;  %s4397_s7 = scalar_lea.vmem %s3718_s2, 128  ;;  %p4402_p9 = scmp.lt.s32.totalorder %s3718_s2, %s3718_s2 }
 0x115   :  { %p4398_p8 = scmp.ne.s32.totalorder %s3718_s2, %s4397_s7  ;;  %p4403_p10 = scmp.lt.s32.totalorder %s4397_s7, %s4397_s7 }
 0x116   :  { %v4728_v41 = vpop.xlane.xlu0 %403 }
 0x117   :  { %v4723_v28 = vpop.xlane.xlu1 %413  ;;  %6512 = vst [vmem:[#allocation19_spill] sm:$0xff] %v4728_v41  ;;  %p4404_p11 = por %p4403_p10, %p4402_p9 }
 0x118   :  { %6511 = vst [vmem:[#allocation18_spill] sm:$0xff] %v4723_v28 }
 0x119   :  { %p4405_p12 = pnand %p4404_p11, %p4398_p8 }
 0x11a   :  { %v4732_v18 = vpop.xlane.xlu0 %407 }
 0x11b   :  { %v4730_v53 = vpop.xlane.xlu1 %417  ;;  %6514 = vst [vmem:[#allocation21_spill] sm:$0xff] %v4732_v18 }
 0x11c   :  { %6513 = vst [vmem:[#allocation20_spill] sm:$0xff] %v4730_v53 }
 0x11e   :  { %v4736_v28 = vpop.xlane.xlu0 %411 }
 0x11f   :  { %v4734_v0 = vpop.xlane.xlu1 %421  ;;  %6516 = vst [vmem:[#allocation23_spill] sm:$0xff] %v4736_v28 }
 0x120   :  { %6515 = vst [vmem:[#allocation22_spill] sm:$0xff] %v4734_v0 }
 0x122   :  { %v4746_v53 = vpop.xlane.xlu0 %415 }
 0x123   :  { %1480 = vbcast.lane.b32.xlu1 %v1478_v25, 256  ;;  %v4742_v41 = vpop.xlane.xlu1 %425  ;;  %6518 = vst [vmem:[#allocation25_spill] sm:$0xff] %v4746_v53 }
 0x124   :  { %6517 = vst [vmem:[#allocation24_spill] sm:$0xff] %v4742_v41 }
 0x126   :  { %v4750_v28 = vpop.xlane.xlu0 %419 }
 0x127   :  { %1484 = vbcast.lane.b32.xlu1 %v1478_v25, 264  ;;  %v4748_v0 = vpop.xlane.xlu1 %429  ;;  %6520 = vst [vmem:[#allocation27_spill] sm:$0xff] %v4750_v28 }
 0x128   :  { %6519 = vst [vmem:[#allocation26_spill] sm:$0xff] %v4748_v0 }
 0x129   :  { %554 = vperm.xlu0 %3860, %v551_v35   ;;  %v1545_v35 = vrot.slane %v4740_v51, %v4708_v8 }
 0x12a   :  { %v4754_v41 = vpop.xlane.xlu0 %423 }
 0x12b   :  { %1488 = vbcast.lane.b32.xlu1 %v1478_v25, 272  ;;  %v4752_v18 = vpop.xlane.xlu1 %433  ;;  %6522 = vst [vmem:[#allocation29_spill] sm:$0xff] %v4754_v41 }
 0x12c   :  { %6521 = vst [vmem:[#allocation28_spill] sm:$0xff] %v4752_v18  ;;  %v4765_v18 = vsub.s32 1, %v4703_v63 }
 0x12d   :  { %1512 = vbcast.lane.b32.xlu0 %v1478_v25, 320 }
 0x12e   :  { %v4758_v53 = vpop.xlane.xlu0 %427 }
 0x12f   :  { %1492 = vbcast.lane.b32.xlu1 %v1478_v25, 280  ;;  %v4756_v26 = vpop.xlane.xlu1 %437  ;;  %6524 = vst [vmem:[#allocation31_spill] sm:$0xff] %v4758_v53 }
 0x130   :  { %6523 = vst [vmem:[#allocation30_spill] sm:$0xff] %v4756_v26  ;;  %v1612_v26 = vrot.slane %v4715_v1, %v4765_v18 }
 0x131   :  { %1520 = vbcast.lane.b32.xlu0 %v1478_v25, 336 }
 0x132   :  { %v4762_v0 = vpop.xlane.xlu0 %431 }
 0x133   :  { %1496 = vbcast.lane.b32.xlu1 %v1478_v25, 288  ;;  %v4760_v34 = vpop.xlane.xlu1 %441  ;;  %6526 = vst [vmem:[#allocation33_spill] sm:$0xff] %v4762_v0 }
 0x134   :  { %6525 = vst [vmem:[#allocation32_spill] sm:$0xff] %v4760_v34 }
 0x135   :  { %1528 = vbcast.lane.b32.xlu0 %v1478_v25, 352 }
 0x136   :  { %v4769_v28 = vpop.xlane.xlu0 %435 }
 0x137   :  { %1500 = vbcast.lane.b32.xlu1 %v1478_v25, 296  ;;  %v4767_v41 = vpop.xlane.xlu1 %445  ;;  %6528 = vst [vmem:[#allocation35_spill] sm:$0xff] %v4769_v28 }
 0x138   :  { %6527 = vst [vmem:[#allocation34_spill] sm:$0xff] %v4767_v41 }
 0x139   :  { %1536 = vbcast.lane.b32.xlu0 %v1478_v25, 368 }
 0x13b   :  { %1504 = vbcast.lane.b32.xlu1 %v1478_v25, 304  ;;  %v4773_v53 = vpop.xlane.xlu1 %449 }
 0x13c   :  { %6529 = vst [vmem:[#allocation36_spill] sm:$0xff] %v4773_v53 }
 0x13d   :  { %1547 = vbcast.lane.b32.xlu0 %v1545_v35, 256 }
 0x13f   :  { %1508 = vbcast.lane.b32.xlu1 %v1478_v25, 312  ;;  %v4777_v34 = vpop.xlane.xlu1 %453 }
 0x140   :  { %6531 = vst [vmem:[#allocation38_spill] sm:$0xff] %v4777_v34 }
 0x141   :  { %1555 = vbcast.lane.b32.xlu0 %v1545_v35, 272 }
 0x143   :  { %1516 = vbcast.lane.b32.xlu1 %v1478_v25, 328  ;;  %v4781_v41 = vpop.xlane.xlu1 %457 }
 0x144   :  { %6533 = vst [vmem:[#allocation40_spill] sm:$0xff] %v4781_v41  ;;  %v1679_v41 = vrot.slane %v4740_v51, %v4765_v18 }
 0x145   :  { %1563 = vbcast.lane.b32.xlu0 %v1545_v35, 288 }
 0x147   :  { %1524 = vbcast.lane.b32.xlu1 %v1478_v25, 344  ;;  %v4785_v53 = vpop.xlane.xlu1 %461 }
 0x148   :  { %6535 = vst [vmem:[#allocation42_spill] sm:$0xff] %v4785_v53 }
 0x149   :  { %1571 = vbcast.lane.b32.xlu0 %v1545_v35, 304 }
 0x14b   :  { %1532 = vbcast.lane.b32.xlu1 %v1478_v25, 360  ;;  %v4789_v11 = vpop.xlane.xlu1 %465 }
 0x14c   :  { %6537 = vst [vmem:[#allocation44_spill] sm:$0xff] %v4789_v11 }
 0x14d   :  { %1579 = vbcast.lane.b32.xlu0 %v1545_v35, 320 }
 0x14f   :  { %1540 = vbcast.lane.b32.xlu1 %v1478_v25, 376  ;;  %v4775_v25 = vpop.xlane.xlu0 %439 }
 0x150   :  { %6530 = vst [vmem:[#allocation37_spill] sm:$0xff] %v4775_v25 }
 0x151   :  { %1587 = vbcast.lane.b32.xlu0 %v1545_v35, 336 }
 0x153   :  { %1551 = vbcast.lane.b32.xlu1 %v1545_v35, 264  ;;  %v4779_v0 = vpop.xlane.xlu0 %443 }
 0x154   :  { %6532 = vst [vmem:[#allocation39_spill] sm:$0xff] %v4779_v0 }
 0x155   :  { %1595 = vbcast.lane.b32.xlu0 %v1545_v35, 352 }
 0x157   :  { %1559 = vbcast.lane.b32.xlu1 %v1545_v35, 280  ;;  %v4783_v28 = vpop.xlane.xlu0 %447 }
 0x158   :  { %6534 = vst [vmem:[#allocation41_spill] sm:$0xff] %v4783_v28  ;;  %v4795_v28 = vpop.xlane.xlu1 %469 }
 0x159   :  { %1603 = vbcast.lane.b32.xlu0 %v1545_v35, 368  ;;  %6539 = vst [vmem:[#allocation46_spill] sm:$0xff] %v4795_v28 }
 0x15b   :  { %1567 = vbcast.lane.b32.xlu1 %v1545_v35, 296  ;;  %v4787_v25 = vpop.xlane.xlu0 %451 }
 0x15c   :  { %6536 = vst [vmem:[#allocation43_spill] sm:$0xff] %v4787_v25 }
 0x15d   :  { %1614 = vbcast.lane.b32.xlu0 %v1612_v26, 256 }
 0x15f   :  { %1575 = vbcast.lane.b32.xlu1 %v1545_v35, 312  ;;  %v4791_v34 = vpop.xlane.xlu0 %455 }
 0x160   :  { %6538 = vst [vmem:[#allocation45_spill] sm:$0xff] %v4791_v34 }
 0x161   :  { %1622 = vbcast.lane.b32.xlu0 %v1612_v26, 272 }
 0x163   :  { %1583 = vbcast.lane.b32.xlu1 %v1545_v35, 328  ;;  %v4797_v0 = vpop.xlane.xlu0 %459 }
 0x164   :  { %6540 = vst [vmem:[#allocation47_spill] sm:$0xff] %v4797_v0 }
 0x165   :  { %1630 = vbcast.lane.b32.xlu0 %v1612_v26, 288 }
 0x167   :  { %1591 = vbcast.lane.b32.xlu1 %v1545_v35, 344  ;;  %v4801_v11 = vpop.xlane.xlu0 %463 }
 0x168   :  { %6542 = vst [vmem:[#allocation49_spill] sm:$0xff] %v4801_v11 }
 0x169   :  { %1638 = vbcast.lane.b32.xlu0 %v1612_v26, 304 }
 0x16b   :  { %1599 = vbcast.lane.b32.xlu1 %v1545_v35, 360  ;;  %v4805_v34 = vpop.xlane.xlu0 %467 }
 0x16c   :  { %6544 = vst [vmem:[#allocation51_spill] sm:$0xff] %v4805_v34 }
 0x16d   :  { %1646 = vbcast.lane.b32.xlu0 %v1612_v26, 320 }
 0x16f   :  { %1607 = vbcast.lane.b32.xlu1 %v1545_v35, 376  ;;  %v4799_v35 = vpop.xlane.xlu1 %473  ;;  %v4809_v28 = vpop.xlane.xlu0 %471 }
 0x170   :  { %6541 = vst [vmem:[#allocation48_spill] sm:$0xff] %v4799_v35  ;;  %6546 = vst [vmem:[#allocation53_spill] sm:$0xff] %v4809_v28 }
 0x171   :  { %1654 = vbcast.lane.b32.xlu0 %v1612_v26, 336 }
 0x173   :  { %1618 = vbcast.lane.b32.xlu1 %v1612_v26, 264  ;;  %v4803_v53 = vpop.xlane.xlu1 %477  ;;  %v4813_v11 = vpop.xlane.xlu0 %475 }
 0x174   :  { %6543 = vst [vmem:[#allocation50_spill] sm:$0xff] %v4803_v53  ;;  %6548 = vst [vmem:[#allocation55_spill] sm:$0xff] %v4813_v11  ;;  %v4816_v53 = vsub.s32 2, %v4703_v63 }
 0x175   :  { %1662 = vbcast.lane.b32.xlu0 %v1612_v26, 352 }
 0x176   :  { %6549 = vst [vmem:[#allocation56_spill] sm:$0xff] %v4816_v53 }
 0x177   :  { %1626 = vbcast.lane.b32.xlu1 %v1612_v26, 280  ;;  %v4807_v25 = vpop.xlane.xlu1 %481  ;;  %v4822_v34 = vpop.xlane.xlu0 %479 }
 0x178   :  { %6545 = vst [vmem:[#allocation52_spill] sm:$0xff] %v4807_v25  ;;  %v1746_v25 = vrot.slane %v4715_v1, %v4816_v53  ;;  %6551 = vst [vmem:[#allocation58_spill] sm:$0xff] %v4822_v34 }
 0x179   :  { %1670 = vbcast.lane.b32.xlu0 %v1612_v26, 368 }
 0x17b   :  { %1634 = vbcast.lane.b32.xlu1 %v1612_v26, 296  ;;  %v4811_v35 = vpop.xlane.xlu1 %485 }
 0x17c   :  { %6547 = vst [vmem:[#allocation54_spill] sm:$0xff] %v4811_v35  ;;  %v4826_v35 = vpop.xlane.xlu0 %483 }
 0x17d   :  { %1681 = vbcast.lane.b32.xlu0 %v1679_v41, 256  ;;  %6553 = vst [vmem:[#allocation60_spill] sm:$0xff] %v4826_v35 }
 0x17f   :  { %1642 = vbcast.lane.b32.xlu1 %v1612_v26, 312  ;;  %v4818_v0 = vpop.xlane.xlu1 %489 }
 0x180   :  { %6550 = vst [vmem:[#allocation57_spill] sm:$0xff] %v4818_v0  ;;  %v4830_v0 = vpop.xlane.xlu0 %487 }
 0x181   :  { %1689 = vbcast.lane.b32.xlu0 %v1679_v41, 272  ;;  %6555 = vst [vmem:[#allocation62_spill] sm:$0xff] %v4830_v0 }
 0x183   :  { %1650 = vbcast.lane.b32.xlu1 %v1612_v26, 328 }
 0x184   :  { %v4834_v34 = vpop.xlane.xlu0 %491 }
 0x185   :  { %1697 = vbcast.lane.b32.xlu0 %v1679_v41, 288  ;;  %6557 = vst [vmem:[#allocation64_spill] sm:$0xff] %v4834_v34 }
 0x187   :  { %1658 = vbcast.lane.b32.xlu1 %v1612_v26, 344 }
 0x189   :  { %1705 = vbcast.lane.b32.xlu0 %v1679_v41, 304 }
 0x18b   :  { %1666 = vbcast.lane.b32.xlu1 %v1612_v26, 360 }
 0x18d   :  { %1713 = vbcast.lane.b32.xlu0 %v1679_v41, 320 }
 0x18f   :  { %1674 = vbcast.lane.b32.xlu1 %v1612_v26, 376  ;;  %v4824_v26 = vpop.xlane.xlu1 %493 }
 0x190   :  { %6552 = vst [vmem:[#allocation59_spill] sm:$0xff] %v4824_v26  ;;  %v4838_v26 = vpop.xlane.xlu0 %495 }
 0x191   :  { %1721 = vbcast.lane.b32.xlu0 %v1679_v41, 336  ;;  %6559 = vst [vmem:[#allocation66_spill] sm:$0xff] %v4838_v26 }
 0x193   :  { %1685 = vbcast.lane.b32.xlu1 %v1679_v41, 264  ;;  %v4828_v11 = vpop.xlane.xlu1 %497 }
 0x194   :  { %6554 = vst [vmem:[#allocation61_spill] sm:$0xff] %v4828_v11  ;;  %v4842_v0 = vpop.xlane.xlu0 %499 }
 0x195   :  { %1729 = vbcast.lane.b32.xlu0 %v1679_v41, 352  ;;  %6561 = vst [vmem:[#allocation68_spill] sm:$0xff] %v4842_v0 }
 0x197   :  { %1693 = vbcast.lane.b32.xlu1 %v1679_v41, 280  ;;  %v4832_v28 = vpop.xlane.xlu1 %501 }
 0x198   :  { %6556 = vst [vmem:[#allocation63_spill] sm:$0xff] %v4832_v28 }
 0x199   :  { %1737 = vbcast.lane.b32.xlu0 %v1679_v41, 368 }
 0x19b   :  { %1701 = vbcast.lane.b32.xlu1 %v1679_v41, 296  ;;  %v4836_v5 = vpop.xlane.xlu1 %505 }
 0x19c   :  { %6558 = vst [vmem:[#allocation65_spill] sm:$0xff] %v4836_v5 }
 0x19d   :  { %1748 = vbcast.lane.b32.xlu0 %v1746_v25, 256 }
 0x19f   :  { %1709 = vbcast.lane.b32.xlu1 %v1679_v41, 312  ;;  %v4840_v11 = vpop.xlane.xlu1 %509 }
 0x1a0   :  { %6560 = vst [vmem:[#allocation67_spill] sm:$0xff] %v4840_v11 }
 0x1a1   :  { %1756 = vbcast.lane.b32.xlu0 %v1746_v25, 272 }
 0x1a3   :  { %1717 = vbcast.lane.b32.xlu1 %v1679_v41, 328  ;;  %v4844_v35 = vpop.xlane.xlu1 %513 }
 0x1a4   :  { %6562 = vst [vmem:[#allocation69_spill] sm:$0xff] %v4844_v35 }
 0x1a5   :  { %1764 = vbcast.lane.b32.xlu0 %v1746_v25, 288 }
 0x1a7   :  { %1725 = vbcast.lane.b32.xlu1 %v1679_v41, 344  ;;  %v4846_v28 = vpop.xlane.xlu1 %517 }
 0x1a8   :  { %6563 = vst [vmem:[#allocation70_spill] sm:$0xff] %v4846_v28 }
 0x1a9   :  { %1772 = vbcast.lane.b32.xlu0 %v1746_v25, 304 }
 0x1ab   :  { %1733 = vbcast.lane.b32.xlu1 %v1679_v41, 360  ;;  %v4848_v5 = vpop.xlane.xlu1 %521 }
 0x1ac   :  { %6564 = vst [vmem:[#allocation71_spill] sm:$0xff] %v4848_v5 }
 0x1ad   :  { %1780 = vbcast.lane.b32.xlu0 %v1746_v25, 320 }
 0x1af   :  { %1741 = vbcast.lane.b32.xlu1 %v1679_v41, 376  ;;  %v4850_v41 = vpop.xlane.xlu0 %503  ;;  %v4854_v34 = vpop.xlane.xlu1 %525 }
 0x1b0   :  { %6565 = vst [vmem:[#allocation72_spill] sm:$0xff] %v4850_v41  ;;  %6567 = vst [vmem:[#allocation74_spill] sm:$0xff] %v4854_v34 }
 0x1b1   :  { %1788 = vbcast.lane.b32.xlu0 %v1746_v25, 336 }
 0x1b3   :  { %1752 = vbcast.lane.b32.xlu1 %v1746_v25, 264  ;;  %v4852_v26 = vpop.xlane.xlu0 %507  ;;  %v4858_v0 = vpop.xlane.xlu1 %529 }
 0x1b4   :  { %6566 = vst [vmem:[#allocation73_spill] sm:$0xff] %v4852_v26  ;;  %6569 = vst [vmem:[#allocation76_spill] sm:$0xff] %v4858_v0 }
 0x1b5   :  { %1796 = vbcast.lane.b32.xlu0 %v1746_v25, 352 }
 0x1b7   :  { %1760 = vbcast.lane.b32.xlu1 %v1746_v25, 280  ;;  %v4856_v11 = vpop.xlane.xlu0 %511  ;;  %v4866_v5 = vpop.xlane.xlu1 %533 }
 0x1b8   :  { %6568 = vst [vmem:[#allocation75_spill] sm:$0xff] %v4856_v11  ;;  %6573 = vst [vmem:[#allocation80_spill] sm:$0xff] %v4866_v5 }
 0x1b9   :  { %1804 = vbcast.lane.b32.xlu0 %v1746_v25, 368 }
 0x1bb   :  { %1768 = vbcast.lane.b32.xlu1 %v1746_v25, 296  ;;  %v4860_v35 = vpop.xlane.xlu0 %515  ;;  %v4870_v41 = vpop.xlane.xlu1 %537 }
 0x1bc   :  { %6570 = vst [vmem:[#allocation77_spill] sm:$0xff] %v4860_v35  ;;  %6575 = vst [vmem:[#allocation82_spill] sm:$0xff] %v4870_v41 }
 0x1bf   :  { %1776 = vbcast.lane.b32.xlu1 %v1746_v25, 312  ;;  %v4862_v56 = vpop.xlane.xlu0 %519  ;;  %v4874_v34 = vpop.xlane.xlu1 %541 }
 0x1c0   :  { %6571 = vst [vmem:[#allocation78_spill] sm:$0xff] %v4862_v56  ;;  %6577 = vst [vmem:[#allocation84_spill] sm:$0xff] %v4874_v34 }
 0x1c3   :  { %1784 = vbcast.lane.b32.xlu1 %v1746_v25, 328  ;;  %v4864_v28 = vpop.xlane.xlu0 %523  ;;  %v4878_v0 = vpop.xlane.xlu1 %545 }
 0x1c4   :  { %6572 = vst [vmem:[#allocation79_spill] sm:$0xff] %v4864_v28  ;;  %6579 = vst [vmem:[#allocation86_spill] sm:$0xff] %v4878_v0 }
 0x1c7   :  { %1792 = vbcast.lane.b32.xlu1 %v1746_v25, 344  ;;  %v4868_v44 = vpop.xlane.xlu0 %527  ;;  %v4882_v35 = vpop.xlane.xlu1 %549 }
 0x1c8   :  { %6574 = vst [vmem:[#allocation81_spill] sm:$0xff] %v4868_v44  ;;  %6581 = vst [vmem:[#allocation88_spill] sm:$0xff] %v4882_v35 }
 0x1cb   :  { %1800 = vbcast.lane.b32.xlu1 %v1746_v25, 360  ;;  %v4872_v26 = vpop.xlane.xlu0 %531  ;;  %v4886_v28 = vpop.permute.xlu1 %1480 }
 0x1cc   :  { %6576 = vst [vmem:[#allocation83_spill] sm:$0xff] %v4872_v26  ;;  %6583 = vst [vmem:[#allocation90_spill] sm:$0xff] %v4886_v28 }
 0x1cf   :  { %1808 = vbcast.lane.b32.xlu1 %v1746_v25, 376  ;;  %v4876_v11 = vpop.xlane.xlu0 %535  ;;  %v4890_v44 = vpop.permute.xlu1 %1484 }
 0x1d0   :  { %6578 = vst [vmem:[#allocation85_spill] sm:$0xff] %v4876_v11  ;;  %6585 = vst [vmem:[#allocation92_spill] sm:$0xff] %v4890_v44 }
 0x1d3   :  { %v4880_v25 = vpop.xlane.xlu0 %539  ;;  %v4894_v26 = vpop.permute.xlu1 %1488 }
 0x1d4   :  { %6580 = vst [vmem:[#allocation87_spill] sm:$0xff] %v4880_v25  ;;  %6586 = vst [vmem:[#allocation93_spill] sm:$0xff] %v4894_v26 }
 0x1d7   :  { %v4884_v56 = vpop.xlane.xlu0 %543  ;;  %v4898_v11 = vpop.permute.xlu1 %1492 }
 0x1d8   :  { %6582 = vst [vmem:[#allocation89_spill] sm:$0xff] %v4884_v56  ;;  %6588 = vst [vmem:[#allocation95_spill] sm:$0xff] %v4898_v11 }
 0x1db   :  { %v4888_v5 = vpop.xlane.xlu0 %547  ;;  %v4902_v25 = vpop.permute.xlu1 %1496 }
 0x1dc   :  { %6584 = vst [vmem:[#allocation91_spill] sm:$0xff] %v4888_v5  ;;  %6590 = vst [vmem:[#allocation97_spill] sm:$0xff] %v4902_v25  ;;  %v4912_v5 = vrot.slane %v4740_v51, %v4816_v53 }
 0x1de   :  { %1815 = vbcast.lane.b32.xlu0 %v4912_v5, 256  ;;  %1819 = vbcast.lane.b32.xlu1 %v4912_v5, 264 }
 0x1df   :  { %v4892_v41 = vpop.permute.xlu0 %554  ;;  %v4906_v56 = vpop.permute.xlu1 %1500 }
 0x1e0   :  { %6592 = vst [vmem:[#allocation99_spill] sm:$0xff] %v4906_v56 }
 0x1e2   :  { %1823 = vbcast.lane.b32.xlu0 %v4912_v5, 272  ;;  %1827 = vbcast.lane.b32.xlu1 %v4912_v5, 280 }
 0x1e3   :  { %v4896_v34 = vpop.permute.xlu0 %1512  ;;  %v4914_v44 = vpop.permute.xlu1 %1504 }
 0x1e4   :  { %6587 = vst [vmem:[#allocation94_spill] sm:$0xff] %v4896_v34  ;;  %6594 = vst [vmem:[#allocation101_spill] sm:$0xff] %v4914_v44  ;;  %v4920_v34 = vrot.slane %v4892_v41, %v4708_v8 }
 0x1e6   :  { %v578_v8 = vadd.f32 %v4920_v34, %v4544_v23  ;;  %v579_v44 = vadd.f32 %v4920_v34, %v4550_v30  ;;  %1831 = vbcast.lane.b32.xlu0 %v4912_v5, 288  ;;  %1835 = vbcast.lane.b32.xlu1 %v4912_v5, 296  ;;  %v582_v23 = vadd.f32 %v4920_v34, %v4564_v43 }
 0x1e7   :  { %v4900_v0 = vpop.permute.xlu0 %1520 }
 0x1e8   :  { %6589 = vst [vmem:[#allocation96_spill] sm:$0xff] %v4900_v0  ;;  %v3729_v30 = vmul.f32 -1.442695, %v578_v8 }
 0x1ea   :  { %1839 = vbcast.lane.b32.xlu0 %v4912_v5, 304  ;;  %1843 = vbcast.lane.b32.xlu1 %v4912_v5, 312 }
 0x1eb   :  { %v4904_v35 = vpop.permute.xlu0 %1528 }
 0x1ec   :  { %6591 = vst [vmem:[#allocation98_spill] sm:$0xff] %v4904_v35  ;;  %v4924_v35 = vpop.permute.xlu1 %1508 }
 0x1ed   :  { %6596 = vst [vmem:[#allocation103_spill] sm:$0xff] %v4924_v35 }
 0x1ee   :  { %1847 = vbcast.lane.b32.xlu0 %v4912_v5, 320  ;;  %1851 = vbcast.lane.b32.xlu1 %v4912_v5, 328 }
 0x1ef   :  { %v4908_v28 = vpop.permute.xlu0 %1536 }
 0x1f0   :  { %6593 = vst [vmem:[#allocation100_spill] sm:$0xff] %v4908_v28  ;;  %v576_v28 = vadd.f32 %v4920_v34, %v4546_v24  ;;  %v4938_v56 = vpop.permute.xlu1 %1516  ;;  %v580_v24 = vadd.f32 %v4920_v34, %v4558_v37 }
 0x1f1   :  { %6598 = vst [vmem:[#allocation105_spill] sm:$0xff] %v4938_v56  ;;  %v583_v56 = vadd.f32 %v4920_v34, %v4562_v42  ;;  %v586_v42 = vadd.f32 %v4920_v34, %v4576_v55  ;;  %v589_v55 = vadd.f32 %v4920_v34, %v4580_v60 }
 0x1f2   :  { %v3731_v53 = vmul.f32 -1.442695, %v580_v24  ;;  %v588_v24 = vadd.f32 %v4920_v34, %v4582_v61  ;;  %1855 = vbcast.lane.b32.xlu0 %v4912_v5, 336  ;;  %1859 = vbcast.lane.b32.xlu1 %v4912_v5, 344 }
 0x1f3   :  { %v4916_v26 = vpop.permute.xlu0 %1547 }
 0x1f4   :  { %6595 = vst [vmem:[#allocation102_spill] sm:$0xff] %v4916_v26  ;;  %v577_v26 = vadd.f32 %v4920_v34, %v4552_v31  ;;  %v581_v31 = vadd.f32 %v4920_v34, %v4556_v36  ;;  %v4952_v11 = vpop.permute.xlu1 %1524  ;;  %v585_v36 = vadd.f32 %v4920_v34, %v4568_v48  ;;  %v3739_v60 = vmul.f32 -1.442695, %v588_v24 }
 0x1f6   :  { %v3728_v25 = vmul.f32 -1.442695, %v577_v26  ;;  %v3732_v43 = vmul.f32 -1.442695, %v581_v31  ;;  %v587_v26 = vadd.f32 %v4920_v34, %v4574_v54  ;;  %v590_v54 = vadd.f32 %v4920_v34, %v4588_v4  ;;  %1863 = vbcast.lane.b32.xlu0 %v4912_v5, 352  ;;  %1867 = vbcast.lane.b32.xlu1 %v4912_v5, 360 }
 0x1f7   :  { %v4926_v0 = vpop.permute.xlu0 %1555  ;;  %v593_v4 = vadd.f32 %v4920_v34, %v4592_v9 }
 0x1f8   :  { %6597 = vst [vmem:[#allocation104_spill] sm:$0xff] %v4926_v0  ;;  %v3727_v0 = vmul.f32 -1.442695, %v576_v28  ;;  %v584_v28 = vadd.f32 %v4920_v34, %v4570_v49  ;;  %v3734_v49 = vmul.f32 -1.442695, %v583_v56 }
 0x1f9   :  { %v3737_v56 = vmul.f32 -1.442695, %v586_v42  ;;  %v3738_v61 = vmul.f32 -1.442695, %v587_v26 }
 0x1fa   :  { %3863 = vpow2.f32 %v3727_v0  ;;  %v4966_v0 = vpop.permute.xlu1 %1532  ;;  %v3735_v48 = vmul.f32 -1.442695, %v584_v28  ;;  %v594_v28 = vadd.f32 %v4920_v34, %v4600_v16  ;;  %1871 = vbcast.lane.b32.xlu0 %v4912_v5, 368  ;;  %1875 = vbcast.lane.b32.xlu1 %v4912_v5, 376 }
 0x1fb   :  { %v4940_v35 = vpop.permute.xlu0 %1563  ;;  %3865 = vpow2.f32 %v3728_v25  ;;  %v3736_v25 = vmul.f32 -1.442695, %v585_v36  ;;  %v3741_v36 = vmul.f32 -1.442695, %v590_v54 }
 0x1fc   :  { %6599 = vst [vmem:[#allocation106_spill] sm:$0xff] %v4940_v35  ;;  %v3730_v35 = vmul.f32 -1.442695, %v579_v44  ;;  %v3733_v44 = vmul.f32 -1.442695, %v582_v23  ;;  %3867 = vpow2.f32 %v3729_v30  ;;  %v592_v23 = vadd.f32 %v4920_v34, %v4594_v10 }
 0x1fd   :  { %v3740_v30 = vmul.f32 -1.442695, %v589_v55  ;;  %v595_v10 = vadd.f32 %v4920_v34, %v4598_v15  ;;  %v597_v15 = vadd.f32 %v4920_v34, %v4604_v21  ;;  %v3745_v54 = vmul.f32 -1.442695, %v594_v28 }
 0x1fe   :  { %3869 = vpow2.f32 %v3730_v35  ;;  %v591_v35 = vadd.f32 %v4920_v34, %v4586_v3  ;;  %v3743_v24 = vmul.f32 -1.442695, %v592_v23  ;;  %v601_v28 = vadd.f32 %v4920_v34, %v4616_v39 }
 0x1ff   :  { %v4954_v37 = vpop.permute.xlu0 %1571  ;;  %3871 = vpow2.f32 %v3731_v53  ;;  %v4980_v53 = vpop.permute.xlu1 %1540 }
 0x200   :  { %3873 = vpow2.f32 %v3732_v43  ;;  %v3742_v42 = vmul.f32 -1.442695, %v591_v35  ;;  %v599_v35 = vadd.f32 %v4920_v34, %v4610_v29 }
 0x201   :  { %3875 = vpow2.f32 %v3733_v44 }
 0x202   :  { %3877 = vpow2.f32 %v3734_v49  ;;  %v596_v49 = vadd.f32 %v4920_v34, %v4606_v22  ;;  %v598_v22 = vadd.f32 %v4920_v34, %v4612_v32  ;;  %v3750_v5 = vmul.f32 -1.442695, %v599_v35 }
 0x203   :  { %v4968_v8 = vpop.permute.xlu0 %1579  ;;  %3879 = vpow2.f32 %v3735_v48  ;;  %v4998_v44 = vpop.permute.xlu1 %1551  ;;  %v3744_v48 = vmul.f32 -1.442695, %v593_v4  ;;  %v600_v4 = vadd.f32 %v4920_v34, %v4618_v40  ;;  %v602_v40 = vadd.f32 %v4920_v34, %v4624_v50 }
 0x204   :  { %6600 = vst [vmem:[#allocation107_spill] sm:$0xff] %v4968_v8  ;;  %3881 = vpow2.f32 %v3736_v25  ;;  %v4990_v3 = vpop.eup %3863  ;;  %v5015_v25 = vsub.s32 3, %v4703_v63  ;;  %v604_v50 = vadd.f32 %v4920_v34, %v4630_v58 }
 0x205   :  { %3883 = vpow2.f32 %v3737_v56  ;;  %v4994_v43 = vpop.eup %3865 }
 0x206   :  { %3885 = vpow2.f32 %v3738_v61  ;;  %v5002_v9 = vpop.eup %3867  ;;  %v3746_v61 = vmul.f32 -1.442695, %v595_v10  ;;  %v5034_v32 = vrot.slane %v4715_v1, %v5015_v25  ;;  %v603_v1 = vadd.f32 %v4920_v34, %v4622_v47 }
 0x207   :  { %v4982_v31 = vpop.permute.xlu0 %1587  ;;  %3887 = vpow2.f32 %v3739_v60  ;;  %v5023_v21 = vpop.permute.xlu1 %1559 }
 0x208   :  { %6601 = vst [vmem:[#allocation108_spill] sm:$0xff] %v4982_v31  ;;  %v5008_v16 = vpop.eup %3869  ;;  %3889 = vpow2.f32 %v3740_v30  ;;  %v3747_v30 = vmul.f32 -1.442695, %v596_v49  ;;  %1882 = vbcast.lane.b32.xlu0 %v5034_v32, 256  ;;  %1886 = vbcast.lane.b32.xlu1 %v5034_v32, 264 }
 0x209   :  { %v5012_v55 = vpop.eup %3871  ;;  %3891 = vpow2.f32 %v3741_v36  ;;  %v3748_v36 = vmul.f32 -1.442695, %v597_v15  ;;  %v5057_v15 = vrot.slane %v4892_v41, %v4765_v18  ;;  %v606_v18 = vadd.f32 %v4920_v34, %v4636_v7 }
 0x20a   :  { %v5019_v56 = vpop.eup %3873  ;;  %3893 = vpow2.f32 %v3742_v42  ;;  %v3749_v42 = vmul.f32 -1.442695, %v598_v22  ;;  %v605_v22 = vadd.f32 %v4920_v34, %v4628_v57 }
 0x20b   :  { %v5000_v26 = vpop.permute.xlu0 %1595  ;;  %v5027_v60 = vpop.eup %3875  ;;  %3895 = vpow2.f32 %v3743_v24 }
 0x20c   :  { %6602 = vst [vmem:[#allocation109_spill] sm:$0xff] %v5000_v26  ;;  %v5037_v29 = vpop.eup %3877  ;;  %3897 = vpow2.f32 %v3744_v48  ;;  %v5049_v24 = vpop.permute.xlu1 %1567  ;;  %v3751_v48 = vmul.f32 -1.442695, %v600_v4  ;;  %v607_v4 = vadd.f32 %v4920_v34, %v4634_v2  ;;  %1890 = vbcast.lane.b32.xlu0 %v5034_v32, 272  ;;  %1894 = vbcast.lane.b32.xlu1 %v5034_v32, 280  ;;  %v609_v2 = vadd.f32 %v5057_v15, %v4640_v12 }
 0x20d   :  { %v5041_v10 = vpop.eup %3879  ;;  %3899 = vpow2.f32 %v3745_v54  ;;  %v3752_v54 = vmul.f32 -1.442695, %v601_v28  ;;  %v608_v28 = vadd.f32 %v5057_v15, %v4642_v17  ;;  %v3756_v34 = vmul.f32 -1.442695, %v605_v22 }
 0x20e   :  { %v5045_v49 = vpop.eup %3881  ;;  %3901 = vpow2.f32 %v3746_v61  ;;  %v3753_v61 = vmul.f32 -1.442695, %v602_v40  ;;  %v612_v22 = vadd.f32 %v5057_v15, %v4658_v52 }
 0x20f   :  { %v5025_v23 = vpop.permute.xlu0 %1603  ;;  %v5053_v39 = vpop.eup %3883  ;;  %3903 = vpow2.f32 %v3747_v30  ;;  %v3754_v30 = vmul.f32 -1.442695, %v603_v1  ;;  %v3757_v1 = vmul.f32 -1.442695, %v606_v18  ;;  %v3760_v18 = vmul.f32 -1.442695, %v609_v2 }
 0x210   :  { %6603 = vst [vmem:[#allocation110_spill] sm:$0xff] %v5025_v23  ;;  %v5063_v47 = vpop.eup %3885  ;;  %3905 = vpow2.f32 %v3748_v36  ;;  %v3755_v36 = vmul.f32 -1.442695, %v604_v50  ;;  %v3758_v50 = vmul.f32 -1.442695, %v607_v4  ;;  %1898 = vbcast.lane.b32.xlu0 %v5034_v32, 288  ;;  %v614_v4 = vadd.f32 %v5057_v15, %v4668_v13 }
 0x211   :  { %v5067_v35 = vpop.eup %3887  ;;  %3907 = vpow2.f32 %v3749_v42  ;;  %v610_v42 = vadd.f32 %v5057_v15, %v4652_v38  ;;  %1902 = vbcast.lane.b32.xlu1 %v5034_v32, 296  ;;  %v616_v2 = vadd.f32 %v5057_v15, %v4674_v27 }
 0x212   :  { %v5071_v58 = vpop.eup %3889  ;;  %3909 = vpow2.f32 %v3750_v5  ;;  %v611_v5 = vadd.f32 %v5057_v15, %v4646_v20  ;;  %v613_v20 = vadd.f32 %v5057_v15, %v4650_v33 }
 0x213   :  { %v5051_v63 = vpop.permute.xlu0 %1614  ;;  %v5079_v57 = vpop.eup %3891  ;;  %3911 = vpow2.f32 %v3751_v48 }
 0x214   :  { %6604 = vst [vmem:[#allocation111_spill] sm:$0xff] %v5051_v63  ;;  %v5075_v63 = vpop.permute.xlu1 %1575  ;;  %v5085_v7 = vpop.eup %3893  ;;  %3913 = vpow2.f32 %v3752_v54  ;;  %v3759_v54 = vmul.f32 -1.442695, %v608_v28  ;;  %v615_v28 = vadd.f32 %v5057_v15, %v4656_v45  ;;  %1906 = vbcast.lane.b32.xlu0 %v5034_v32, 304  ;;  %v617_v45 = vadd.f32 %v5057_v15, %v4662_v59 }
 0x215   :  { %6605 = vst [vmem:[#allocation112_spill] sm:$0xff] %v5075_v63  ;;  %v5089_v40 = vpop.eup %3895  ;;  %3915 = vpow2.f32 %v3753_v61  ;;  %1910 = vbcast.lane.b32.xlu1 %v5034_v32, 312 }
 0x216   :  { %v5093_v17 = vpop.eup %3897  ;;  %3917 = vpow2.f32 %v3754_v30  ;;  %v3761_v30 = vmul.f32 -1.442695, %v610_v42  ;;  %v3764_v42 = vmul.f32 -1.442695, %v613_v20  ;;  %v620_v20 = vadd.f32 %v5057_v15, %v4688_v14 }
 0x217   :  { %v5077_v23 = vpop.permute.xlu0 %1622  ;;  %v5101_v12 = vpop.eup %3899  ;;  %3919 = vpow2.f32 %v3755_v36  ;;  %v3762_v36 = vmul.f32 -1.442695, %v611_v5  ;;  %v618_v5 = vadd.f32 %v5057_v15, %v4682_v62 }
 0x218   :  { %6606 = vst [vmem:[#allocation113_spill] sm:$0xff] %v5077_v23  ;;  %v5097_v48 = vpop.permute.xlu1 %1583  ;;  %v5107_v38 = vpop.eup %3901  ;;  %3921 = vpow2.f32 %v3756_v34  ;;  %v3763_v34 = vmul.f32 -1.442695, %v612_v22  ;;  %v619_v22 = vadd.f32 %v5057_v15, %v4666_v6  ;;  %1914 = vbcast.lane.b32.xlu0 %v5034_v32, 320  ;;  %v621_v6 = vadd.f32 %v5057_v15, %v4672_v19 }
 0x219   :  { %6607 = vst [vmem:[#allocation114_spill] sm:$0xff] %v5097_v48  ;;  %v5111_v61 = vpop.eup %3903  ;;  %3923 = vpow2.f32 %v3757_v1  ;;  %1918 = vbcast.lane.b32.xlu1 %v5034_v32, 328  ;;  %v3771_v48 = vmul.f32 -1.442695, %v620_v20 }
 0x21a   :  { %v5115_v52 = vpop.eup %3905  ;;  %3925 = vpow2.f32 %v3758_v50  ;;  %v3765_v50 = vmul.f32 -1.442695, %v614_v4  ;;  %v3768_v4 = vmul.f32 -1.442695, %v617_v45  ;;  %v6616_v45 = vld [vmem:[#allocation12_spill] sm:$0xff] }
 0x21b   :  { %v5099_v23 = vpop.permute.xlu0 %1630  ;;  %v5123_v33 = vpop.eup %3907  ;;  %3927 = vpow2.f32 %v3759_v54  ;;  %v3766_v54 = vmul.f32 -1.442695, %v615_v28  ;;  %v622_v28 = vadd.f32 %v5057_v15, %v4696_v46 }
 0x21c   :  { %6608 = vst [vmem:[#allocation115_spill] sm:$0xff] %v5099_v23  ;;  %v5119_v23 = vpop.permute.xlu1 %1591  ;;  %v5129_v13 = vpop.eup %3909  ;;  %3929 = vpow2.f32 %v3760_v18  ;;  %v3767_v18 = vmul.f32 -1.442695, %v616_v2  ;;  %v6613_v2 = vld [vmem:[#allocation8_spill] sm:$0xff]  ;;  %1922 = vbcast.lane.b32.xlu0 %v5034_v32, 336 }
 0x21d   :  { %6609 = vst [vmem:[#allocation116_spill] sm:$0xff] %v5119_v23  ;;  %v5133_v1 = vpop.eup %3911  ;;  %3931 = vpow2.f32 %v3761_v30  ;;  %1926 = vbcast.lane.b32.xlu1 %v5034_v32, 344 }
 0x21e   :  { %v5137_v27 = vpop.eup %3913  ;;  %3933 = vpow2.f32 %v3762_v36  ;;  %v3769_v36 = vmul.f32 -1.442695, %v618_v5  ;;  %v6618_v5 = vld [vmem:[#allocation9_spill] sm:$0xff] }
 0x21f   :  { %v5121_v26 = vpop.permute.xlu0 %1638  ;;  %v5145_v59 = vpop.eup %3915  ;;  %3935 = vpow2.f32 %v3763_v34  ;;  %v623_v34 = vadd.f32 %v5057_v15, %v6613_v2  ;;  %v6620_v2 = vld [vmem:[#allocation15_spill] sm:$0xff] }
 0x220   :  { %6610 = vst [vmem:[#allocation117_spill] sm:$0xff] %v5121_v26  ;;  %v5141_v26 = vpop.permute.xlu1 %1599  ;;  %v5151_v62 = vpop.eup %3917  ;;  %3937 = vpow2.f32 %v3764_v42  ;;  %v624_v42 = vadd.f32 %v5057_v15, %v6616_v45  ;;  %1930 = vbcast.lane.b32.xlu0 %v5034_v32, 352 }
 0x221   :  { %6611 = vst [vmem:[#allocation118_spill] sm:$0xff] %v5141_v26  ;;  %v5155_v30 = vpop.eup %3919  ;;  %3939 = vpow2.f32 %v3765_v50  ;;  %v625_v50 = vadd.f32 %v5057_v15, %v6618_v5  ;;  %v3774_v8 = vmul.f32 -1.442695, %v623_v34  ;;  %1934 = vbcast.lane.b32.xlu1 %v5034_v32, 360 }
 0x222   :  { %v5159_v14 = vpop.eup %3921  ;;  %3941 = vpow2.f32 %v3766_v54 }
 0x223   :  { %v5143_v23 = vpop.permute.xlu0 %1646  ;;  %v5167_v19 = vpop.eup %3923  ;;  %3943 = vpow2.f32 %v3767_v18  ;;  %v6622_v18 = vld [vmem:[#allocation10_spill] sm:$0xff]  ;;  %v3776_v34 = vmul.f32 -1.442695, %v625_v50 }
 0x224   :  { %6612 = vst [vmem:[#allocation119_spill] sm:$0xff] %v5143_v23  ;;  %v3770_v23 = vmul.f32 -1.442695, %v619_v22  ;;  %v5163_v26 = vpop.permute.xlu1 %1607  ;;  %v5173_v46 = vpop.eup %3925  ;;  %v3772_v22 = vmul.f32 -1.442695, %v621_v6  ;;  %3945 = vpow2.f32 %v3768_v4  ;;  %v627_v45 = vadd.f32 %v5057_v15, %v6622_v18  ;;  %v6626_v4 = vld [vmem:[#allocation17_spill] sm:$0xff] }
 0x225   :  { %6614 = vst [vmem:[#allocation8_spill] sm:$0xff] %v5163_v26  ;;  %6617 = vst [vmem:[#allocation12_spill] sm:$0xff] %v5173_v46  ;;  %v5177_v54 = vpop.eup %3927  ;;  %v3773_v26 = vmul.f32 -1.442695, %v622_v28  ;;  %3947 = vpow2.f32 %v3769_v36  ;;  %v628_v5 = vadd.f32 %v5057_v15, %v6626_v4  ;;  %v6628_v36 = vld [vmem:[#allocation11_spill] sm:$0xff]  ;;  %1938 = vbcast.lane.b32.xlu0 %v5034_v32, 368 }
 0x226   :  { %6619 = vst [vmem:[#allocation9_spill] sm:$0xff] %v5177_v54  ;;  %v5181_v20 = vpop.eup %3929  ;;  %3949 = vpow2.f32 %v3770_v23  ;;  %v3775_v54 = vmul.f32 -1.442695, %v624_v42  ;;  %v629_v23 = vadd.f32 %v5057_v15, %v6628_v36  ;;  %v6630_v18 = vld [vmem:[#allocation19_spill] sm:$0xff]  ;;  %1942 = vbcast.lane.b32.xlu1 %v5034_v32, 376 }
 0x227   :  { %v5165_v31 = vpop.permute.xlu0 %1654  ;;  %6621 = vst [vmem:[#allocation15_spill] sm:$0xff] %v5181_v20  ;;  %v5189_v6 = vpop.eup %3931  ;;  %3951 = vpow2.f32 %v3771_v48  ;;  %v6631_v48 = vld [vmem:[#allocation14_spill] sm:$0xff] }
 0x228   :  { %6615 = vst [vmem:[#allocation120_spill] sm:$0xff] %v5165_v31  ;;  %v626_v31 = vadd.f32 %v5057_v15, %v6620_v2  ;;  %v5185_v46 = vpop.permute.xlu1 %1618  ;;  %6625 = vst [vmem:[#allocation122_spill] sm:$0xff] %v5189_v6  ;;  %v5195_v28 = vpop.eup %3933  ;;  %3953 = vpow2.f32 %v3772_v22  ;;  %v631_v4 = vadd.f32 %v5057_v15, %v6631_v48  ;;  %v3778_v6 = vmul.f32 -1.442695, %v627_v45  ;;  %v6635_v22 = vld [vmem:[#allocation21_spill] sm:$0xff] }
 0x229   :  { %6623 = vst [vmem:[#allocation10_spill] sm:$0xff] %v5185_v46  ;;  %6627 = vst [vmem:[#allocation17_spill] sm:$0xff] %v5195_v28  ;;  %v5199_v2 = vpop.eup %3935  ;;  %3955 = vpow2.f32 %v3773_v26  ;;  %v632_v36 = vadd.f32 %v5057_v15, %v6635_v22  ;;  %v6637_v26 = vld [vmem:[#allocation16_spill] sm:$0xff]  ;;  %v6638_v22 = vld [vmem:[#allocation23_spill] sm:$0xff] }
 0x22a   :  { %6629 = vst [vmem:[#allocation11_spill] sm:$0xff] %v5199_v2  ;;  %v3777_v46 = vmul.f32 -1.442695, %v626_v31  ;;  %v5203_v42 = vpop.eup %3937  ;;  %3957 = vpow2.f32 %v3774_v8  ;;  %v3779_v2 = vmul.f32 -1.442695, %v628_v5  ;;  %v5218_v31 = vrot.slane %v4740_v51, %v5015_v25  ;;  %v6639_v51 = vld [vmem:[#allocation18_spill] sm:$0xff] }
 0x22b   :  { %v5187_v63 = vpop.permute.xlu0 %1662  ;;  %v5211_v50 = vpop.eup %3939  ;;  %3959 = vpow2.f32 %v3775_v54  ;;  %v633_v45 = vadd.f32 %v5057_v15, %v6637_v26  ;;  %v634_v54 = vadd.f32 %v5057_v15, %v6638_v22  ;;  %v3782_v32 = vmul.f32 -1.442695, %v631_v4  ;;  %v6643_v4 = vld [vmem:[#allocation25_spill] sm:$0xff] }
 0x22c   :  { %6624 = vst [vmem:[#allocation121_spill] sm:$0xff] %v5187_v63  ;;  %v630_v63 = vadd.f32 %v5057_v15, %v6630_v18  ;;  %v5207_v28 = vpop.permute.xlu1 %1626  ;;  %6634 = vst [vmem:[#allocation123_spill] sm:$0xff] %v5211_v50  ;;  %v5221_v8 = vpop.eup %3941  ;;  %v3780_v18 = vmul.f32 -1.442695, %v629_v23  ;;  %3961 = vpow2.f32 %v3776_v34  ;;  %v3783_v34 = vmul.f32 -1.442695, %v632_v36 }
 0x22d   :  { %6632 = vst [vmem:[#allocation19_spill] sm:$0xff] %v5207_v28  ;;  %6636 = vst [vmem:[#allocation21_spill] sm:$0xff] %v5221_v8  ;;  %v5225_v48 = vpop.eup %3943  ;;  %3963 = vpow2.f32 %v3777_v46  ;;  %v635_v28 = vadd.f32 %v5057_v15, %v6639_v51  ;;  %1949 = vbcast.lane.b32.xlu0 %v5218_v31, 256  ;;  %1953 = vbcast.lane.b32.xlu1 %v5218_v31, 264  ;;  %v3784_v46 = vmul.f32 -1.442695, %v633_v45 }
 0x22e   :  { %v3781_v5 = vmul.f32 -1.442695, %v630_v63  ;;  %3965 = vpow2.f32 %v3778_v6  ;;  %v636_v6 = vadd.f32 %v5057_v15, %v6643_v4  ;;  %v3785_v22 = vmul.f32 -1.442695, %v634_v54  ;;  %v6651_v4 = vld [vmem:[#allocation27_spill] sm:$0xff] }
 0x22f   :  { %v5209_v20 = vpop.permute.xlu0 %1670  ;;  %3967 = vpow2.f32 %v3779_v2  ;;  %v3786_v36 = vmul.f32 -1.442695, %v635_v28 }
 0x230   :  { %6633 = vst [vmem:[#allocation14_spill] sm:$0xff] %v5209_v20  ;;  %v5229_v20 = vpop.eup %3945  ;;  %v5233_v8 = vpop.permute.xlu1 %1634  ;;  %3969 = vpow2.f32 %v3780_v18  ;;  %v1088_v18 = vadd.f32 1.0, %v4990_v3 }
 0x231   :  { %6640 = vst [vmem:[#allocation16_spill] sm:$0xff] %v5233_v8  ;;  %v5237_v23 = vpop.eup %3947  ;;  %3971 = vpow2.f32 %v3781_v5  ;;  %1957 = vbcast.lane.b32.xlu0 %v5218_v31, 272  ;;  %1961 = vbcast.lane.b32.xlu1 %v5218_v31, 280  ;;  %v6650_v5 = vld [vmem:[#allocation56_spill] sm:$0xff] }
 0x232   :  { %6642 = vst [vmem:[#allocation18_spill] sm:$0xff] %v5237_v23  ;;  %v5241_v63 = vpop.eup %3949  ;;  %3973 = vpow2.f32 %v3782_v32  ;;  %v5267_v32 = vrot.slane %v4892_v41, %v6650_v5  ;;  %v1090_v5 = vadd.f32 1.0, %v5002_v9  ;;  %v6659_v9 = vld [vmem:[#allocation24_spill] sm:$0xff] }
 0x233   :  { %v5235_v50 = vpop.permute.xlu0 %1681  ;;  %v5243_v26 = vpop.eup %3951  ;;  %3975 = vpow2.f32 %v3783_v34  ;;  %v638_v34 = vadd.f32 %v5057_v15, %v6651_v4 }
 0x234   :  { %6641 = vst [vmem:[#allocation23_spill] sm:$0xff] %v5235_v50  ;;  %v5247_v51 = vpop.eup %3953  ;;  %v6644_v50 = vld [vmem:[#allocation20_spill] sm:$0xff]  ;;  %v5251_v8 = vpop.permute.xlu1 %1642  ;;  %3977 = vpow2.f32 %v3784_v46 }
 0x235   :  { %v637_v2 = vadd.f32 %v5057_v15, %v6644_v50  ;;  %6645 = vst [vmem:[#allocation25_spill] sm:$0xff] %v5251_v8  ;;  %v5255_v45 = vpop.eup %3955  ;;  %v1089_v50 = vadd.f32 1.0, %v4994_v43  ;;  %3979 = vpow2.f32 %v3785_v22  ;;  %v6652_v8 = vld [vmem:[#allocation22_spill] sm:$0xff]  ;;  %1965 = vbcast.lane.b32.xlu0 %v5218_v31, 288  ;;  %1969 = vbcast.lane.b32.xlu1 %v5218_v31, 296  ;;  %v1091_v22 = vadd.f32 1.0, %v5008_v16 }
 0x236   :  { %6647 = vst [vmem:[#allocation124_spill] sm:$0xff] %v5255_v45  ;;  %v5260_v54 = vpop.eup %3957  ;;  %v639_v45 = vadd.f32 %v5057_v15, %v6652_v8  ;;  %3981 = vpow2.f32 %v3786_v36  ;;  %v6657_v8 = vld [vmem:[#allocation29_spill] sm:$0xff]  ;;  %v3789_v36 = vmul.f32 -1.442695, %v638_v34  ;;  %v1093_v34 = vadd.f32 1.0, %v5019_v56 }
 0x237   :  { %v5253_v23 = vpop.permute.xlu0 %1689  ;;  %6648 = vst [vmem:[#allocation125_spill] sm:$0xff] %v5260_v54  ;;  %v5263_v28 = vpop.eup %3959  ;;  %v3788_v54 = vmul.f32 -1.442695, %v637_v2  ;;  %3983 = vrcp.f32 %v1088_v18  ;;  %v640_v2 = vadd.f32 %v5267_v32, %v6657_v8  ;;  %v641_v18 = vadd.f32 %v5267_v32, %v6659_v9 }
 0x238   :  { %6646 = vst [vmem:[#allocation20_spill] sm:$0xff] %v5253_v23  ;;  %6649 = vst [vmem:[#allocation126_spill] sm:$0xff] %v5263_v28  ;;  %v3787_v23 = vmul.f32 -1.442695, %v636_v6  ;;  %v5271_v3 = vpop.eup %3961  ;;  %v5275_v46 = vpop.permute.xlu1 %1650  ;;  %3985 = vrcp.f32 %v1089_v50  ;;  %v1092_v50 = vadd.f32 1.0, %v5012_v55 }
 0x239   :  { %v5279_v28 = vpop.eup %3963  ;;  %1973 = vbcast.lane.b32.xlu0 %v5218_v31, 304  ;;  %1977 = vbcast.lane.b32.xlu1 %v5218_v31, 312  ;;  %v3791_v9 = vmul.f32 -1.442695, %v640_v2 }
 0x23a   :  { %6654 = vst [vmem:[#allocation27_spill] sm:$0xff] %v5279_v28  ;;  %v5284_v6 = vpop.eup %3965  ;;  %3987 = vpow2.f32 %v3787_v23 }
 0x23b   :  { %v5277_v43 = vpop.permute.xlu0 %1697  ;;  %6655 = vst [vmem:[#allocation22_spill] sm:$0xff] %v5284_v6  ;;  %v5287_v15 = vpop.eup %3967  ;;  %3989 = vpow2.f32 %v3788_v54  ;;  %v6665_v54 = vld [vmem:[#allocation31_spill] sm:$0xff] }
 0x23c   :  { %6653 = vst [vmem:[#allocation56_spill] sm:$0xff] %v5277_v43  ;;  %6656 = vst [vmem:[#allocation127_spill] sm:$0xff] %v5287_v15  ;;  %v5291_v4 = vpop.eup %3969  ;;  %v3790_v43 = vmul.f32 -1.442695, %v639_v45  ;;  %v5295_v28 = vpop.permute.xlu1 %1658  ;;  %3991 = vrcp.f32 %v1090_v5  ;;  %v642_v8 = vadd.f32 %v5267_v32, %v6665_v54  ;;  %v6667_v5 = vld [vmem:[#allocation26_spill] sm:$0xff] }
 0x23d   :  { %6658 = vst [vmem:[#allocation29_spill] sm:$0xff] %v5291_v4  ;;  %6660 = vst [vmem:[#allocation24_spill] sm:$0xff] %v5295_v28  ;;  %v5299_v16 = vpop.eup %3971  ;;  %3993 = vrcp.f32 %v1091_v22  ;;  %v643_v55 = vadd.f32 %v5267_v32, %v6667_v5  ;;  %v1094_v22 = vadd.f32 1.0, %v5027_v60  ;;  %1981 = vbcast.lane.b32.xlu0 %v5218_v31, 320  ;;  %1985 = vbcast.lane.b32.xlu1 %v5218_v31, 328 }
 0x23e   :  { %6662 = vst [vmem:[#allocation129_spill] sm:$0xff] %v5299_v16  ;;  %v5304_v23 = vpop.eup %3973  ;;  %3995 = vpow2.f32 %v3789_v36  ;;  %v3792_v16 = vmul.f32 -1.442695, %v641_v18  ;;  %v1095_v36 = vadd.f32 1.0, %v5037_v29  ;;  %v3793_v5 = vmul.f32 -1.442695, %v642_v8 }
 0x23f   :  { %v5297_v6 = vpop.permute.xlu0 %1705  ;;  %6663 = vst [vmem:[#allocation130_spill] sm:$0xff] %v5304_v23  ;;  %v5307_v45 = vpop.eup %3975  ;;  %3997 = vpow2.f32 %v3790_v43  ;;  %v6672_v43 = vld [vmem:[#allocation33_spill] sm:$0xff]  ;;  %v1096_v29 = vadd.f32 1.0, %v5041_v10  ;;  %v6678_v8 = vld [vmem:[#allocation35_spill] sm:$0xff] }
 0x240   :  { %6661 = vst [vmem:[#allocation128_spill] sm:$0xff] %v5297_v6  ;;  %6664 = vst [vmem:[#allocation131_spill] sm:$0xff] %v5307_v45  ;;  %v5311_v6 = vpop.eup %3977  ;;  %v5315_v4 = vpop.permute.xlu1 %1666  ;;  %3999 = vrcp.f32 %v1092_v50  ;;  %v644_v54 = vadd.f32 %v5267_v32, %v6672_v43  ;;  %v3794_v50 = vmul.f32 -1.442695, %v643_v55  ;;  %v6679_v43 = vld [vmem:[#allocation90_spill] sm:$0xff] }
 0x241   :  { %6666 = vst [vmem:[#allocation31_spill] sm:$0xff] %v5311_v6  ;;  %6668 = vst [vmem:[#allocation26_spill] sm:$0xff] %v5315_v4  ;;  %v5319_v56 = vpop.eup %3979  ;;  %4001 = vrcp.f32 %v1093_v34  ;;  %1989 = vbcast.lane.b32.xlu0 %v5218_v31, 336  ;;  %1993 = vbcast.lane.b32.xlu1 %v5218_v31, 344 }
 0x242   :  { %6670 = vst [vmem:[#allocation133_spill] sm:$0xff] %v5319_v56  ;;  %v5324_v2 = vpop.eup %3981  ;;  %4003 = vpow2.f32 %v3791_v9  ;;  %v6673_v56 = vld [vmem:[#allocation28_spill] sm:$0xff]  ;;  %v646_v9 = vadd.f32 %v5267_v32, %v6678_v8  ;;  %v1098_v8 = vadd.f32 1.0, %v5053_v39 }
 0x243   :  { %v5317_v23 = vpop.permute.xlu0 %1713  ;;  %6671 = vst [vmem:[#allocation134_spill] sm:$0xff] %v5324_v2  ;;  %v3984_v18 = vpop.eup %3983  ;;  %v645_v60 = vadd.f32 %v5267_v32, %v6673_v56  ;;  %4005 = vpow2.f32 %v3792_v16  ;;  %v1097_v16 = vadd.f32 1.0, %v5045_v49  ;;  %v3795_v56 = vmul.f32 -1.442695, %v644_v54 }
 0x244   :  { %6669 = vst [vmem:[#allocation132_spill] sm:$0xff] %v5317_v23  ;;  %v3986_v23 = vpop.eup %3985  ;;  %v5331_v6 = vpop.permute.xlu1 %1674  ;;  %4007 = vrcp.f32 %v1094_v22 }
 0x245   :  { %6674 = vst [vmem:[#allocation33_spill] sm:$0xff] %v5331_v6  ;;  %v5335_v2 = vpop.eup %3987  ;;  %4009 = vrcp.f32 %v1095_v36  ;;  %v3796_v6 = vmul.f32 -1.442695, %v645_v60  ;;  %1997 = vbcast.lane.b32.xlu0 %v5218_v31, 352  ;;  %2001 = vbcast.lane.b32.xlu1 %v5218_v31, 360  ;;  %v6685_v36 = vld [vmem:[#allocation30_spill] sm:$0xff] }
 0x246   :  { %6676 = vst [vmem:[#allocation135_spill] sm:$0xff] %v5335_v2  ;;  %v5340_v34 = vpop.eup %3989  ;;  %4011 = vpow2.f32 %v3793_v5  ;;  %v6680_v2 = vld [vmem:[#allocation92_spill] sm:$0xff] }
 0x247   :  { %v5333_v45 = vpop.permute.xlu0 %1721  ;;  %6677 = vst [vmem:[#allocation136_spill] sm:$0xff] %v5340_v34  ;;  %v3992_v55 = vpop.eup %3991  ;;  %v2140_v10 = vmul.f32 %v3986_v23, %v6680_v2  ;;  %4013 = vpow2.f32 %v3794_v50  ;;  %v647_v23 = vadd.f32 %v5267_v32, %v6685_v36  ;;  %v3797_v2 = vmul.f32 -1.442695, %v646_v9  ;;  %v6691_v9 = vld [vmem:[#allocation37_spill] sm:$0xff] }
 0x248   :  { %6675 = vst [vmem:[#allocation28_spill] sm:$0xff] %v5333_v45  ;;  %v2139_v45 = vmul.f32 %v3984_v18, %v6679_v43  ;;  %v3994_v22 = vpop.eup %3993  ;;  %v5347_v4 = vpop.permute.xlu1 %1685  ;;  %4015 = vrcp.f32 %v1096_v29  ;;  %v6686_v18 = vld [vmem:[#allocation93_spill] sm:$0xff]  ;;  %v6687_v43 = vld [vmem:[#allocation95_spill] sm:$0xff] }
 0x249   :  { %6681 = vst [vmem:[#allocation35_spill] sm:$0xff] %v5347_v4  ;;  %v5351_v34 = vpop.eup %3995  ;;  %v2141_v54 = vmul.f32 %v3992_v55, %v6686_v18  ;;  %4017 = vrcp.f32 %v1097_v16  ;;  %v2396_v50 = vcombine.high %v2140_v10, %v2140_v10  ;;  %v2142_v39 = vmul.f32 %v3994_v22, %v6687_v43  ;;  %2005 = vbcast.lane.b32.xlu0 %v5218_v31, 368  ;;  %v6693_v22 = vld [vmem:[#allocation97_spill] sm:$0xff] }
 0x24a   :  { %6683 = vst [vmem:[#allocation92_spill] sm:$0xff] %v5351_v34  ;;  %v5356_v49 = vpop.eup %3997  ;;  %4019 = vpow2.f32 %v3795_v56  ;;  %v2395_v60 = vcombine.high %v2139_v45, %v2139_v45  ;;  %v648_v55 = vadd.f32 %v5267_v32, %v6691_v9  ;;  %v1100_v16 = vadd.f32 1.0, %v5067_v35  ;;  %2009 = vbcast.lane.b32.xlu1 %v5218_v31, 376 }
 0x24b   :  { %v5349_v15 = vpop.permute.xlu0 %1729  ;;  %6684 = vst [vmem:[#allocation137_spill] sm:$0xff] %v5356_v49  ;;  %v4000_v5 = vpop.eup %3999  ;;  %4021 = vpow2.f32 %v3796_v6  ;;  %v3798_v6 = vmul.f32 -1.442695, %v647_v23  ;;  %v2398_v43 = vcombine.high %v2142_v39, %v2142_v39  ;;  %v1101_v35 = vadd.f32 1.0, %v5071_v58  ;;  %v6698_v23 = vld [vmem:[#allocation32_spill] sm:$0xff] }
 0x24c   :  { %6682 = vst [vmem:[#allocation90_spill] sm:$0xff] %v5349_v15  ;;  %v4002_v29 = vpop.eup %4001  ;;  %v1099_v15 = vadd.f32 1.0, %v5063_v47  ;;  %v5363_v34 = vpop.permute.xlu1 %1693  ;;  %4023 = vrcp.f32 %v1098_v8  ;;  %v2397_v47 = vcombine.high %v2141_v54, %v2141_v54  ;;  %v2143_v36 = vmul.f32 %v4000_v5, %v6693_v22 }
 0x24d   :  { %6688 = vst [vmem:[#allocation30_spill] sm:$0xff] %v5363_v34  ;;  %v5367_v4 = vpop.eup %4003  ;;  %4025 = vpow2.f32 %v3797_v2  ;;  %v6694_v34 = vld [vmem:[#allocation99_spill] sm:$0xff]  ;;  %v649_v2 = vadd.f32 %v5267_v32, %v6698_v23  ;;  %v1102_v5 = vadd.f32 1.0, %v5079_v57  ;;  %v1103_v23 = vadd.f32 1.0, %v5085_v7  ;;  %v6704_v7 = vld [vmem:[#allocation94_spill] sm:$0xff] }
 0x24e   :  { %6690 = vst [vmem:[#allocation95_spill] sm:$0xff] %v5367_v4  ;;  %v5374_v56 = vpop.eup %4005  ;;  %v2524_v4 = vcombine.low %v2140_v10, %v2396_v50  ;;  %v2144_v9 = vmul.f32 %v4002_v29, %v6694_v34  ;;  %4027 = vrcp.f32 %v1099_v15  ;;  %v3799_v34 = vmul.f32 -1.442695, %v648_v55  ;;  %v6699_v29 = vld [vmem:[#allocation101_spill] sm:$0xff]  ;;  %v6703_v55 = vld [vmem:[#allocation39_spill] sm:$0xff] }
 0x24f   :  { %v5365_v49 = vpop.permute.xlu0 %1737  ;;  %6692 = vst [vmem:[#allocation37_spill] sm:$0xff] %v5374_v56  ;;  %v4008_v18 = vpop.eup %4007  ;;  %4029 = vrcp.f32 %v1100_v16  ;;  %v2525_v58 = vcombine.low %v2141_v54, %v2397_v47  ;;  %v2399_v15 = vcombine.high %v2143_v36, %v2143_v36  ;;  %v650_v54 = vadd.f32 %v5267_v32, %v6703_v55 }
 0x250   :  { %6689 = vst [vmem:[#allocation93_spill] sm:$0xff] %v5365_v49  ;;  %v2523_v49 = vcombine.low %v2139_v45, %v2395_v60  ;;  %v4010_v28 = vpop.eup %4009  ;;  %v5379_v8 = vpop.permute.xlu1 %1701  ;;  %2655 = vperm.xlu1 %3861, %v2524_v4   ;;  %4031 = vpow2.f32 %v3798_v6  ;;  %v2526_v60 = vcombine.low %v2142_v39, %v2398_v43  ;;  %v2400_v50 = vcombine.high %v2144_v9, %v2144_v9 }
 0x251   :  { %6695 = vst [vmem:[#allocation97_spill] sm:$0xff] %v5379_v8  ;;  %v5383_v56 = vpop.eup %4011  ;;  %v2145_v22 = vmul.f32 %v4008_v18, %v6699_v29  ;;  %4033 = vrcp.f32 %v1101_v35  ;;  %v3800_v16 = vmul.f32 -1.442695, %v649_v2  ;;  %v2527_v47 = vcombine.low %v2143_v36, %v2399_v15  ;;  %v6705_v29 = vld [vmem:[#allocation105_spill] sm:$0xff]  ;;  %v6706_v2 = vld [vmem:[#allocation34_spill] sm:$0xff]  ;;  %v6707_v15 = vld [vmem:[#allocation96_spill] sm:$0xff] }
 0x252   :  { %6697 = vst [vmem:[#allocation138_spill] sm:$0xff] %v5383_v56  ;;  %2652 = vperm.xlu0 %3860, %v2523_v49   ;;  %v5388_v45 = vpop.eup %4013  ;;  %4035 = vrcp.f32 %v1102_v5  ;;  %v2528_v43 = vcombine.low %v2144_v9, %v2400_v50  ;;  %v651_v5 = vadd.f32 %v5267_v32, %v6706_v2  ;;  %v1106_v9 = vadd.f32 1.0, %v5101_v12  ;;  %v6708_v2 = vld [vmem:[#allocation41_spill] sm:$0xff] }
 0x253   :  { %v5381_v31 = vpop.permute.xlu0 %1748  ;;  %v4016_v10 = vpop.eup %4015  ;;  %4037 = vpow2.f32 %v3799_v34  ;;  %v2401_v35 = vcombine.high %v2145_v22, %v2145_v22 }
 0x254   :  { %6696 = vst [vmem:[#allocation99_spill] sm:$0xff] %v5381_v31  ;;  %v6700_v31 = vld [vmem:[#allocation103_spill] sm:$0xff]  ;;  %v4018_v8 = vpop.eup %4017  ;;  %v5393_v57 = vpop.permute.xlu1 %1709  ;;  %2661 = vperm.xlu1 %3861, %v2526_v60   ;;  %v2147_v6 = vmul.f32 %v4016_v10, %v6704_v7  ;;  %4039 = vrcp.f32 %v1103_v23  ;;  %v3801_v10 = vmul.f32 -1.442695, %v650_v54  ;;  %v652_v54 = vadd.f32 %v5267_v32, %v6708_v2 }
 0x255   :  { %v2146_v56 = vmul.f32 %v4010_v28, %v6700_v31  ;;  %v5397_v49 = vpop.eup %4019  ;;  %v1104_v28 = vadd.f32 1.0, %v5089_v40  ;;  %4041 = vpow2.f32 %v3800_v16  ;;  %v2529_v55 = vcombine.low %v2145_v22, %v2401_v35  ;;  %v6711_v35 = vld [vmem:[#allocation98_spill] sm:$0xff] }
 0x256   :  { %6702 = vst [vmem:[#allocation101_spill] sm:$0xff] %v5397_v49  ;;  %2658 = vperm.xlu0 %3860, %v2525_v58   ;;  %v5401_v39 = vpop.eup %4021  ;;  %v1105_v58 = vadd.f32 1.0, %v5093_v17  ;;  %v3802_v16 = vmul.f32 -1.442695, %v651_v5  ;;  %v1108_v22 = vadd.f32 1.0, %v5111_v61 }
 0x257   :  { %v5395_v4 = vpop.permute.xlu0 %1756  ;;  %v4024_v18 = vpop.eup %4023  ;;  %v2402_v31 = vcombine.high %v2146_v56, %v2146_v56  ;;  %4043 = vrcp.f32 %v1104_v28  ;;  %v6710_v28 = vld [vmem:[#allocation36_spill] sm:$0xff] }
 0x258   :  { %6701 = vst [vmem:[#allocation32_spill] sm:$0xff] %v5395_v4  ;;  %v2148_v4 = vmul.f32 %v4018_v8, %v6705_v29  ;;  %v5406_v49 = vpop.eup %4025  ;;  %v5411_v34 = vpop.permute.xlu1 %1717  ;;  %2667 = vperm.xlu1 %3861, %v2528_v43   ;;  %v2403_v8 = vcombine.high %v2147_v6, %v2147_v6  ;;  %v2149_v60 = vmul.f32 %v4024_v18, %v6707_v15  ;;  %4045 = vrcp.f32 %v1105_v58 }
 0x259   :  { %v4028_v36 = vpop.eup %4027  ;;  %v2530_v7 = vcombine.low %v2146_v56, %v2402_v31  ;;  %v653_v18 = vadd.f32 %v5267_v32, %v6710_v28  ;;  %4047 = vpow2.f32 %v3801_v10  ;;  %v1107_v56 = vadd.f32 1.0, %v5107_v38 }
 0x25a   :  { %2664 = vperm.xlu0 %3860, %v2527_v47   ;;  %v4030_v50 = vpop.eup %4029  ;;  %v2404_v17 = vcombine.high %v2148_v4, %v2148_v4  ;;  %v2150_v23 = vmul.f32 %v4028_v36, %v4952_v11  ;;  %v2531_v43 = vcombine.low %v2147_v6, %v2403_v8  ;;  %4049 = vrcp.f32 %v1106_v9  ;;  %v6714_v8 = vld [vmem:[#allocation100_spill] sm:$0xff] }
 0x25b   :  { %v5413_v40 = vpop.permute.xlu0 %1764  ;;  %v5418_v29 = vpop.eup %4031  ;;  %v2151_v31 = vmul.f32 %v4030_v50, %v6711_v35  ;;  %v2405_v58 = vcombine.high %v2149_v60, %v2149_v60  ;;  %v3803_v10 = vmul.f32 -1.442695, %v652_v54  ;;  %4051 = vpow2.f32 %v3802_v16 }
 0x25c   :  { %v5422_v47 = vpop.permute.xlu1 %1725  ;;  %2673 = vperm.xlu1 %3861, %v2530_v7   ;;  %v4034_v11 = vpop.eup %4033  ;;  %v2532_v36 = vcombine.low %v2148_v4, %v2404_v17  ;;  %v2406_v15 = vcombine.high %v2150_v23, %v2150_v23  ;;  %v6713_v7 = vld [vmem:[#allocation43_spill] sm:$0xff]  ;;  %v1109_v6 = vadd.f32 1.0, %v5115_v52  ;;  %4053 = vrcp.f32 %v1107_v56 }
 0x25d   :  { %v4036_v5 = vpop.eup %4035  ;;  %v2152_v2 = vmul.f32 %v4034_v11, %v4966_v0  ;;  %v654_v61 = vadd.f32 %v5267_v32, %v6713_v7  ;;  %v3804_v9 = vmul.f32 -1.442695, %v653_v18  ;;  %4055 = vrcp.f32 %v1108_v22  ;;  %v6716_v18 = vld [vmem:[#allocation38_spill] sm:$0xff] }
 0x25e   :  { %2670 = vperm.xlu0 %3860, %v2529_v55   ;;  %v2407_v0 = vcombine.high %v2151_v31, %v2151_v31  ;;  %v2153_v50 = vmul.f32 %v4036_v5, %v6714_v8  ;;  %v2533_v54 = vcombine.low %v2149_v60, %v2405_v58  ;;  %v2534_v16 = vcombine.low %v2150_v23, %v2406_v15 }
 0x25f   :  { %v5424_v12 = vpop.permute.xlu0 %1772  ;;  %v2408_v28 = vcombine.high %v2152_v2, %v2152_v2  ;;  %4057 = vpow2.f32 %v3803_v10  ;;  %v1110_v52 = vadd.f32 1.0, %v5123_v33  ;;  %v655_v22 = vadd.f32 %v5267_v32, %v6716_v18  ;;  %v6717_v33 = vld [vmem:[#allocation102_spill] sm:$0xff] }
 0x260   :  { %6709 = vst [vmem:[#allocation103_spill] sm:$0xff] %v5424_v12  ;;  %v5432_v12 = vpop.eup %4037  ;;  %v5434_v38 = vpop.permute.xlu1 %1733  ;;  %2679 = vperm.xlu1 %3861, %v2532_v36   ;;  %v1111_v5 = vadd.f32 1.0, %v5129_v13  ;;  %4059 = vrcp.f32 %v1109_v6  ;;  %v3805_v23 = vmul.f32 -1.442695, %v654_v61  ;;  %v2409_v58 = vcombine.high %v2153_v50, %v2153_v50  ;;  %v6719_v61 = vld [vmem:[#allocation45_spill] sm:$0xff] }
 0x261   :  { %v4040_v4 = vpop.eup %4039  ;;  %4061 = vpow2.f32 %v3804_v9  ;;  %v2536_v10 = vcombine.low %v2152_v2, %v2408_v28  ;;  %v1112_v18 = vadd.f32 1.0, %v5133_v1  ;;  %v1113_v9 = vadd.f32 1.0, %v5137_v27 }
 0x262   :  { %2676 = vperm.xlu0 %3860, %v2531_v43   ;;  %v5442_v17 = vpop.eup %4041  ;;  %v2154_v11 = vmul.f32 %v4040_v4, %v4980_v53  ;;  %v2535_v53 = vcombine.low %v2151_v31, %v2407_v0  ;;  %4063 = vrcp.f32 %v1110_v52  ;;  %v656_v31 = vadd.f32 %v5267_v32, %v6719_v61  ;;  %v6720_v0 = vld [vmem:[#allocation40_spill] sm:$0xff] }
 0x263   :  { %v5436_v55 = vpop.permute.xlu0 %1780  ;;  %v4044_v35 = vpop.eup %4043  ;;  %4065 = vrcp.f32 %v1111_v5  ;;  %v2537_v1 = vcombine.low %v2153_v50, %v2409_v58  ;;  %v1114_v27 = vadd.f32 1.0, %v5145_v59  ;;  %v6723_v50 = vld [vmem:[#allocation47_spill] sm:$0xff]  ;;  %v6724_v58 = vld [vmem:[#allocation42_spill] sm:$0xff] }
 0x264   :  { %6712 = vst [vmem:[#allocation39_spill] sm:$0xff] %v5436_v55  ;;  %v5446_v56 = vpop.permute.xlu1 %1741  ;;  %2685 = vperm.xlu1 %3861, %v2534_v16   ;;  %v4046_v60 = vpop.eup %4045  ;;  %v2155_v15 = vmul.f32 %v4044_v35, %v6717_v33  ;;  %v2410_v7 = vcombine.high %v2154_v11, %v2154_v11  ;;  %4067 = vpow2.f32 %v3805_v23  ;;  %v6721_v35 = vld [vmem:[#allocation104_spill] sm:$0xff]  ;;  %v658_v23 = vadd.f32 %v5267_v32, %v6723_v50 }
 0x265   :  { %v5453_v36 = vpop.eup %4047  ;;  %v2156_v4 = vmul.f32 %v4046_v60, %v4998_v44  ;;  %v657_v44 = vadd.f32 %v5267_v32, %v6720_v0  ;;  %4069 = vrcp.f32 %v1112_v18 }
 0x266   :  { %2682 = vperm.xlu0 %3860, %v2533_v54   ;;  %v4050_v8 = vpop.eup %4049  ;;  %v3806_v54 = vmul.f32 -1.442695, %v655_v22  ;;  %v2411_v28 = vcombine.high %v2155_v15, %v2155_v15  ;;  %v2538_v60 = vcombine.low %v2154_v11, %v2410_v7  ;;  %v5478_v22 = vrot.slane %v4892_v41, %v5015_v25  ;;  %v6725_v25 = vld [vmem:[#allocation106_spill] sm:$0xff] }
 0x267   :  { %v5448_v43 = vpop.permute.xlu0 %1788  ;;  %v5465_v2 = vpop.eup %4051  ;;  %v2157_v52 = vmul.f32 %v4050_v8, %v6721_v35  ;;  %v2412_v33 = vcombine.high %v2156_v4, %v2156_v4  ;;  %v1115_v11 = vadd.f32 1.0, %v5151_v62  ;;  %4071 = vrcp.f32 %v1113_v9 }
 0x268   :  { %6715 = vst [vmem:[#allocation94_spill] sm:$0xff] %v5448_v43  ;;  %v5458_v13 = vpop.permute.xlu1 %1752  ;;  %2691 = vperm.xlu1 %3861, %v2536_v10   ;;  %v4054_v16 = vpop.eup %4053  ;;  %v3807_v7 = vmul.f32 -1.442695, %v656_v31  ;;  %v3808_v8 = vmul.f32 -1.442695, %v657_v44  ;;  %4073 = vpow2.f32 %v3806_v54  ;;  %v2539_v0 = vcombine.low %v2155_v15, %v2411_v28  ;;  %v6727_v31 = vld [vmem:[#allocation49_spill] sm:$0xff] }
 0x269   :  { %v4056_v61 = vpop.eup %4055  ;;  %v2158_v5 = vmul.f32 %v4054_v16, %v5023_v21  ;;  %v659_v21 = vadd.f32 %v5267_v32, %v6724_v58  ;;  %v2413_v41 = vcombine.high %v2157_v52, %v2157_v52  ;;  %v2540_v35 = vcombine.low %v2156_v4, %v2412_v33  ;;  %v6728_v15 = vld [vmem:[#allocation44_spill] sm:$0xff] }
 0x26a   :  { %2688 = vperm.xlu0 %3860, %v2535_v53   ;;  %v5483_v59 = vpop.eup %4057  ;;  %v2159_v16 = vmul.f32 %v4056_v61, %v6725_v25  ;;  %v1116_v62 = vadd.f32 1.0, %v5155_v30  ;;  %4075 = vrcp.f32 %v1114_v27  ;;  %v660_v44 = vadd.f32 %v5267_v32, %v6727_v31 }
 0x26b   :  { %v5460_v6 = vpop.permute.xlu0 %1796  ;;  %v4060_v18 = vpop.eup %4059  ;;  %v2414_v9 = vcombine.high %v2158_v5, %v2158_v5  ;;  %v661_v54 = vadd.f32 %v5267_v32, %v6728_v15  ;;  %v1117_v4 = vadd.f32 1.0, %v5159_v14  ;;  %4077 = vrcp.f32 %v1115_v11  ;;  %v6729_v11 = vld [vmem:[#allocation112_spill] sm:$0xff] }
 0x26c   :  { %6718 = vst [vmem:[#allocation105_spill] sm:$0xff] %v5460_v6  ;;  %v5472_v53 = vpop.permute.xlu1 %1760  ;;  %2697 = vperm.xlu1 %3861, %v2538_v60   ;;  %v5488_v50 = vpop.eup %4061  ;;  %v3809_v28 = vmul.f32 -1.442695, %v658_v23  ;;  %v3810_v33 = vmul.f32 -1.442695, %v659_v21  ;;  %4079 = vpow2.f32 %v3807_v7  ;;  %v2541_v27 = vcombine.low %v2157_v52, %v2413_v41  ;;  %v6732_v21 = vld [vmem:[#allocation51_spill] sm:$0xff] }
 0x26d   :  { %v4064_v30 = vpop.eup %4063  ;;  %4081 = vpow2.f32 %v3808_v8  ;;  %v2542_v15 = vcombine.low %v2158_v5, %v2414_v9  ;;  %v6733_v7 = vld [vmem:[#allocation46_spill] sm:$0xff]  ;;  %v6734_v8 = vld [vmem:[#allocation12_spill] sm:$0xff]  ;;  %v3812_v5 = vmul.f32 -1.442695, %v661_v54  ;;  %v6735_v9 = vld [vmem:[#allocation9_spill] sm:$0xff] }
 0x26e   :  { %2694 = vperm.xlu0 %3860, %v2537_v1   ;;  %v2160_v1 = vmul.f32 %v4060_v18, %v5049_v24  ;;  %v1118_v24 = vadd.f32 1.0, %v5167_v19  ;;  %v4066_v61 = vpop.eup %4065  ;;  %v2415_v18 = vcombine.high %v2159_v16, %v2159_v16  ;;  %v2161_v25 = vmul.f32 %v4064_v30, %v4954_v37  ;;  %v6740_v54 = vld [vmem:[#allocation53_spill] sm:$0xff] }
 0x26f   :  { %v5474_v10 = vpop.permute.xlu0 %1804  ;;  %v5503_v31 = vpop.eup %4067  ;;  %4083 = vrcp.f32 %v1116_v62  ;;  %v662_v19 = vadd.f32 %v5267_v32, %v6732_v21  ;;  %v663_v52 = vadd.f32 %v5267_v32, %v6733_v7  ;;  %v1119_v41 = vadd.f32 1.0, %v6734_v8 }
 0x270   :  { %6722 = vst [vmem:[#allocation34_spill] sm:$0xff] %v5474_v10  ;;  %v5492_v60 = vpop.permute.xlu1 %1768  ;;  %2703 = vperm.xlu1 %3861, %v2540_v35   ;;  %v2416_v14 = vcombine.high %v2160_v1, %v2160_v1  ;;  %4085 = vrcp.f32 %v1117_v4  ;;  %v4070_v37 = vpop.eup %4069  ;;  %v3811_v62 = vmul.f32 -1.442695, %v660_v44  ;;  %v1120_v30 = vadd.f32 1.0, %v6735_v9  ;;  %v6737_v4 = vld [vmem:[#allocation114_spill] sm:$0xff] }
 0x271   :  { %4087 = vpow2.f32 %v3809_v28  ;;  %v664_v28 = vadd.f32 %v5267_v32, %v6740_v54 }
 0x272   :  { %2700 = vperm.xlu0 %3860, %v2539_v0   ;;  %v2162_v0 = vmul.f32 %v4066_v61, %v6729_v11  ;;  %v4072_v61 = vpop.eup %4071  ;;  %4089 = vpow2.f32 %v3810_v33  ;;  %v2543_v11 = vcombine.low %v2159_v16, %v2415_v18  ;;  %v2544_v7 = vcombine.low %v2160_v1, %v2416_v14  ;;  %v6742_v33 = vld [vmem:[#allocation15_spill] sm:$0xff]  ;;  %v6743_v14 = vld [vmem:[#allocation122_spill] sm:$0xff] }
 0x273   :  { %v5494_v58 = vpop.permute.xlu0 %1815  ;;  %v5517_v10 = vpop.eup %4073  ;;  %4091 = vrcp.f32 %v1118_v24  ;;  %v1121_v18 = vadd.f32 1.0, %v6742_v33  ;;  %v3813_v24 = vmul.f32 -1.442695, %v662_v19  ;;  %v3814_v1 = vmul.f32 -1.442695, %v663_v52 }
 0x274   :  { %6726 = vst [vmem:[#allocation96_spill] sm:$0xff] %v5494_v58  ;;  %v5506_v35 = vpop.permute.xlu1 %1776  ;;  %2709 = vperm.xlu1 %3861, %v2542_v15   ;;  %v6736_v58 = vld [vmem:[#allocation107_spill] sm:$0xff]  ;;  %v2418_v8 = vcombine.high %v2162_v0, %v2162_v0  ;;  %v6741_v15 = vld [vmem:[#allocation48_spill] sm:$0xff]  ;;  %4093 = vrcp.f32 %v1119_v41 }
 0x275   :  { %6730 = vst [vmem:[#allocation41_spill] sm:$0xff] %v5506_v35  ;;  %v2163_v21 = vmul.f32 %v4070_v37, %v6736_v58  ;;  %v665_v16 = vadd.f32 %v5267_v32, %v6741_v15  ;;  %v4076_v58 = vpop.eup %4075  ;;  %4095 = vpow2.f32 %v3811_v62  ;;  %v1122_v37 = vadd.f32 1.0, %v6743_v14  ;;  %v6745_v41 = vld [vmem:[#allocation116_spill] sm:$0xff]  ;;  %v6748_v62 = vld [vmem:[#allocation55_spill] sm:$0xff] }
 0x276   :  { %2706 = vperm.xlu0 %3860, %v2541_v27   ;;  %v2164_v27 = vmul.f32 %v4072_v61, %v6737_v4  ;;  %v4078_v9 = vpop.eup %4077  ;;  %4097 = vpow2.f32 %v3812_v5  ;;  %v2546_v15 = vcombine.low %v2162_v0, %v2418_v8  ;;  %v666_v5 = vadd.f32 %v5267_v32, %v6748_v62 }
 0x277   :  { %v5508_v23 = vpop.permute.xlu0 %1823  ;;  %v2419_v4 = vcombine.high %v2163_v21, %v2163_v21  ;;  %v5531_v43 = vpop.eup %4079  ;;  %4099 = vrcp.f32 %v1120_v30  ;;  %v3815_v30 = vmul.f32 -1.442695, %v664_v28  ;;  %v3816_v8 = vmul.f32 -1.442695, %v665_v16 }
 0x278   :  { %6731 = vst [vmem:[#allocation36_spill] sm:$0xff] %v5508_v23  ;;  %v2417_v23 = vcombine.high %v2161_v25, %v2161_v25  ;;  %v5520_v6 = vpop.permute.xlu1 %1784  ;;  %2715 = vperm.xlu1 %3861, %v2544_v7   ;;  %v2420_v33 = vcombine.high %v2164_v27, %v2164_v27  ;;  %v5538_v52 = vpop.eup %4081  ;;  %v6750_v7 = vld [vmem:[#allocation17_spill] sm:$0xff]  ;;  %4101 = vrcp.f32 %v1121_v18  ;;  %v6753_v18 = vld [vmem:[#allocation118_spill] sm:$0xff] }
 0x279   :  { %6738 = vst [vmem:[#allocation98_spill] sm:$0xff] %v5520_v6  ;;  %v4084_v0 = vpop.eup %4083  ;;  %4103 = vpow2.f32 %v3813_v24  ;;  %v6757_v24 = vld [vmem:[#allocation58_spill] sm:$0xff] }
 0x27a   :  { %2712 = vperm.xlu0 %3860, %v2543_v11   ;;  %v2545_v61 = vcombine.low %v2161_v25, %v2417_v23  ;;  %v2166_v11 = vmul.f32 %v4078_v9, %v6745_v41  ;;  %v6749_v25 = vld [vmem:[#allocation50_spill] sm:$0xff]  ;;  %v4086_v9 = vpop.eup %4085  ;;  %4105 = vpow2.f32 %v3814_v1  ;;  %v2547_v41 = vcombine.low %v2163_v21, %v2419_v4  ;;  %v6758_v21 = vld [vmem:[#allocation52_spill] sm:$0xff] }
 0x27b   :  { %v5522_v44 = vpop.permute.xlu0 %1831  ;;  %v667_v23 = vadd.f32 %v5267_v32, %v6749_v25  ;;  %v5547_v55 = vpop.eup %4087  ;;  %4107 = vrcp.f32 %v1122_v37  ;;  %v2548_v25 = vcombine.low %v2164_v27, %v2420_v33  ;;  %v668_v1 = vadd.f32 %v5267_v32, %v6757_v24  ;;  %v6759_v33 = vld [vmem:[#allocation123_spill] sm:$0xff] }
 0x27c   :  { %6739 = vst [vmem:[#allocation43_spill] sm:$0xff] %v5522_v44  ;;  %v6744_v44 = vld [vmem:[#allocation108_spill] sm:$0xff]  ;;  %v5534_v6 = vpop.permute.xlu1 %1792  ;;  %2721 = vperm.xlu1 %3861, %v2546_v15   ;;  %v5554_v16 = vpop.eup %4089  ;;  %v669_v4 = vadd.f32 %v5267_v32, %v6758_v21  ;;  %v3817_v37 = vmul.f32 -1.442695, %v666_v5 }
 0x27d   :  { %v2165_v54 = vmul.f32 %v4076_v58, %v6744_v44  ;;  %6746 = vst [vmem:[#allocation100_spill] sm:$0xff] %v5534_v6  ;;  %v1123_v44 = vadd.f32 1.0, %v6750_v7  ;;  %v6751_v58 = vld [vmem:[#allocation11_spill] sm:$0xff]  ;;  %v6752_v6 = vld [vmem:[#allocation109_spill] sm:$0xff]  ;;  %v2422_v7 = vcombine.high %v2166_v11, %v2166_v11  ;;  %6756 = vst [vmem:[#allocation40_spill] sm:$0xff] %v5554_v16  ;;  %v4092_v27 = vpop.eup %4091 }
 0x27e   :  { %2718 = vperm.xlu0 %3860, %v2545_v61   ;;  %v1124_v14 = vadd.f32 1.0, %v6751_v58  ;;  %v2167_v62 = vmul.f32 %v4084_v0, %v6752_v6  ;;  %v2168_v61 = vmul.f32 %v4086_v9, %v6753_v18  ;;  %v1125_v6 = vadd.f32 1.0, %v5203_v42  ;;  %v4094_v58 = vpop.eup %4093 }
 0x27f   :  { %v5536_v19 = vpop.permute.xlu0 %1839  ;;  %4109 = vrcp.f32 %v1123_v44  ;;  %v3818_v15 = vmul.f32 -1.442695, %v667_v23  ;;  %v1126_v0 = vadd.f32 1.0, %v6759_v33  ;;  %v2550_v21 = vcombine.low %v2166_v11, %v2422_v7  ;;  %v6761_v44 = vld [vmem:[#allocation8_spill] sm:$0xff] }
 0x280   :  { %6747 = vst [vmem:[#allocation38_spill] sm:$0xff] %v5536_v19  ;;  %v2421_v19 = vcombine.high %v2165_v54, %v2165_v54  ;;  %v5550_v35 = vpop.permute.xlu1 %1800  ;;  %4111 = vpow2.f32 %v3815_v30  ;;  %2727 = vperm.xlu1 %3861, %v2548_v25   ;;  %v2423_v18 = vcombine.high %v2167_v62, %v2167_v62  ;;  %v2424_v42 = vcombine.high %v2168_v61, %v2168_v61  ;;  %v6764_v30 = vld [vmem:[#allocation60_spill] sm:$0xff]  ;;  %v6766_v25 = vld [vmem:[#allocation21_spill] sm:$0xff] }
 0x281   :  { %6754 = vst [vmem:[#allocation102_spill] sm:$0xff] %v5550_v35  ;;  %4113 = vpow2.f32 %v3816_v8  ;;  %v5563_v35 = vpop.eup %4095  ;;  %v670_v8 = vadd.f32 %v5267_v32, %v6764_v30  ;;  %v3820_v7 = vmul.f32 -1.442695, %v669_v4 }
 0x282   :  { %2724 = vperm.xlu0 %3860, %v2547_v41   ;;  %v2549_v9 = vcombine.low %v2165_v54, %v2421_v19  ;;  %4115 = vrcp.f32 %v1124_v14  ;;  %v2170_v41 = vmul.f32 %v4094_v58, %v6761_v44  ;;  %v5570_v23 = vpop.eup %4097  ;;  %v6765_v54 = vld [vmem:[#allocation54_spill] sm:$0xff]  ;;  %v3819_v14 = vmul.f32 -1.442695, %v668_v1 }
 0x283   :  { %v5552_v28 = vpop.permute.xlu0 %1847  ;;  %v671_v19 = vadd.f32 %v5267_v32, %v6765_v54  ;;  %4117 = vrcp.f32 %v1125_v6  ;;  %v4100_v11 = vpop.eup %4099  ;;  %v2551_v58 = vcombine.low %v2167_v62, %v2423_v18  ;;  %v2552_v32 = vcombine.low %v2168_v61, %v2424_v42  ;;  %v6768_v6 = vld [vmem:[#allocation10_spill] sm:$0xff]  ;;  %v6773_v62 = vld [vmem:[#allocation57_spill] sm:$0xff] }
 0x284   :  { %6755 = vst [vmem:[#allocation45_spill] sm:$0xff] %v5552_v28  ;;  %v6760_v28 = vld [vmem:[#allocation110_spill] sm:$0xff]  ;;  %v5566_v16 = vpop.permute.xlu1 %1808  ;;  %4119 = vpow2.f32 %v3817_v37  ;;  %2733 = vperm.xlu1 %3861, %v2550_v21   ;;  %v4102_v33 = vpop.eup %4101  ;;  %v2426_v54 = vcombine.high %v2170_v41, %v2170_v41  ;;  %v1129_v18 = vadd.f32 1.0, %v5229_v20 }
 0x285   :  { %v2169_v24 = vmul.f32 %v4092_v27, %v6760_v28  ;;  %6762 = vst [vmem:[#allocation104_spill] sm:$0xff] %v5566_v16  ;;  %v1127_v28 = vadd.f32 1.0, %v6766_v25  ;;  %v1128_v27 = vadd.f32 1.0, %v5225_v48  ;;  %4121 = vpow2.f32 %v3818_v15  ;;  %v5579_v16 = vpop.eup %4103  ;;  %v6772_v48 = vld [vmem:[#allocation62_spill] sm:$0xff] }
 0x286   :  { %2730 = vperm.xlu0 %3860, %v2549_v9   ;;  %4123 = vrcp.f32 %v1126_v0  ;;  %v2172_v9 = vmul.f32 %v4102_v33, %v6768_v6  ;;  %v5586_v4 = vpop.eup %4105  ;;  %v672_v37 = vadd.f32 %v5478_v22, %v6772_v48  ;;  %v673_v15 = vadd.f32 %v5478_v22, %v6773_v62  ;;  %v6774_v42 = vld [vmem:[#allocation18_spill] sm:$0xff] }
 0x287   :  { %v5568_v5 = vpop.permute.xlu0 %1855  ;;  %v2425_v44 = vcombine.high %v2169_v24, %v2169_v24  ;;  %6771 = vst [vmem:[#allocation49_spill] sm:$0xff] %v5586_v4  ;;  %4125 = vrcp.f32 %v1127_v28  ;;  %v4108_v61 = vpop.eup %4107  ;;  %v3821_v0 = vmul.f32 -1.442695, %v670_v8  ;;  %v3822_v21 = vmul.f32 -1.442695, %v671_v19  ;;  %v6776_v28 = vld [vmem:[#allocation19_spill] sm:$0xff] }
 0x288   :  { %6763 = vst [vmem:[#allocation47_spill] sm:$0xff] %v5568_v5  ;;  %v6767_v5 = vld [vmem:[#allocation111_spill] sm:$0xff]  ;;  %v5582_v25 = vpop.permute.xlu1 %1819  ;;  %4127 = vpow2.f32 %v3819_v14  ;;  %2739 = vperm.xlu1 %3861, %v2552_v32   ;;  %v2554_v62 = vcombine.low %v2170_v41, %v2426_v54  ;;  %v2428_v20 = vcombine.high %v2172_v9, %v2172_v9  ;;  %v6779_v14 = vld [vmem:[#allocation64_spill] sm:$0xff]  ;;  %v1131_v32 = vadd.f32 1.0, %v5241_v63 }
 0x289   :  { %v2171_v30 = vmul.f32 %v4100_v11, %v6767_v5  ;;  %6769 = vst [vmem:[#allocation42_spill] sm:$0xff] %v5582_v25  ;;  %v1130_v5 = vadd.f32 1.0, %v6774_v42  ;;  %v4110_v11 = vpop.eup %4109  ;;  %4129 = vpow2.f32 %v3820_v7  ;;  %v2553_v33 = vcombine.low %v2169_v24, %v2425_v44  ;;  %v6780_v24 = vld [vmem:[#allocation59_spill] sm:$0xff] }
 0x28a   :  { %2736 = vperm.xlu0 %3860, %v2551_v58   ;;  %v5595_v25 = vpop.eup %4111  ;;  %4131 = vrcp.f32 %v1128_v27  ;;  %v2174_v58 = vmul.f32 %v4110_v11, %v6776_v28  ;;  %v674_v7 = vadd.f32 %v5478_v22, %v6779_v14  ;;  %v675_v44 = vadd.f32 %v5478_v22, %v6780_v24  ;;  %v6781_v28 = vld [vmem:[#allocation115_spill] sm:$0xff] }
 0x28b   :  { %v5584_v1 = vpop.permute.xlu0 %1863  ;;  %v2427_v6 = vcombine.high %v2171_v30, %v2171_v30  ;;  %v5602_v19 = vpop.eup %4113  ;;  %4133 = vrcp.f32 %v1129_v18  ;;  %v3823_v27 = vmul.f32 -1.442695, %v672_v37  ;;  %v3824_v54 = vmul.f32 -1.442695, %v673_v15  ;;  %v6782_v18 = vld [vmem:[#allocation16_spill] sm:$0xff] }
 0x28c   :  { %6770 = vst [vmem:[#allocation106_spill] sm:$0xff] %v5584_v1  ;;  %v6775_v1 = vld [vmem:[#allocation113_spill] sm:$0xff]  ;;  %v5598_v4 = vpop.permute.xlu1 %1827  ;;  %v4116_v41 = vpop.eup %4115  ;;  %4135 = vpow2.f32 %v3821_v0  ;;  %2745 = vperm.xlu1 %3861, %v2554_v62   ;;  %v2556_v24 = vcombine.low %v2172_v9, %v2428_v20  ;;  %v2430_v63 = vcombine.high %v2174_v58, %v2174_v58  ;;  %v3826_v62 = vmul.f32 -1.442695, %v675_v44  ;;  %v6788_v20 = vld [vmem:[#allocation124_spill] sm:$0xff] }
 0x28d   :  { %v2173_v48 = vmul.f32 %v4108_v61, %v6775_v1  ;;  %6777 = vst [vmem:[#allocation44_spill] sm:$0xff] %v5598_v4  ;;  %v1132_v1 = vadd.f32 1.0, %v5243_v26  ;;  %v4118_v61 = vpop.eup %4117  ;;  %4137 = vpow2.f32 %v3822_v21  ;;  %v2555_v42 = vcombine.low %v2171_v30, %v2427_v6  ;;  %v6786_v26 = vld [vmem:[#allocation66_spill] sm:$0xff]  ;;  %v6787_v30 = vld [vmem:[#allocation61_spill] sm:$0xff] }
 0x28e   :  { %2742 = vperm.xlu0 %3860, %v2553_v33   ;;  %v2175_v14 = vmul.f32 %v4116_v41, %v6781_v28  ;;  %4139 = vrcp.f32 %v1130_v5  ;;  %v2176_v33 = vmul.f32 %v4118_v61, %v6782_v18  ;;  %v676_v0 = vadd.f32 %v5478_v22, %v6786_v26 }
 0x28f   :  { %v5600_v8 = vpop.permute.xlu0 %1871  ;;  %v2429_v11 = vcombine.high %v2173_v48, %v2173_v48  ;;  %v677_v21 = vadd.f32 %v5478_v22, %v6787_v30  ;;  %v1133_v6 = vadd.f32 1.0, %v5247_v51  ;;  %4141 = vrcp.f32 %v1131_v32  ;;  %v6790_v32 = vld [vmem:[#allocation25_spill] sm:$0xff] }
 0x290   :  { %6778 = vst [vmem:[#allocation112_spill] sm:$0xff] %v5600_v8  ;;  %v5611_v8 = vpop.eup %4119  ;;  %v5614_v4 = vpop.permute.xlu1 %1835  ;;  %v3825_v5 = vmul.f32 -1.442695, %v674_v7  ;;  %4143 = vpow2.f32 %v3823_v27  ;;  %v1134_v41 = vadd.f32 1.0, %v6788_v20  ;;  %2751 = vperm.xlu1 %3861, %v2556_v24   ;;  %v2431_v18 = vcombine.high %v2175_v14, %v2175_v14  ;;  %v6794_v27 = vld [vmem:[#allocation68_spill] sm:$0xff]  ;;  %v6796_v24 = vld [vmem:[#allocation125_spill] sm:$0xff] }
 0x291   :  { %6783 = vst [vmem:[#allocation51_spill] sm:$0xff] %v5614_v4  ;;  %v5618_v15 = vpop.eup %4121  ;;  %4145 = vpow2.f32 %v3824_v54  ;;  %v2557_v28 = vcombine.low %v2173_v48, %v2429_v11  ;;  %v2558_v30 = vcombine.low %v2174_v58, %v2430_v63  ;;  %v2432_v51 = vcombine.high %v2176_v33, %v2176_v33  ;;  %v6795_v48 = vld [vmem:[#allocation63_spill] sm:$0xff] }
 0x292   :  { %6785 = vst [vmem:[#allocation12_spill] sm:$0xff] %v5618_v15  ;;  %2748 = vperm.xlu0 %3860, %v2555_v42   ;;  %v4124_v9 = vpop.eup %4123  ;;  %4147 = vrcp.f32 %v1132_v1  ;;  %v678_v54 = vadd.f32 %v5478_v22, %v6794_v27  ;;  %v679_v11 = vadd.f32 %v5478_v22, %v6795_v48  ;;  %v3827_v1 = vmul.f32 -1.442695, %v676_v0 }
 0x293   :  { %v5616_v37 = vpop.permute.xlu0 %1882  ;;  %v4126_v61 = vpop.eup %4125  ;;  %4149 = vrcp.f32 %v1133_v6  ;;  %v3828_v63 = vmul.f32 -1.442695, %v677_v21  ;;  %v2560_v48 = vcombine.low %v2176_v33, %v2432_v51 }
 0x294   :  { %6784 = vst [vmem:[#allocation46_spill] sm:$0xff] %v5616_v37  ;;  %v6789_v37 = vld [vmem:[#allocation117_spill] sm:$0xff]  ;;  %v5627_v4 = vpop.eup %4127  ;;  %v2178_v42 = vmul.f32 %v4126_v61, %v6790_v32  ;;  %v5630_v15 = vpop.permute.xlu1 %1843  ;;  %4151 = vpow2.f32 %v3825_v5  ;;  %2757 = vperm.xlu1 %3861, %v2558_v30   ;;  %v2559_v32 = vcombine.low %v2175_v14, %v2431_v18  ;;  %v6802_v5 = vld [vmem:[#allocation72_spill] sm:$0xff]  ;;  %v3830_v30 = vmul.f32 -1.442695, %v679_v11 }
 0x295   :  { %v2177_v26 = vmul.f32 %v4124_v9, %v6789_v37  ;;  %6791 = vst [vmem:[#allocation9_spill] sm:$0xff] %v5630_v15  ;;  %v5634_v44 = vpop.eup %4129  ;;  %v1135_v37 = vadd.f32 1.0, %v6796_v24  ;;  %v6797_v9 = vld [vmem:[#allocation126_spill] sm:$0xff]  ;;  %4153 = vpow2.f32 %v3826_v62  ;;  %v6798_v15 = vld [vmem:[#allocation119_spill] sm:$0xff]  ;;  %v680_v62 = vadd.f32 %v5478_v22, %v6802_v5  ;;  %v6803_v14 = vld [vmem:[#allocation65_spill] sm:$0xff] }
 0x296   :  { %6793 = vst [vmem:[#allocation114_spill] sm:$0xff] %v5634_v44  ;;  %2754 = vperm.xlu0 %3860, %v2557_v28   ;;  %v4132_v58 = vpop.eup %4131  ;;  %v1136_v20 = vadd.f32 1.0, %v6797_v9  ;;  %4155 = vrcp.f32 %v1134_v41  ;;  %v2434_v24 = vcombine.high %v2178_v42, %v2178_v42  ;;  %v681_v18 = vadd.f32 %v5478_v22, %v6803_v14 }
 0x297   :  { %v5632_v7 = vpop.permute.xlu0 %1890  ;;  %v4134_v61 = vpop.eup %4133  ;;  %v2179_v27 = vmul.f32 %v4132_v58, %v6798_v15  ;;  %v1137_v15 = vadd.f32 1.0, %v5271_v3  ;;  %4157 = vrcp.f32 %v1135_v37  ;;  %v3829_v41 = vmul.f32 -1.442695, %v678_v54  ;;  %v6807_v37 = vld [vmem:[#allocation24_spill] sm:$0xff] }
 0x298   :  { %6792 = vst [vmem:[#allocation107_spill] sm:$0xff] %v5632_v7  ;;  %v2433_v7 = vcombine.high %v2177_v26, %v2177_v26  ;;  %v5643_v44 = vpop.eup %4135  ;;  %v2180_v6 = vmul.f32 %v4134_v61, %v5275_v46  ;;  %v5646_v28 = vpop.permute.xlu1 %1851  ;;  %4159 = vpow2.f32 %v3827_v1  ;;  %v6804_v46 = vld [vmem:[#allocation27_spill] sm:$0xff]  ;;  %2763 = vperm.xlu1 %3861, %v2560_v48   ;;  %v2562_v14 = vcombine.low %v2178_v42, %v2434_v24  ;;  %v6811_v1 = vld [vmem:[#allocation73_spill] sm:$0xff]  ;;  %v6813_v48 = vld [vmem:[#allocation22_spill] sm:$0xff] }
 0x299   :  { %6799 = vst [vmem:[#allocation53_spill] sm:$0xff] %v5646_v28  ;;  %v5650_v21 = vpop.eup %4137  ;;  %v1138_v51 = vadd.f32 1.0, %v6804_v46  ;;  %4161 = vpow2.f32 %v3828_v63  ;;  %v2435_v61 = vcombine.high %v2179_v27, %v2179_v27  ;;  %v682_v63 = vadd.f32 %v5478_v22, %v6811_v1 }
 0x29a   :  { %6801 = vst [vmem:[#allocation15_spill] sm:$0xff] %v5650_v21  ;;  %2760 = vperm.xlu0 %3860, %v2559_v32   ;;  %v4140_v33 = vpop.eup %4139  ;;  %v2561_v9 = vcombine.low %v2177_v26, %v2433_v7  ;;  %4163 = vrcp.f32 %v1136_v20  ;;  %v2436_v3 = vcombine.high %v2180_v6, %v2180_v6  ;;  %v6812_v26 = vld [vmem:[#allocation67_spill] sm:$0xff]  ;;  %v3831_v20 = vmul.f32 -1.442695, %v680_v62 }
 0x29b   :  { %v5648_v0 = vpop.permute.xlu0 %1898  ;;  %v4142_v58 = vpop.eup %4141  ;;  %v683_v7 = vadd.f32 %v5478_v22, %v6812_v26  ;;  %4165 = vrcp.f32 %v1137_v15  ;;  %v3832_v24 = vmul.f32 -1.442695, %v681_v18  ;;  %v6817_v15 = vld [vmem:[#allocation26_spill] sm:$0xff] }
 0x29c   :  { %6800 = vst [vmem:[#allocation48_spill] sm:$0xff] %v5648_v0  ;;  %v6805_v0 = vld [vmem:[#allocation120_spill] sm:$0xff]  ;;  %v5659_v28 = vpop.eup %4143  ;;  %v2182_v32 = vmul.f32 %v4142_v58, %v6807_v37  ;;  %v5662_v21 = vpop.permute.xlu1 %1859  ;;  %4167 = vpow2.f32 %v3829_v41  ;;  %2769 = vperm.xlu1 %3861, %v2562_v14   ;;  %v2563_v37 = vcombine.low %v2179_v27, %v2435_v61  ;;  %v2564_v26 = vcombine.low %v2180_v6, %v2436_v3  ;;  %v6821_v41 = vld [vmem:[#allocation75_spill] sm:$0xff] }
 0x29d   :  { %v2181_v5 = vmul.f32 %v4140_v33, %v6805_v0  ;;  %6806 = vst [vmem:[#allocation122_spill] sm:$0xff] %v5659_v28  ;;  %6808 = vst [vmem:[#allocation108_spill] sm:$0xff] %v5662_v21  ;;  %v5666_v11 = vpop.eup %4145  ;;  %v1139_v0 = vadd.f32 1.0, %v6813_v48  ;;  %v6814_v33 = vld [vmem:[#allocation127_spill] sm:$0xff]  ;;  %4169 = vpow2.f32 %v3830_v30  ;;  %v6815_v21 = vld [vmem:[#allocation121_spill] sm:$0xff]  ;;  %v684_v30 = vadd.f32 %v5478_v22, %v6821_v41 }
 0x29e   :  { %6810 = vst [vmem:[#allocation55_spill] sm:$0xff] %v5666_v11  ;;  %2766 = vperm.xlu0 %3860, %v2561_v9   ;;  %v4148_v42 = vpop.eup %4147  ;;  %v1140_v46 = vadd.f32 1.0, %v6814_v33  ;;  %4171 = vrcp.f32 %v1138_v51  ;;  %v2438_v48 = vcombine.high %v2182_v32, %v2182_v32  ;;  %v6822_v27 = vld [vmem:[#allocation71_spill] sm:$0xff]  ;;  %v3833_v51 = vmul.f32 -1.442695, %v682_v63 }
 0x29f   :  { %v5664_v54 = vpop.permute.xlu0 %1906  ;;  %v4150_v58 = vpop.eup %4149  ;;  %v2183_v1 = vmul.f32 %v4148_v42, %v6815_v21  ;;  %v689_v61 = vadd.f32 %v5478_v22, %v6822_v27  ;;  %v6823_v21 = vld [vmem:[#allocation29_spill] sm:$0xff]  ;;  %4173 = vrcp.f32 %v1139_v0  ;;  %v3834_v3 = vmul.f32 -1.442695, %v683_v7 }
 0x2a0   :  { %6809 = vst [vmem:[#allocation116_spill] sm:$0xff] %v5664_v54  ;;  %v2437_v54 = vcombine.high %v2181_v5, %v2181_v5  ;;  %v5675_v11 = vpop.eup %4151  ;;  %v2184_v9 = vmul.f32 %v4150_v58, %v6817_v15  ;;  %v5678_v28 = vpop.permute.xlu1 %1867  ;;  %v1141_v14 = vadd.f32 1.0, %v6823_v21  ;;  %4175 = vpow2.f32 %v3831_v20  ;;  %v6824_v42 = vld [vmem:[#allocation129_spill] sm:$0xff]  ;;  %2775 = vperm.xlu1 %3861, %v2564_v26  }
 0x2a1   :  { %6816 = vst [vmem:[#allocation50_spill] sm:$0xff] %v5675_v11  ;;  %6818 = vst [vmem:[#allocation17_spill] sm:$0xff] %v5678_v28  ;;  %v5682_v18 = vpop.eup %4153  ;;  %v1142_v33 = vadd.f32 1.0, %v6824_v42  ;;  %4177 = vpow2.f32 %v3832_v24  ;;  %v6825_v28 = vld [vmem:[#allocation14_spill] sm:$0xff]  ;;  %v2566_v27 = vcombine.low %v2182_v32, %v2438_v48  ;;  %v6827_v0 = vld [vmem:[#allocation33_spill] sm:$0xff] }
 0x2a2   :  { %6820 = vst [vmem:[#allocation109_spill] sm:$0xff] %v5682_v18  ;;  %2772 = vperm.xlu0 %3860, %v2563_v37   ;;  %v4156_v6 = vpop.eup %4155  ;;  %v2565_v15 = vcombine.low %v2181_v5, %v2437_v54  ;;  %4179 = vrcp.f32 %v1140_v46  ;;  %v2440_v21 = vcombine.high %v2184_v9, %v2184_v9  ;;  %v6831_v20 = vld [vmem:[#allocation69_spill] sm:$0xff]  ;;  %v3835_v46 = vmul.f32 -1.442695, %v684_v30 }
 0x2a3   :  { %v5680_v62 = vpop.permute.xlu0 %1914  ;;  %v4158_v58 = vpop.eup %4157  ;;  %v2185_v41 = vmul.f32 %v4156_v6, %v6825_v28  ;;  %v685_v24 = vadd.f32 %v5478_v22, %v6831_v20  ;;  %v6832_v5 = vld [vmem:[#allocation77_spill] sm:$0xff]  ;;  %v6833_v28 = vld [vmem:[#allocation130_spill] sm:$0xff]  ;;  %4181 = vrcp.f32 %v1141_v14  ;;  %v3840_v48 = vmul.f32 -1.442695, %v689_v61  ;;  %v6834_v6 = vld [vmem:[#allocation131_spill] sm:$0xff] }
 0x2a4   :  { %6819 = vst [vmem:[#allocation11_spill] sm:$0xff] %v5680_v62  ;;  %v2439_v62 = vcombine.high %v2183_v1, %v2183_v1  ;;  %v5691_v18 = vpop.eup %4159  ;;  %v2186_v37 = vmul.f32 %v4158_v58, %v6827_v0  ;;  %v5694_v11 = vpop.permute.xlu1 %1875  ;;  %v686_v54 = vadd.f32 %v5478_v22, %v6832_v5  ;;  %v1143_v26 = vadd.f32 1.0, %v6833_v28  ;;  %2781 = vperm.xlu1 %3861, %v2566_v27   ;;  %v6837_v14 = vld [vmem:[#allocation35_spill] sm:$0xff] }
 0x2a5   :  { %6826 = vst [vmem:[#allocation118_spill] sm:$0xff] %v5691_v18  ;;  %6828 = vst [vmem:[#allocation58_spill] sm:$0xff] %v5694_v11  ;;  %v5698_v7 = vpop.eup %4161  ;;  %4183 = vpow2.f32 %v3833_v51  ;;  %v1144_v42 = vadd.f32 1.0, %v6834_v6  ;;  %v6835_v11 = vld [vmem:[#allocation23_spill] sm:$0xff]  ;;  %v2568_v5 = vcombine.low %v2184_v9, %v2440_v21  ;;  %v6841_v51 = vld [vmem:[#allocation70_spill] sm:$0xff] }
 0x2a6   :  { %6830 = vst [vmem:[#allocation123_spill] sm:$0xff] %v5698_v7  ;;  %2778 = vperm.xlu0 %3860, %v2565_v15   ;;  %v4164_v32 = vpop.eup %4163  ;;  %4185 = vpow2.f32 %v3834_v3  ;;  %v2567_v0 = vcombine.low %v2183_v1, %v2439_v62  ;;  %v2442_v28 = vcombine.high %v2186_v37, %v2186_v37  ;;  %v687_v3 = vadd.f32 %v5478_v22, %v6841_v51  ;;  %v6842_v1 = vld [vmem:[#allocation78_spill] sm:$0xff] }
 0x2a7   :  { %v5696_v63 = vpop.permute.xlu0 %1922  ;;  %v4166_v58 = vpop.eup %4165  ;;  %v2187_v20 = vmul.f32 %v4164_v32, %v6835_v11  ;;  %4187 = vrcp.f32 %v1142_v33  ;;  %v688_v62 = vadd.f32 %v5478_v22, %v6842_v1  ;;  %v6843_v11 = vld [vmem:[#allocation31_spill] sm:$0xff]  ;;  %v3836_v33 = vmul.f32 -1.442695, %v685_v24  ;;  %v6844_v32 = vld [vmem:[#allocation133_spill] sm:$0xff] }
 0x2a8   :  { %6829 = vst [vmem:[#allocation52_spill] sm:$0xff] %v5696_v63  ;;  %v2441_v63 = vcombine.high %v2185_v41, %v2185_v41  ;;  %v5707_v7 = vpop.eup %4167  ;;  %v2188_v15 = vmul.f32 %v4166_v58, %v6837_v14  ;;  %v5710_v18 = vpop.permute.xlu1 %1886  ;;  %v1145_v27 = vadd.f32 1.0, %v6843_v11  ;;  %4189 = vrcp.f32 %v1143_v26  ;;  %2787 = vperm.xlu1 %3861, %v2568_v5   ;;  %v6847_v26 = vld [vmem:[#allocation30_spill] sm:$0xff] }
 0x2a9   :  { %6836 = vst [vmem:[#allocation110_spill] sm:$0xff] %v5707_v7  ;;  %6838 = vst [vmem:[#allocation8_spill] sm:$0xff] %v5710_v18  ;;  %v5714_v61 = vpop.eup %4169  ;;  %v3837_v21 = vmul.f32 -1.442695, %v686_v54  ;;  %4191 = vpow2.f32 %v3835_v46  ;;  %v1146_v6 = vadd.f32 1.0, %v6844_v32  ;;  %v6845_v18 = vld [vmem:[#allocation20_spill] sm:$0xff]  ;;  %v2570_v1 = vcombine.low %v2186_v37, %v2442_v28 }
 0x2aa   :  { %6840 = vst [vmem:[#allocation54_spill] sm:$0xff] %v5714_v61  ;;  %2784 = vperm.xlu0 %3860, %v2567_v0   ;;  %v4172_v9 = vpop.eup %4171  ;;  %4193 = vpow2.f32 %v3840_v48  ;;  %v2569_v14 = vcombine.low %v2185_v41, %v2441_v63  ;;  %v2444_v11 = vcombine.high %v2188_v15, %v2188_v15  ;;  %v6851_v46 = vld [vmem:[#allocation79_spill] sm:$0xff]  ;;  %v6852_v41 = vld [vmem:[#allocation74_spill] sm:$0xff]  ;;  %v3839_v28 = vmul.f32 -1.442695, %v688_v62 }
 0x2ab   :  { %v5712_v30 = vpop.permute.xlu0 %1930  ;;  %v4174_v58 = vpop.eup %4173  ;;  %v2189_v51 = vmul.f32 %v4172_v9, %v6845_v18  ;;  %4195 = vrcp.f32 %v1144_v42  ;;  %v690_v48 = vadd.f32 %v5478_v22, %v6851_v46  ;;  %v691_v63 = vadd.f32 %v5478_v22, %v6852_v41  ;;  %v6853_v18 = vld [vmem:[#allocation134_spill] sm:$0xff]  ;;  %v6854_v9 = vld [vmem:[#allocation135_spill] sm:$0xff] }
 0x2ac   :  { %6839 = vst [vmem:[#allocation60_spill] sm:$0xff] %v5712_v30  ;;  %v2443_v30 = vcombine.high %v2187_v20, %v2187_v20  ;;  %v5723_v61 = vpop.eup %4175  ;;  %v2190_v0 = vmul.f32 %v4174_v58, %v6847_v26  ;;  %v5726_v7 = vpop.permute.xlu1 %1894  ;;  %v1147_v5 = vadd.f32 1.0, %v6853_v18  ;;  %4197 = vrcp.f32 %v1145_v27  ;;  %2793 = vperm.xlu1 %3861, %v2570_v1   ;;  %v6856_v27 = vld [vmem:[#allocation97_spill] sm:$0xff] }
 0x2ad   :  { %6846 = vst [vmem:[#allocation21_spill] sm:$0xff] %v5723_v61  ;;  %6848 = vst [vmem:[#allocation111_spill] sm:$0xff] %v5726_v7  ;;  %v5730_v54 = vpop.eup %4177  ;;  %v3838_v42 = vmul.f32 -1.442695, %v687_v3  ;;  %4199 = vpow2.f32 %v3836_v33  ;;  %v1148_v32 = vadd.f32 1.0, %v6854_v9  ;;  %v6855_v7 = vld [vmem:[#allocation56_spill] sm:$0xff]  ;;  %v2572_v41 = vcombine.low %v2188_v15, %v2444_v11 }
 0x2ae   :  { %6850 = vst [vmem:[#allocation62_spill] sm:$0xff] %v5730_v54  ;;  %2790 = vperm.xlu0 %3860, %v2569_v14   ;;  %v4180_v37 = vpop.eup %4179  ;;  %4201 = vpow2.f32 %v3837_v21  ;;  %v2571_v26 = vcombine.low %v2187_v20, %v2443_v30  ;;  %v2446_v18 = vcombine.high %v2190_v0, %v2190_v0  ;;  %v6860_v33 = vld [vmem:[#allocation81_spill] sm:$0xff]  ;;  %v6861_v20 = vld [vmem:[#allocation76_spill] sm:$0xff]  ;;  %v3842_v11 = vmul.f32 -1.442695, %v691_v63 }
 0x2af   :  { %v5728_v24 = vpop.permute.xlu0 %1938  ;;  %v4182_v58 = vpop.eup %4181  ;;  %v2191_v46 = vmul.f32 %v4180_v37, %v6855_v7  ;;  %4203 = vrcp.f32 %v1146_v6  ;;  %v692_v21 = vadd.f32 %v5478_v22, %v6860_v33  ;;  %v693_v30 = vadd.f32 %v5478_v22, %v6861_v20  ;;  %v6862_v7 = vld [vmem:[#allocation136_spill] sm:$0xff] }
 0x2b0   :  { %6849 = vst [vmem:[#allocation10_spill] sm:$0xff] %v5728_v24  ;;  %v2445_v24 = vcombine.high %v2189_v51, %v2189_v51  ;;  %v5739_v54 = vpop.eup %4183  ;;  %v2192_v14 = vmul.f32 %v4182_v58, %v6856_v27  ;;  %v5742_v61 = vpop.permute.xlu1 %1902  ;;  %v1149_v1 = vadd.f32 1.0, %v6862_v7  ;;  %4205 = vrcp.f32 %v1147_v5  ;;  %v6863_v37 = vld [vmem:[#allocation92_spill] sm:$0xff]  ;;  %2799 = vperm.xlu1 %3861, %v2572_v41  }
 0x2b1   :  { %6857 = vst [vmem:[#allocation57_spill] sm:$0xff] %v5742_v61  ;;  %v5746_v62 = vpop.eup %4185  ;;  %v3841_v6 = vmul.f32 -1.442695, %v690_v48  ;;  %4207 = vpow2.f32 %v3838_v42  ;;  %v1150_v9 = vadd.f32 1.0, %v6863_v37  ;;  %v2574_v20 = vcombine.low %v2190_v0, %v2446_v18  ;;  %v6867_v42 = vld [vmem:[#allocation83_spill] sm:$0xff] }
 0x2b2   :  { %6859 = vst [vmem:[#allocation113_spill] sm:$0xff] %v5746_v62  ;;  %2796 = vperm.xlu0 %3860, %v2571_v26   ;;  %v4188_v15 = vpop.eup %4187  ;;  %4209 = vpow2.f32 %v3839_v28  ;;  %v2573_v27 = vcombine.low %v2189_v51, %v2445_v24  ;;  %v2447_v62 = vcombine.high %v2191_v46, %v2191_v46  ;;  %v2448_v7 = vcombine.high %v2192_v14, %v2192_v14  ;;  %v6868_v28 = vld [vmem:[#allocation137_spill] sm:$0xff]  ;;  %v6869_v0 = vld [vmem:[#allocation95_spill] sm:$0xff] }
 0x2b3   :  { %v5744_v3 = vpop.permute.xlu0 %1949  ;;  %v4190_v58 = vpop.eup %4189  ;;  %4211 = vrcp.f32 %v1148_v32  ;;  %v694_v41 = vadd.f32 %v5478_v22, %v6867_v42  ;;  %v1151_v51 = vadd.f32 1.0, %v6868_v28  ;;  %v1152_v32 = vadd.f32 1.0, %v6869_v0 }
 0x2b4   :  { %6858 = vst [vmem:[#allocation18_spill] sm:$0xff] %v5744_v3  ;;  %v6864_v3 = vld [vmem:[#allocation128_spill] sm:$0xff]  ;;  %v5755_v61 = vpop.eup %4191  ;;  %v2194_v5 = vmul.f32 %v4190_v58, %v5393_v57  ;;  %v5758_v26 = vpop.permute.xlu1 %1910  ;;  %4213 = vrcp.f32 %v1149_v1  ;;  %2805 = vperm.xlu1 %3861, %v2574_v20   ;;  %v2575_v18 = vcombine.low %v2191_v46, %v2447_v62  ;;  %v2576_v42 = vcombine.low %v2192_v14, %v2448_v7  ;;  %v6876_v46 = vld [vmem:[#allocation85_spill] sm:$0xff] }
 0x2b5   :  { %v2193_v33 = vmul.f32 %v4188_v15, %v6864_v3  ;;  %6865 = vst [vmem:[#allocation19_spill] sm:$0xff] %v5755_v61  ;;  %v4194_v63 = vpop.eup %4193  ;;  %v3843_v3 = vmul.f32 -1.442695, %v692_v21  ;;  %v3844_v15 = vmul.f32 -1.442695, %v693_v30  ;;  %4215 = vpow2.f32 %v3841_v6  ;;  %v6870_v58 = vld [vmem:[#allocation132_spill] sm:$0xff] }
 0x2b6   :  { %2802 = vperm.xlu0 %3860, %v2573_v27   ;;  %v4196_v24 = vpop.eup %4195  ;;  %4217 = vpow2.f32 %v3842_v11  ;;  %v2450_v28 = vcombine.high %v2194_v5, %v2194_v5  ;;  %v6875_v6 = vld [vmem:[#allocation80_spill] sm:$0xff]  ;;  %v696_v62 = vadd.f32 %v5478_v22, %v6876_v46  ;;  %v6877_v20 = vld [vmem:[#allocation37_spill] sm:$0xff]  ;;  %v1201_v0 = vadd.f32 1.0, %v4194_v63  ;;  %v6883_v63 = vld [vmem:[#allocation82_spill] sm:$0xff] }
 0x2b7   :  { %v5760_v48 = vpop.permute.xlu0 %1957  ;;  %v4198_v57 = vpop.eup %4197  ;;  %v2449_v37 = vcombine.high %v2193_v33, %v2193_v33  ;;  %v2195_v61 = vmul.f32 %v4196_v24, %v6870_v58  ;;  %4219 = vrcp.f32 %v1150_v9  ;;  %v695_v11 = vadd.f32 %v5478_v22, %v6875_v6 }
 0x2b8   :  { %6866 = vst [vmem:[#allocation64_spill] sm:$0xff] %v5760_v48  ;;  %v5767_v48 = vpop.eup %4199  ;;  %v2196_v1 = vmul.f32 %v4198_v57, %v5411_v34  ;;  %v5770_v27 = vpop.permute.xlu1 %1918  ;;  %v1153_v24 = vadd.f32 1.0, %v6877_v20  ;;  %4221 = vrcp.f32 %v1151_v51  ;;  %v3845_v9 = vmul.f32 -1.442695, %v694_v41  ;;  %v6878_v34 = vld [vmem:[#allocation138_spill] sm:$0xff]  ;;  %2811 = vperm.xlu1 %3861, %v2576_v42  }
 0x2b9   :  { %6871 = vst [vmem:[#allocation59_spill] sm:$0xff] %v5767_v48  ;;  %6872 = vst [vmem:[#allocation115_spill] sm:$0xff] %v5770_v27  ;;  %v5774_v30 = vpop.eup %4201  ;;  %4223 = vpow2.f32 %v3843_v3  ;;  %v1154_v7 = vadd.f32 1.0, %v6878_v34  ;;  %v2577_v58 = vcombine.low %v2193_v33, %v2449_v37  ;;  %v6879_v48 = vld [vmem:[#allocation28_spill] sm:$0xff]  ;;  %v2578_v46 = vcombine.low %v2194_v5, %v2450_v28  ;;  %v6884_v33 = vld [vmem:[#allocation87_spill] sm:$0xff] }
 0x2ba   :  { %6874 = vst [vmem:[#allocation66_spill] sm:$0xff] %v5774_v30  ;;  %2808 = vperm.xlu0 %3860, %v2575_v18   ;;  %v4204_v14 = vpop.eup %4203  ;;  %4225 = vpow2.f32 %v3844_v15  ;;  %v2451_v30 = vcombine.high %v2195_v61, %v2195_v61  ;;  %v2452_v20 = vcombine.high %v2196_v1, %v2196_v1  ;;  %v697_v15 = vadd.f32 %v5478_v22, %v6883_v63 }
 0x2bb   :  { %v5772_v21 = vpop.permute.xlu0 %1965  ;;  %v4206_v57 = vpop.eup %4205  ;;  %v2197_v6 = vmul.f32 %v4204_v14, %v6879_v48  ;;  %4227 = vrcp.f32 %v1152_v32  ;;  %v698_v37 = vadd.f32 %v5478_v22, %v6884_v33  ;;  %v1155_v48 = vadd.f32 1.0, %v5388_v45 }
 0x2bc   :  { %6873 = vst [vmem:[#allocation16_spill] sm:$0xff] %v5772_v21  ;;  %v5783_v21 = vpop.eup %4207  ;;  %v2198_v51 = vmul.f32 %v4206_v57, %v5422_v47  ;;  %v5786_v18 = vpop.permute.xlu1 %1926  ;;  %4229 = vrcp.f32 %v1153_v24  ;;  %v3846_v32 = vmul.f32 -1.442695, %v695_v11  ;;  %v3847_v42 = vmul.f32 -1.442695, %v696_v62  ;;  %v6885_v47 = vld [vmem:[#allocation101_spill] sm:$0xff]  ;;  %2817 = vperm.xlu1 %3861, %v2578_v46  }
 0x2bd   :  { %6880 = vst [vmem:[#allocation61_spill] sm:$0xff] %v5783_v21  ;;  %6881 = vst [vmem:[#allocation124_spill] sm:$0xff] %v5786_v18  ;;  %v5790_v3 = vpop.eup %4209  ;;  %v1156_v28 = vadd.f32 1.0, %v6885_v47  ;;  %4231 = vrcp.f32 %v1201_v0  ;;  %v2579_v34 = vcombine.low %v2195_v61, %v2451_v30  ;;  %v2453_v57 = vcombine.high %v2197_v6, %v2197_v6  ;;  %v6886_v18 = vld [vmem:[#allocation90_spill] sm:$0xff]  ;;  %v6889_v0 = vld [vmem:[#allocation84_spill] sm:$0xff] }
 0x2be   :  { %2814 = vperm.xlu0 %3860, %v2577_v58   ;;  %v4212_v5 = vpop.eup %4211  ;;  %4233 = vpow2.f32 %v3845_v9  ;;  %v2580_v33 = vcombine.low %v2196_v1, %v2452_v20  ;;  %v2454_v45 = vcombine.high %v2198_v51, %v2198_v51  ;;  %v699_v9 = vadd.f32 %v5478_v22, %v6889_v0 }
 0x2bf   :  { %v5788_v41 = vpop.permute.xlu0 %1973  ;;  %v4214_v14 = vpop.eup %4213  ;;  %v2199_v63 = vmul.f32 %v4212_v5, %v6886_v18  ;;  %4235 = vrcp.f32 %v1154_v7  ;;  %v1157_v61 = vadd.f32 1.0, %v5401_v39  ;;  %v3848_v46 = vmul.f32 -1.442695, %v697_v15  ;;  %v6890_v5 = vld [vmem:[#allocation93_spill] sm:$0xff] }
 0x2c0   :  { %6882 = vst [vmem:[#allocation117_spill] sm:$0xff] %v5788_v41  ;;  %v5799_v21 = vpop.eup %4215  ;;  %v2200_v24 = vmul.f32 %v4214_v14, %v5434_v38  ;;  %v5802_v58 = vpop.permute.xlu1 %1934  ;;  %4237 = vrcp.f32 %v1155_v48  ;;  %v3849_v7 = vmul.f32 -1.442695, %v698_v37  ;;  %v1158_v1 = vadd.f32 1.0, %v5406_v49  ;;  %2823 = vperm.xlu1 %3861, %v2580_v33   ;;  %v6895_v33 = vld [vmem:[#allocation99_spill] sm:$0xff] }
 0x2c1   :  { %6887 = vst [vmem:[#allocation25_spill] sm:$0xff] %v5802_v58  ;;  %v5806_v62 = vpop.eup %4217  ;;  %4239 = vpow2.f32 %v3846_v32  ;;  %v2581_v20 = vcombine.low %v2197_v6, %v2453_v57  ;;  %v2455_v18 = vcombine.high %v2199_v63, %v2199_v63  ;;  %v2582_v0 = vcombine.low %v2198_v51, %v2454_v45 }
 0x2c2   :  { %2820 = vperm.xlu0 %3860, %v2579_v34   ;;  %v4220_v30 = vpop.eup %4219  ;;  %4241 = vpow2.f32 %v3847_v42  ;;  %v2456_v39 = vcombine.high %v2200_v24, %v2200_v24  ;;  %v1159_v49 = vadd.f32 1.0, %v5418_v29  ;;  %v3850_v32 = vmul.f32 -1.442695, %v699_v9 }
 0x2c3   :  { %v5804_v11 = vpop.permute.xlu0 %1981  ;;  %v4222_v38 = vpop.eup %4221  ;;  %v2201_v47 = vmul.f32 %v4220_v30, %v6890_v5  ;;  %4243 = vrcp.f32 %v1156_v28  ;;  %v1160_v42 = vadd.f32 1.0, %v5432_v12  ;;  %v1161_v51 = vadd.f32 1.0, %v5442_v17 }
 0x2c4   :  { %6888 = vst [vmem:[#allocation68_spill] sm:$0xff] %v5804_v11  ;;  %v5813_v14 = vpop.eup %4223  ;;  %v2202_v48 = vmul.f32 %v4222_v38, %v5446_v56  ;;  %v5816_v34 = vpop.permute.xlu1 %1942  ;;  %4245 = vrcp.f32 %v1157_v61  ;;  %2829 = vperm.xlu1 %3861, %v2582_v0   ;;  %v2583_v56 = vcombine.low %v2199_v63, %v2455_v18  ;;  %v2584_v38 = vcombine.low %v2200_v24, %v2456_v39  ;;  %v6899_v0 = vld [vmem:[#allocation32_spill] sm:$0xff] }
 0x2c5   :  { %6891 = vst [vmem:[#allocation63_spill] sm:$0xff] %v5813_v14  ;;  %6892 = vst [vmem:[#allocation125_spill] sm:$0xff] %v5816_v34  ;;  %v5820_v37 = vpop.eup %4225  ;;  %4247 = vpow2.f32 %v3848_v46  ;;  %v2457_v57 = vcombine.high %v2201_v47, %v2201_v47  ;;  %v1162_v12 = vadd.f32 1.0, %v5453_v36  ;;  %v1164_v24 = vadd.f32 1.0, %v5483_v59 }
 0x2c6   :  { %6894 = vst [vmem:[#allocation119_spill] sm:$0xff] %v5820_v37  ;;  %2826 = vperm.xlu0 %3860, %v2581_v20   ;;  %v4228_v6 = vpop.eup %4227  ;;  %4249 = vpow2.f32 %v3849_v7  ;;  %v2458_v29 = vcombine.high %v2202_v48, %v2202_v48  ;;  %v1163_v7 = vadd.f32 1.0, %v5465_v2 }
 0x2c7   :  { %v5818_v15 = vpop.permute.xlu0 %1989  ;;  %v4230_v28 = vpop.eup %4229  ;;  %v2203_v45 = vmul.f32 %v4228_v6, %v6895_v33  ;;  %4251 = vrcp.f32 %v1158_v1  ;;  %v1165_v1 = vadd.f32 1.0, %v5488_v50  ;;  %v2585_v18 = vcombine.low %v2201_v47, %v2457_v57 }
 0x2c8   :  { %6893 = vst [vmem:[#allocation126_spill] sm:$0xff] %v5818_v15  ;;  %v4232_v30 = vpop.eup %4231  ;;  %v2204_v61 = vmul.f32 %v4230_v28, %v5458_v13  ;;  %v1954_v20 = vpop.permute.xlu1 %1953  ;;  %4253 = vrcp.f32 %v1159_v49  ;;  %2835 = vperm.xlu1 %3861, %v2584_v38   ;;  %v2586_v49 = vcombine.low %v2202_v48, %v2458_v29  ;;  %v1166_v50 = vadd.f32 1.0, %v5503_v31 }
 0x2c9   :  { %v5829_v46 = vpop.eup %4233  ;;  %v5832_v17 = vmul.f32 %v4232_v30, %v1954_v20  ;;  %4255 = vpow2.f32 %v3850_v32  ;;  %v2459_v5 = vcombine.high %v2203_v45, %v2203_v45  ;;  %v1169_v48 = vadd.f32 1.0, %v5538_v52 }
 0x2ca   :  { %6897 = vst [vmem:[#allocation65_spill] sm:$0xff] %v5829_v46  ;;  %2832 = vperm.xlu0 %3860, %v2583_v56   ;;  %v4236_v63 = vpop.eup %4235  ;;  %4257 = vrcp.f32 %v1160_v42  ;;  %v2460_v6 = vcombine.high %v2204_v61, %v2204_v61  ;;  %v1167_v42 = vadd.f32 1.0, %v5517_v10  ;;  %v1168_v56 = vadd.f32 1.0, %v5531_v43 }
 0x2cb   :  { %v5827_v9 = vpop.permute.xlu0 %1997  ;;  %6898 = vst [vmem:[#allocation27_spill] sm:$0xff] %v5832_v17  ;;  %v4238_v13 = vpop.eup %4237  ;;  %v2205_v39 = vmul.f32 %v4236_v63, %v6899_v0  ;;  %4259 = vrcp.f32 %v1161_v51  ;;  %v2587_v51 = vcombine.low %v2203_v45, %v2459_v5  ;;  %v1170_v20 = vadd.f32 1.0, %v5547_v55  ;;  %v6910_v0 = vld [vmem:[#allocation41_spill] sm:$0xff] }
 0x2cc   :  { %6896 = vst [vmem:[#allocation72_spill] sm:$0xff] %v5827_v9  ;;  %v5838_v36 = vpop.eup %4239  ;;  %v2206_v32 = vmul.f32 %v4238_v13, %v5472_v53  ;;  %v5841_v28 = vpop.permute.xlu1 %1961  ;;  %4261 = vrcp.f32 %v1162_v12  ;;  %2841 = vperm.xlu1 %3861, %v2586_v49   ;;  %v2588_v31 = vcombine.low %v2204_v61, %v2460_v6  ;;  %v6907_v12 = vld [vmem:[#allocation40_spill] sm:$0xff]  ;;  %v1172_v63 = vadd.f32 1.0, %v5563_v35 }
 0x2cd   :  { %6900 = vst [vmem:[#allocation120_spill] sm:$0xff] %v5838_v36  ;;  %6901 = vst [vmem:[#allocation24_spill] sm:$0xff] %v5841_v28  ;;  %v5845_v59 = vpop.eup %4241  ;;  %4263 = vrcp.f32 %v1163_v7  ;;  %v2461_v57 = vcombine.high %v2205_v39, %v2205_v39  ;;  %v1173_v61 = vadd.f32 1.0, %v5570_v23 }
 0x2ce   :  { %6903 = vst [vmem:[#allocation67_spill] sm:$0xff] %v5845_v59  ;;  %2838 = vperm.xlu0 %3860, %v2585_v18   ;;  %v4244_v47 = vpop.eup %4243  ;;  %4265 = vrcp.f32 %v1164_v24  ;;  %v2462_v38 = vcombine.high %v2206_v32, %v2206_v32 }
 0x2cf   :  { %v5843_v2 = vpop.permute.xlu0 %2005  ;;  %v4246_v53 = vpop.eup %4245  ;;  %v2207_v33 = vmul.f32 %v4244_v47, %v5413_v40  ;;  %4267 = vrcp.f32 %v1165_v1  ;;  %v1171_v40 = vadd.f32 1.0, %v6907_v12  ;;  %v2589_v7 = vcombine.low %v2205_v39, %v2461_v57  ;;  %v6908_v1 = vld [vmem:[#allocation103_spill] sm:$0xff]  ;;  %v6912_v47 = vld [vmem:[#allocation49_spill] sm:$0xff] }
 0x2d0   :  { %6902 = vst [vmem:[#allocation73_spill] sm:$0xff] %v5843_v2  ;;  %v5852_v30 = vpop.eup %4247  ;;  %v2208_v29 = vmul.f32 %v4246_v53, %v5492_v60  ;;  %v5855_v10 = vpop.permute.xlu1 %1969  ;;  %4269 = vrcp.f32 %v1166_v50  ;;  %2847 = vperm.xlu1 %3861, %v2588_v31   ;;  %v2590_v55 = vcombine.low %v2206_v32, %v2462_v38  ;;  %v1174_v50 = vadd.f32 1.0, %v5579_v16  ;;  %v6913_v57 = vld [vmem:[#allocation39_spill] sm:$0xff] }
 0x2d1   :  { %6904 = vst [vmem:[#allocation22_spill] sm:$0xff] %v5852_v30  ;;  %6905 = vst [vmem:[#allocation127_spill] sm:$0xff] %v5855_v10  ;;  %v5859_v52 = vpop.eup %4249  ;;  %4271 = vrcp.f32 %v1167_v42  ;;  %v2463_v24 = vcombine.high %v2207_v33, %v2207_v33  ;;  %v1175_v42 = vadd.f32 1.0, %v6912_v47  ;;  %v6938_v10 = vld [vmem:[#allocation42_spill] sm:$0xff] }
 0x2d2   :  { %6906 = vst [vmem:[#allocation121_spill] sm:$0xff] %v5859_v52  ;;  %2844 = vperm.xlu0 %3860, %v2587_v51   ;;  %v4252_v45 = vpop.eup %4251  ;;  %4273 = vrcp.f32 %v1168_v56  ;;  %v2464_v5 = vcombine.high %v2208_v29, %v2208_v29  ;;  %v1176_v56 = vadd.f32 1.0, %v5595_v25 }
 0x2d3   :  { %v5857_v43 = vpop.permute.xlu0 %2652  ;;  %v4254_v60 = vpop.eup %4253  ;;  %v2209_v13 = vmul.f32 %v4252_v45, %v6908_v1  ;;  %4275 = vrcp.f32 %v1169_v48  ;;  %v1177_v48 = vadd.f32 1.0, %v5602_v19  ;;  %v2591_v53 = vcombine.low %v2207_v33, %v2463_v24  ;;  %v6914_v45 = vld [vmem:[#allocation98_spill] sm:$0xff]  ;;  %v6916_v33 = vld [vmem:[#allocation12_spill] sm:$0xff] }
 0x2d4   :  { %v5866_v18 = vpop.eup %4255  ;;  %v2210_v49 = vmul.f32 %v4254_v60, %v6910_v0  ;;  %v5869_v6 = vpop.permute.xlu1 %1977  ;;  %4277 = vrcp.f32 %v1170_v20  ;;  %2853 = vperm.xlu1 %3861, %v2590_v55   ;;  %v2592_v16 = vcombine.low %v2208_v29, %v2464_v5  ;;  %v1178_v19 = vadd.f32 1.0, %v5611_v8  ;;  %v6917_v55 = vld [vmem:[#allocation94_spill] sm:$0xff]  ;;  %v6918_v8 = vld [vmem:[#allocation100_spill] sm:$0xff] }
 0x2d5   :  { %6909 = vst [vmem:[#allocation26_spill] sm:$0xff] %v5866_v18  ;;  %6911 = vst [vmem:[#allocation75_spill] sm:$0xff] %v5869_v6  ;;  %v4258_v23 = vpop.eup %4257  ;;  %4279 = vrcp.f32 %v1171_v40  ;;  %v2465_v51 = vcombine.high %v2209_v13, %v2209_v13  ;;  %v1180_v24 = vadd.f32 1.0, %v5627_v4  ;;  %v6920_v4 = vld [vmem:[#allocation89_spill] sm:$0xff] }
 0x2d6   :  { %2850 = vperm.xlu0 %3860, %v2589_v7   ;;  %v4260_v39 = vpop.eup %4259  ;;  %4281 = vrcp.f32 %v1172_v63  ;;  %v2211_v31 = vmul.f32 %v4258_v23, %v6913_v57  ;;  %v2466_v20 = vcombine.high %v2210_v49, %v2210_v49  ;;  %v1179_v63 = vadd.f32 1.0, %v6916_v33 }
 0x2d7   :  { %v5871_v35 = vpop.permute.xlu0 %2658  ;;  %v4262_v32 = vpop.eup %4261  ;;  %4283 = vrcp.f32 %v1173_v61  ;;  %v2212_v12 = vmul.f32 %v4260_v39, %v6914_v45  ;;  %v2593_v61 = vcombine.low %v2209_v13, %v2465_v51  ;;  %v6923_v45 = vld [vmem:[#allocation105_spill] sm:$0xff] }
 0x2d8   :  { %v4264_v38 = vpop.eup %4263  ;;  %v5879_v60 = vpop.permute.xlu1 %1985  ;;  %4285 = vrcp.f32 %v1174_v50  ;;  %2859 = vperm.xlu1 %3861, %v2592_v16   ;;  %v2467_v1 = vcombine.high %v2211_v31, %v2211_v31  ;;  %v2213_v5 = vmul.f32 %v4262_v32, %v6917_v55  ;;  %v2594_v23 = vcombine.low %v2210_v49, %v2466_v20  ;;  %v6921_v16 = vld [vmem:[#allocation114_spill] sm:$0xff] }
 0x2d9   :  { %6915 = vst [vmem:[#allocation71_spill] sm:$0xff] %v5879_v60  ;;  %v4266_v25 = vpop.eup %4265  ;;  %4287 = vrcp.f32 %v1175_v42  ;;  %v2468_v39 = vcombine.high %v2212_v12, %v2212_v12  ;;  %v2214_v50 = vmul.f32 %v4264_v38, %v6918_v8  ;;  %v700_v42 = vadd.f32 %v5478_v22, %v6920_v4 }
 0x2da   :  { %2856 = vperm.xlu0 %3860, %v2591_v53   ;;  %v4268_v40 = vpop.eup %4267  ;;  %4289 = vrcp.f32 %v1176_v56  ;;  %v1181_v56 = vadd.f32 1.0, %v6921_v16  ;;  %v1182_v32 = vadd.f32 1.0, %v5643_v44  ;;  %v2595_v38 = vcombine.low %v2211_v31, %v2467_v1  ;;  %v6925_v16 = vld [vmem:[#allocation102_spill] sm:$0xff] }
 0x2db   :  { %v5881_v7 = vpop.permute.xlu0 %2664  ;;  %v4270_v29 = vpop.eup %4269  ;;  %4291 = vrcp.f32 %v1177_v48  ;;  %v6922_v48 = vld [vmem:[#allocation15_spill] sm:$0xff]  ;;  %v2469_v20 = vcombine.high %v2213_v5, %v2213_v5  ;;  %v2215_v33 = vmul.f32 %v4266_v25, %v6923_v45  ;;  %v6924_v55 = vlaneseq  ;;  %v6927_v1 = vld [vmem:[#allocation122_spill] sm:$0xff] }
 0x2dc   :  { %v4272_v0 = vpop.eup %4271  ;;  %v5888_v47 = vpop.permute.xlu1 %1993  ;;  %4293 = vrcp.f32 %v1178_v19  ;;  %v1183_v49 = vadd.f32 1.0, %v6922_v48  ;;  %2865 = vperm.xlu1 %3861, %v2594_v23   ;;  %v2596_v19 = vcombine.low %v2212_v12, %v2468_v39  ;;  %v2216_v44 = vmul.f32 %v4268_v40, %v6925_v16  ;;  %v6928_v12 = vld [vmem:[#allocation55_spill] sm:$0xff]  ;;  %v6929_v39 = vld [vmem:[#allocation50_spill] sm:$0xff] }
 0x2dd   :  { %6919 = vst [vmem:[#allocation29_spill] sm:$0xff] %v5888_v47  ;;  %v4274_v57 = vpop.eup %4273  ;;  %4295 = vrcp.f32 %v1179_v63  ;;  %v5901_v8 = vand.u32 127, %v6924_v55  ;;  %v5912_v31 = vmul.f32 -1.442695, %v700_v42  ;;  %v1184_v25 = vadd.f32 1.0, %v6927_v1  ;;  %v6930_v55 = vld [vmem:[#allocation109_spill] sm:$0xff] }
 0x2de   :  { %2862 = vperm.xlu0 %3860, %v2593_v61   ;;  %v4276_v13 = vpop.eup %4275  ;;  %4297 = vrcp.f32 %v1180_v24  ;;  %v2470_v61 = vcombine.high %v2214_v50, %v2214_v50  ;;  %v1185_v24 = vadd.f32 1.0, %v6928_v12  ;;  %v5920_v40 = vadd.f32 1.0, %v6929_v39  ;;  %v6932_v39 = vld [vmem:[#allocation104_spill] sm:$0xff] }
 0x2df   :  { %v5890_v53 = vpop.permute.xlu0 %2670  ;;  %v5897_v51 = vpop.eup %4277  ;;  %4299 = vrcp.f32 %v1181_v56  ;;  %v3041_v48 = vadd.s32 4294967288, %v5901_v8  ;;  %v5923_v16 = vadd.f32 1.0, %v6930_v55  ;;  %v2597_v2 = vcombine.low %v2213_v5, %v2469_v20  ;;  %v6931_v56 = vld [vmem:[#allocation34_spill] sm:$0xff]  ;;  %v6934_v5 = vld [vmem:[#allocation13_spill] sm:$0xff] }
 0x2e0   :  { %v5903_v4 = vpop.eup %4279  ;;  %v5906_v34 = vpop.permute.xlu1 %2001  ;;  %4301 = vrcp.f32 %v1182_v32  ;;  %2871 = vperm.xlu1 %3861, %v2596_v19   ;;  %v2471_v1 = vcombine.high %v2215_v33, %v2215_v33  ;;  %v2598_v12 = vcombine.low %v2214_v50, %v2470_v61  ;;  %v2472_v9 = vcombine.high %v2216_v44, %v2216_v44  ;;  %v6936_v61 = vld [vmem:[#allocation123_spill] sm:$0xff] }
 0x2e1   :  { %6926 = vst [vmem:[#allocation129_spill] sm:$0xff] %v5906_v34  ;;  %v5910_v23 = vpop.eup %4281  ;;  %v3048_v34 = vadd.s32 4294967280, %v5901_v8  ;;  %4303 = vrcp.f32 %v1183_v49  ;;  %v2218_v47 = vmul.f32 %v4272_v0, %v6932_v39  ;;  %v5940_v20 = vsub.s32 %v5901_v8, %v6934_v5  ;;  %v6935_v0 = vld [vmem:[#allocation118_spill] sm:$0xff] }
 0x2e2   :  { %2868 = vperm.xlu0 %3860, %v2595_v38   ;;  %v5916_v45 = vpop.eup %4283  ;;  %v2217_v38 = vmul.f32 %v4270_v29, %v6931_v56  ;;  %4305 = vrcp.f32 %v1184_v25  ;;  %v5943_v29 = vsub.s32 %v3041_v48, %v6934_v5  ;;  %v3055_v50 = vadd.s32 4294967272, %v5901_v8  ;;  %v6937_v48 = vld [vmem:[#allocation96_spill] sm:$0xff] }
 0x2e3   :  { %v5908_v63 = vpop.permute.xlu0 %2676  ;;  %v5925_v42 = vpop.eup %4285  ;;  %v5949_v19 = vadd.f32 1.0, %v6935_v0  ;;  %v5952_v56 = vadd.f32 1.0, %v6936_v61  ;;  %4307 = vrcp.f32 %v1185_v24  ;;  %v3062_v25 = vadd.s32 4294967264, %v5901_v8 }
 0x2e4   :  { %v5929_v58 = vpop.eup %4287  ;;  %v5932_v15 = vpop.permute.xlu1 %2009  ;;  %2877 = vperm.xlu1 %3861, %v2598_v12   ;;  %v2219_v60 = vmul.f32 %v4274_v57, %v6937_v48  ;;  %v5959_v11 = vsub.s32 %v3048_v34, %v6934_v5  ;;  %v2600_v0 = vcombine.low %v2216_v44, %v2472_v9  ;;  %v2474_v41 = vcombine.high %v2218_v47, %v2218_v47 }
 0x2e5   :  { %6933 = vst [vmem:[#allocation14_spill] sm:$0xff] %v5932_v15  ;;  %v5936_v32 = vpop.eup %4289  ;;  %v2473_v15 = vcombine.high %v2217_v38, %v2217_v38  ;;  %v2220_v61 = vmul.f32 %v4276_v13, %v6938_v10  ;;  %v3040_v12 = vrot.slane %v5857_v43, %v5940_v20  ;;  %v5970_v57 = vsub.s32 %v3055_v50, %v6934_v5 }
 0x2e6   :  { %2874 = vperm.xlu0 %3860, %v2597_v2   ;;  %v5946_v49 = vpop.eup %4291  ;;  %v2599_v2 = vcombine.low %v2215_v33, %v2471_v1  ;;  %v3069_v34 = vadd.s32 4294967256, %v5901_v8  ;;  %v5976_v9 = vsub.s32 %v3062_v25, %v6934_v5  ;;  %v3076_v10 = vadd.s32 4294967248, %v5901_v8  ;;  %v6940_v25 = vld [vmem:[#allocation44_spill] sm:$0xff] }
 0x2e7   :  { %v5934_v55 = vpop.permute.xlu0 %2682  ;;  %v5955_v39 = vpop.eup %4293  ;;  %v2601_v43 = vcombine.low %v2217_v38, %v2473_v15  ;;  %v2475_v44 = vcombine.high %v2219_v60, %v2219_v60  ;;  %v2602_v28 = vcombine.low %v2218_v47, %v2474_v41  ;;  %v2476_v17 = vcombine.high %v2220_v61, %v2220_v61 }
 0x2e8   :  { %v5961_v6 = vpop.eup %4295  ;;  %v2656_v24 = vpop.permute.xlu1 %2655  ;;  %2883 = vperm.xlu1 %3861, %v2600_v0   ;;  %v2222_v52 = vmul.f32 %v5903_v4, %v6940_v25  ;;  %v3052_v30 = vrot.slane %v5871_v35, %v5959_v11  ;;  %v3090_v15 = vadd.s32 4294967232, %v5901_v8  ;;  %v3083_v41 = vadd.s32 4294967240, %v5901_v8 }
 0x2e9   :  { %v3045_v33 = vrot.slane %v2656_v24, %v5943_v29  ;;  %v5973_v1 = vpop.eup %4297  ;;  %v6001_v4 = vsub.s32 %v3076_v10, %v6934_v5  ;;  %v2604_v36 = vcombine.low %v2220_v61, %v2476_v17  ;;  %v6942_v10 = vld [vmem:[#allocation51_spill] sm:$0xff]  ;;  %v3097_v17 = vadd.s32 4294967224, %v5901_v8 }
 0x2ea   :  { %2880 = vperm.xlu0 %3860, %v2599_v2   ;;  %v5979_v13 = vpop.eup %4299  ;;  %v6939_v2 = vld [vmem:[#allocation36_spill] sm:$0xff]  ;;  %v2478_v46 = vcombine.high %v2222_v52, %v2222_v52  ;;  %v2224_v27 = vmul.f32 %v5916_v45, %v6942_v10  ;;  %v3104_v61 = vadd.s32 4294967216, %v5901_v8  ;;  %4309 = vrcp.f32 %v5920_v40 }
 0x2eb   :  { %v5964_v18 = vpop.permute.xlu0 %2688  ;;  %v2221_v50 = vmul.f32 %v5897_v51, %v6939_v2  ;;  %v3047_v48 = vsel %vm3046_vm0, %v3045_v33, %v3040_v12  ;;  %v5984_v24 = vpop.eup %4301  ;;  %v5995_v51 = vsub.s32 %v3069_v34, %v6934_v5  ;;  %v2603_v33 = vcombine.low %v2219_v60, %v2475_v44 }
 0x2ec   :  { %v2662_v0 = vpop.permute.xlu1 %2661  ;;  %v5998_v47 = vpop.eup %4303  ;;  %v3054_v35 = vsel %vm3053_vm1, %v3052_v30, %v3047_v48  ;;  %2889 = vperm.xlu1 %3861, %v2602_v28   ;;  %v3066_v30 = vrot.slane %v5881_v7, %v5976_v9  ;;  %v6018_v60 = vsub.s32 %v3090_v15, %v6934_v5  ;;  %v6022_v44 = vsub.s32 %v3083_v41, %v6934_v5  ;;  %v6944_v41 = vld [vmem:[#allocation9_spill] sm:$0xff] }
 0x2ed   :  { %v3059_v38 = vrot.slane %v2662_v0, %v5970_v57  ;;  %v6004_v12 = vpop.eup %4305  ;;  %v2477_v2 = vcombine.high %v2221_v50, %v2221_v50  ;;  %v2480_v10 = vcombine.high %v2224_v27, %v2224_v27  ;;  %v3080_v37 = vrot.slane %v5890_v53, %v6001_v4 }
 0x2ee   :  { %2886 = vperm.xlu0 %3860, %v2601_v43   ;;  %v6941_v43 = vld [vmem:[#allocation43_spill] sm:$0xff]  ;;  %v6009_v0 = vpop.eup %4307  ;;  %4311 = vrcp.f32 %v5923_v16 }
 0x2ef   :  { %v5990_v59 = vpop.permute.xlu0 %2694  ;;  %v2223_v34 = vmul.f32 %v5910_v23, %v6941_v43  ;;  %v3061_v25 = vsel %vm3060_vm2, %v3059_v38, %v3054_v35  ;;  %v2605_v7 = vcombine.low %v2221_v50, %v2477_v2  ;;  %v6943_v35 = vld [vmem:[#allocation38_spill] sm:$0xff]  ;;  %4313 = vrcp.f32 %v5949_v19 }
 0x2f0   :  { %v2668_v28 = vpop.permute.xlu1 %2667  ;;  %v3068_v45 = vsel %vm3067_vm3, %v3066_v30, %v3061_v25  ;;  %2895 = vperm.xlu1 %3861, %v2604_v36   ;;  %v2225_v15 = vmul.f32 %v5925_v42, %v6943_v35  ;;  %v3118_v36 = vadd.s32 4294967200, %v5901_v8  ;;  %v6039_v42 = vsub.s32 %v3097_v17, %v6934_v5  ;;  %v6945_v30 = vld [vmem:[#allocation45_spill] sm:$0xff] }
 0x2f1   :  { %v3073_v23 = vrot.slane %v2668_v28, %v5995_v51  ;;  %v2479_v38 = vcombine.high %v2223_v34, %v2223_v34  ;;  %v2226_v28 = vmul.f32 %v5929_v58, %v6944_v41  ;;  %4315 = vrcp.f32 %v5952_v56 }
 0x2f2   :  { %2892 = vperm.xlu0 %3860, %v2603_v33   ;;  %v2606_v33 = vcombine.low %v2222_v52, %v2478_v46  ;;  %v3111_v46 = vadd.s32 4294967208, %v5901_v8  ;;  %v6043_v52 = vsub.s32 %v3104_v61, %v6934_v5  ;;  %v2481_v2 = vcombine.high %v2225_v15, %v2225_v15 }
 0x2f3   :  { %v6015_v48 = vpop.permute.xlu0 %2700  ;;  %v3075_v43 = vsel %vm3074_vm4, %v3073_v23, %v3068_v45  ;;  %v2607_v53 = vcombine.low %v2223_v34, %v2479_v38  ;;  %v2227_v23 = vmul.f32 %v5936_v32, %v6945_v30  ;;  %v2608_v45 = vcombine.low %v2224_v27, %v2480_v10  ;;  %v6947_v10 = vld [vmem:[#allocation47_spill] sm:$0xff] }
 0x2f4   :  { %v2674_v14 = vpop.permute.xlu1 %2673  ;;  %v3082_v58 = vsel %vm3081_vm5, %v3080_v37, %v3075_v43  ;;  %2901 = vperm.xlu1 %3861, %v2606_v33   ;;  %v2482_v17 = vcombine.high %v2226_v28, %v2226_v28  ;;  %v3094_v61 = vrot.slane %v5908_v63, %v6018_v60  ;;  %v6056_v43 = vsub.s32 %v3118_v36, %v6934_v5 }
 0x2f5   :  { %v3087_v50 = vrot.slane %v2674_v14, %v6022_v44  ;;  %v6060_v32 = vsub.s32 %v3111_v46, %v6934_v5  ;;  %v3125_v27 = vadd.s32 4294967192, %v5901_v8  ;;  %v3132_v38 = vadd.s32 4294967184, %v5901_v8  ;;  %v6948_v46 = vld [vmem:[#allocation108_spill] sm:$0xff] }
 0x2f6   :  { %2898 = vperm.xlu0 %3860, %v2605_v7   ;;  %v6946_v7 = vld [vmem:[#allocation53_spill] sm:$0xff]  ;;  %v2609_v63 = vcombine.low %v2225_v15, %v2481_v2  ;;  %v2483_v33 = vcombine.high %v2227_v23, %v2227_v23  ;;  %v2229_v36 = vmul.f32 %v5955_v39, %v6947_v10  ;;  %v2230_v30 = vmul.f32 %v5961_v6, %v6948_v46 }
 0x2f7   :  { %v6034_v25 = vpop.permute.xlu0 %2706  ;;  %v3089_v14 = vsel %vm3088_vm6, %v3087_v50, %v3082_v58  ;;  %v2228_v35 = vmul.f32 %v5946_v49, %v6946_v7  ;;  %v2610_v58 = vcombine.low %v2226_v28, %v2482_v17  ;;  %v3108_v7 = vrot.slane %v5934_v55, %v6043_v52  ;;  %v6949_v17 = vld [vmem:[#allocation106_spill] sm:$0xff] }
 0x2f8   :  { %v2680_v41 = vpop.permute.xlu1 %2679  ;;  %v3096_v49 = vsel %vm3095_vm7, %v3094_v61, %v3089_v14  ;;  %2907 = vperm.xlu1 %3861, %v2608_v45   ;;  %v6077_v39 = vsub.s32 %v3125_v27, %v6934_v5  ;;  %v3139_v28 = vadd.s32 4294967176, %v5901_v8  ;;  %v6081_v2 = vsub.s32 %v3132_v38, %v6934_v5 }
 0x2f9   :  { %v3101_v34 = vrot.slane %v2680_v41, %v6039_v42  ;;  %v2611_v55 = vcombine.low %v2227_v23, %v2483_v33  ;;  %v2485_v45 = vcombine.high %v2229_v36, %v2229_v36  ;;  %v2231_v40 = vmul.f32 %v5973_v1, %v6949_v17  ;;  %v6952_v33 = vld [vmem:[#allocation112_spill] sm:$0xff] }
 0x2fa   :  { %2904 = vperm.xlu0 %3860, %v2607_v53   ;;  %v2484_v53 = vcombine.high %v2228_v35, %v2228_v35  ;;  %v2486_v27 = vcombine.high %v2230_v30, %v2230_v30  ;;  %v3122_v38 = vrot.slane %v5964_v18, %v6056_v43  ;;  %v6097_v1 = vsub.s32 %v3139_v28, %v6934_v5 }
 0x2fb   :  { %v6053_v37 = vpop.permute.xlu0 %2712  ;;  %v3103_v50 = vsel %vm3102_vm8, %v3101_v34, %v3096_v49  ;;  %v6950_v49 = vld [vmem:[#allocation17_spill] sm:$0xff]  ;;  %v2613_v18 = vcombine.low %v2229_v36, %v2485_v45  ;;  %v3136_v19 = vrot.slane %v5990_v59, %v6081_v2  ;;  %4317 = vpow2.f32 %v5912_v31 }
 0x2fc   :  { %v2686_v41 = vpop.permute.xlu1 %2685  ;;  %v3110_v6 = vsel %vm3109_vm9, %v3108_v7, %v3103_v50  ;;  %2913 = vperm.xlu1 %3861, %v2610_v58   ;;  %v2612_v34 = vcombine.low %v2228_v35, %v2484_v53  ;;  %v2232_v8 = vmul.f32 %v5979_v13, %v6950_v49  ;;  %v6951_v50 = vld [vmem:[#allocation110_spill] sm:$0xff]  ;;  %v2487_v35 = vcombine.high %v2231_v40, %v2231_v40 }
 0x2fd   :  { %v3115_v15 = vrot.slane %v2686_v41, %v6060_v32  ;;  %v1190_v58 = vadd.f32 1.0, %v6951_v50  ;;  %v2233_v53 = vmul.f32 %v5984_v24, %v6952_v33  ;;  %v2614_v46 = vcombine.low %v2230_v30, %v2486_v27  ;;  %v6953_v41 = vld [vmem:[#allocation58_spill] sm:$0xff]  ;;  %v6955_v24 = vld [vmem:[#allocation21_spill] sm:$0xff] }
 0x2fe   :  { %2910 = vperm.xlu0 %3860, %v2609_v63   ;;  %v2488_v7 = vcombine.high %v2232_v8, %v2232_v8  ;;  %v2234_v5 = vmul.f32 %v5998_v47, %v6953_v41  ;;  %v1192_v30 = vadd.f32 1.0, %v6955_v24  ;;  %v4310_v47 = vpop.eup %4309  ;;  %v2615_v17 = vcombine.low %v2231_v40, %v2487_v35 }
 0x2ff   :  { %v6072_v14 = vpop.permute.xlu0 %2718  ;;  %v3117_v61 = vsel %vm3116_vm10, %v3115_v15, %v3110_v6  ;;  %v6954_v6 = vld [vmem:[#allocation54_spill] sm:$0xff]  ;;  %v2489_v59 = vcombine.high %v2233_v53, %v2233_v53  ;;  %4319 = vrcp.f32 %v1190_v58  ;;  %v3149_v40 = vrot.slane %v6015_v48, %v5940_v20 }
 0x300   :  { %v2692_v63 = vpop.permute.xlu1 %2691  ;;  %v3124_v13 = vsel %vm3123_vm11, %v3122_v38, %v3117_v61  ;;  %2919 = vperm.xlu1 %3861, %v2612_v34   ;;  %v6956_v61 = vld [vmem:[#allocation46_spill] sm:$0xff]  ;;  %v2616_v56 = vcombine.low %v2232_v8, %v2488_v7  ;;  %v2490_v49 = vcombine.high %v2234_v5, %v2234_v5  ;;  %v6957_v38 = vld [vmem:[#allocation8_spill] sm:$0xff]  ;;  %v1194_v8 = vadd.f32 1.0, %v5739_v54 }
 0x301   :  { %v3129_v23 = vrot.slane %v2692_v63, %v6077_v39  ;;  %v2235_v34 = vmul.f32 %v6004_v12, %v6956_v61  ;;  %v2236_v31 = vmul.f32 %v6009_v0, %v6957_v38  ;;  %v4312_v0 = vpop.eup %4311  ;;  %v2617_v35 = vcombine.low %v2233_v53, %v2489_v59  ;;  %v6962_v59 = vld [vmem:[#allocation48_spill] sm:$0xff]  ;;  %v6963_v38 = vld [vmem:[#allocation57_spill] sm:$0xff] }
 0x302   :  { %2916 = vperm.xlu0 %3860, %v2611_v55   ;;  %v1191_v55 = vadd.f32 1.0, %v6954_v6  ;;  %v4314_v41 = vpop.eup %4313  ;;  %v1200_v54 = vadd.f32 1.0, %v5790_v3 }
 0x303   :  { %v6091_v10 = vpop.permute.xlu0 %2724  ;;  %v3131_v16 = vsel %vm3130_vm12, %v3129_v23, %v3124_v13  ;;  %v6958_v23 = vld [vmem:[#allocation62_spill] sm:$0xff]  ;;  %v2491_v33 = vcombine.high %v2235_v34, %v2235_v34  ;;  %v2492_v48 = vcombine.high %v2236_v31, %v2236_v31  ;;  %v2239_v61 = vmul.f32 %v4314_v41, %v6962_v59 }
 0x304   :  { %v2698_v15 = vpop.permute.xlu1 %2697  ;;  %v3138_v45 = vsel %vm3137_vm13, %v3136_v19, %v3131_v16  ;;  %2925 = vperm.xlu1 %3861, %v2614_v46   ;;  %v1193_v13 = vadd.f32 1.0, %v6958_v23  ;;  %4321 = vrcp.f32 %v1191_v55  ;;  %v6960_v16 = vld [vmem:[#allocation107_spill] sm:$0xff]  ;;  %v2618_v19 = vcombine.low %v2234_v5, %v2490_v49  ;;  %v4316_v5 = vpop.eup %4315 }
 0x305   :  { %v3143_v36 = vrot.slane %v2698_v15, %v6097_v1  ;;  %4323 = vrcp.f32 %v1192_v30  ;;  %v2237_v46 = vmul.f32 %v4310_v47, %v6960_v16  ;;  %v6961_v15 = vld [vmem:[#allocation111_spill] sm:$0xff]  ;;  %v3158_v55 = vrot.slane %v6034_v25, %v5959_v11 }
 0x306   :  { %2922 = vperm.xlu0 %3860, %v2613_v18   ;;  %v6959_v18 = vld [vmem:[#allocation86_spill] sm:$0xff]  ;;  %v2238_v6 = vmul.f32 %v4312_v0, %v6961_v15  ;;  %4325 = vrcp.f32 %v1193_v13  ;;  %v2619_v47 = vcombine.low %v2235_v34, %v2491_v33  ;;  %v2620_v49 = vcombine.low %v2236_v31, %v2492_v48 }
 0x307   :  { %v6108_v28 = vpop.permute.xlu0 %2730  ;;  %v6119_v27 = vsel %vm3144_vm14, %v3143_v36, %v3138_v45  ;;  %v701_v58 = vadd.f32 %v5478_v22, %v6959_v18  ;;  %4327 = vrcp.f32 %v1194_v8  ;;  %v3168_v23 = vrot.slane %v6053_v37, %v5976_v9  ;;  %v6964_v37 = vld [vmem:[#allocation116_spill] sm:$0xff] }
 0x308   :  { %v2704_v63 = vpop.permute.xlu1 %2703  ;;  %2931 = vperm.xlu1 %3861, %v2616_v56   ;;  %v6144_v56 = vpop.eup %4317  ;;  %v2494_v3 = vcombine.high %v2238_v6, %v2238_v6  ;;  %4329 = vrcp.f32 %v1200_v54  ;;  %v3178_v48 = vrot.slane %v6072_v14, %v6001_v4  ;;  %v6966_v54 = vld [vmem:[#allocation91_spill] sm:$0xff] }
 0x309   :  { %v3153_v12 = vrot.slane %v2704_v63, %v5943_v29  ;;  %v3852_v30 = vmul.f32 -1.442695, %v701_v58  ;;  %v2240_v63 = vmul.f32 %v4316_v5, %v6963_v38  ;;  %v4320_v18 = vpop.eup %4319  ;;  %v1203_v58 = vadd.f32 1.0, %v5806_v62  ;;  %v6969_v38 = vld [vmem:[#allocation115_spill] sm:$0xff] }
 0x30a   :  { %2928 = vperm.xlu0 %3860, %v2615_v17   ;;  %v2493_v17 = vcombine.high %v2237_v46, %v2237_v46  ;;  %v2241_v33 = vmul.f32 %v4320_v18, %v6964_v37  ;;  %v6970_v18 = vld [vmem:[#allocation65_spill] sm:$0xff] }
 0x30b   :  { %v6123_v50 = vpop.permute.xlu0 %2736  ;;  %v3154_v7 = vsel %vm3046_vm0, %v3153_v12, %v3149_v40  ;;  %v1202_v12 = vadd.f32 1.0, %v5799_v21  ;;  %4331 = vpow2.f32 %v3852_v30  ;;  %v2622_v21 = vcombine.low %v2238_v6, %v2494_v3  ;;  %v6967_v30 = vld [vmem:[#allocation119_spill] sm:$0xff] }
 0x30c   :  { %v2710_v36 = vpop.permute.xlu1 %2709  ;;  %v3159_v45 = vsel %vm3053_vm1, %v3158_v55, %v3154_v7  ;;  %2937 = vperm.xlu1 %3861, %v2618_v19   ;;  %v2621_v0 = vcombine.low %v2237_v46, %v2493_v17  ;;  %v2496_v41 = vcombine.high %v2240_v63, %v2240_v63  ;;  %v6965_v55 = vld [vmem:[#allocation63_spill] sm:$0xff]  ;;  %v1205_v6 = vadd.f32 1.0, %v6967_v30  ;;  %v6974_v30 = vld [vmem:[#allocation88_spill] sm:$0xff] }
 0x30d   :  { %v3163_v53 = vrot.slane %v2710_v36, %v5970_v57  ;;  %v1204_v36 = vadd.f32 1.0, %v6965_v55  ;;  %4333 = vrcp.f32 %v1202_v12  ;;  %v2497_v5 = vcombine.high %v2241_v33, %v2241_v33 }
 0x30e   :  { %2934 = vperm.xlu0 %3860, %v2617_v35   ;;  %v4322_v8 = vpop.eup %4321  ;;  %v2495_v35 = vcombine.high %v2239_v61, %v2239_v61  ;;  %4335 = vrcp.f32 %v1203_v58  ;;  %v1206_v58 = vadd.f32 1.0, %v6970_v18 }
 0x30f   :  { %v6137_v24 = vpop.permute.xlu0 %2742  ;;  %v3164_v25 = vsel %vm3060_vm2, %v3163_v53, %v3159_v45  ;;  %v4324_v7 = vpop.eup %4323  ;;  %v2242_v19 = vmul.f32 %v4322_v8, %v5758_v26  ;;  %v702_v53 = vadd.f32 %v5478_v22, %v6966_v54  ;;  %4337 = vrcp.f32 %v1204_v36  ;;  %v6971_v8 = vld [vmem:[#allocation120_spill] sm:$0xff] }
 0x310   :  { %v2716_v13 = vpop.permute.xlu1 %2715  ;;  %v3169_v31 = vsel %vm3067_vm3, %v3168_v23, %v3164_v25  ;;  %2943 = vperm.xlu1 %3861, %v2620_v49   ;;  %v4326_v45 = vpop.eup %4325  ;;  %v2623_v14 = vcombine.low %v2239_v61, %v2495_v35  ;;  %v2624_v49 = vcombine.low %v2240_v63, %v2496_v41  ;;  %4339 = vrcp.f32 %v1205_v6  ;;  %v6975_v6 = vld [vmem:[#allocation67_spill] sm:$0xff] }
 0x311   :  { %v3173_v34 = vrot.slane %v2716_v13, %v5995_v51  ;;  %v4328_v25 = vpop.eup %4327  ;;  %v2498_v3 = vcombine.high %v2242_v19, %v2242_v19  ;;  %v2244_v23 = vmul.f32 %v4326_v45, %v6969_v38  ;;  %v3188_v13 = vrot.slane %v6091_v10, %v6018_v60  ;;  %v6972_v10 = vld [vmem:[#allocation52_spill] sm:$0xff] }
 0x312   :  { %2940 = vperm.xlu0 %3860, %v2619_v47   ;;  %v6968_v47 = vld [vmem:[#allocation11_spill] sm:$0xff]  ;;  %v4330_v35 = vpop.eup %4329  ;;  %v2625_v37 = vcombine.low %v2241_v33, %v2497_v5  ;;  %v703_v33 = vadd.f32 %v5478_v22, %v6974_v30  ;;  %4341 = vrcp.f32 %v1206_v58  ;;  %v6982_v30 = vld [vmem:[#allocation16_spill] sm:$0xff] }
 0x313   :  { %v6149_v40 = vpop.permute.xlu0 %2748  ;;  %v3174_v16 = vsel %vm3074_vm4, %v3173_v34, %v3169_v31  ;;  %v2243_v17 = vmul.f32 %v4324_v7, %v6968_v47  ;;  %v3853_v31 = vmul.f32 -1.442695, %v702_v53  ;;  %v2245_v7 = vmul.f32 %v4328_v25, %v6972_v10 }
 0x314   :  { %v2722_v15 = vpop.permute.xlu1 %2721  ;;  %v3179_v26 = vsel %vm3081_vm5, %v3178_v48, %v3174_v16  ;;  %2949 = vperm.xlu1 %3861, %v2622_v21   ;;  %v6973_v48 = vld [vmem:[#allocation18_spill] sm:$0xff]  ;;  %v2626_v55 = vcombine.low %v2242_v19, %v2498_v3  ;;  %v2500_v36 = vcombine.high %v2244_v23, %v2244_v23  ;;  %v6977_v3 = vld [vmem:[#allocation64_spill] sm:$0xff] }
 0x315   :  { %v3183_v46 = vrot.slane %v2722_v15, %v6022_v44  ;;  %v2499_v16 = vcombine.high %v2243_v17, %v2243_v17  ;;  %v6181_v41 = vpop.eup %4331  ;;  %v2251_v15 = vmul.f32 %v4330_v35, %v6973_v48  ;;  %4343 = vpow2.f32 %v3853_v31  ;;  %v6978_v31 = vld [vmem:[#allocation121_spill] sm:$0xff] }
 0x316   :  { %2946 = vperm.xlu0 %3860, %v2621_v0   ;;  %v1207_v0 = vadd.f32 1.0, %v6971_v8  ;;  %v1210_v8 = vadd.f32 1.0, %v6978_v31  ;;  %v3218_v35 = vrot.slane %v6137_v24, %v6081_v2 }
 0x317   :  { %v6160_v62 = vpop.permute.xlu0 %2754  ;;  %v3184_v59 = vsel %vm3088_vm6, %v3183_v46, %v3179_v26  ;;  %v3198_v46 = vrot.slane %v6108_v28, %v6043_v52  ;;  %v1208_v26 = vadd.f32 1.0, %v6975_v6  ;;  %v4334_v47 = vpop.eup %4333  ;;  %v2627_v28 = vcombine.low %v2243_v17, %v2499_v16  ;;  %v6980_v16 = vld [vmem:[#allocation27_spill] sm:$0xff] }
 0x318   :  { %v2728_v12 = vpop.permute.xlu1 %2727  ;;  %v3189_v63 = vsel %vm3095_vm7, %v3188_v13, %v3184_v59  ;;  %2955 = vperm.xlu1 %3861, %v2624_v49   ;;  %4345 = vrcp.f32 %v1207_v0  ;;  %v2501_v59 = vcombine.high %v2245_v7, %v2245_v7  ;;  %v4336_v49 = vpop.eup %4335  ;;  %v2507_v22 = vcombine.high %v2251_v15, %v2251_v15  ;;  %v6979_v0 = vld [vmem:[#allocation113_spill] sm:$0xff] }
 0x319   :  { %v3193_v61 = vrot.slane %v2728_v12, %v6039_v42  ;;  %v2253_v38 = vmul.f32 %v4334_v47, %v6977_v3  ;;  %v2628_v13 = vcombine.low %v2244_v23, %v2500_v36  ;;  %v3208_v12 = vrot.slane %v6123_v50, %v6056_v43  ;;  %v4338_v50 = vpop.eup %4337 }
 0x31a   :  { %2952 = vperm.xlu0 %3860, %v2623_v14   ;;  %v6976_v14 = vld [vmem:[#allocation22_spill] sm:$0xff]  ;;  %4347 = vrcp.f32 %v1208_v26  ;;  %v2508_v10 = vcombine.high %v6980_v16, %v6980_v16  ;;  %v4340_v36 = vpop.eup %4339 }
 0x31b   :  { %v6173_v34 = vpop.permute.xlu0 %2760  ;;  %v3194_v21 = vsel %vm3102_vm8, %v3193_v61, %v3189_v63  ;;  %v1209_v5 = vadd.f32 1.0, %v6976_v14  ;;  %v3854_v61 = vmul.f32 -1.442695, %v703_v33  ;;  %v1195_v63 = vadd.f32 1.0, %v6979_v0 }
 0x31c   :  { %v2734_v54 = vpop.permute.xlu1 %2733  ;;  %v3199_v19 = vsel %vm3109_vm9, %v3198_v46, %v3194_v21  ;;  %2961 = vperm.xlu1 %3861, %v2626_v55   ;;  %v6981_v21 = vld [vmem:[#allocation24_spill] sm:$0xff]  ;;  %v2635_v46 = vcombine.low %v2251_v15, %v2507_v22  ;;  %v2255_v33 = vmul.f32 %v4338_v50, %v6982_v30  ;;  %v4342_v47 = vpop.eup %4341  ;;  %v2636_v15 = vcombine.low %v6980_v16, %v2508_v10  ;;  %v6988_v10 = vld [vmem:[#allocation75_spill] sm:$0xff] }
 0x31d   :  { %v3203_v45 = vrot.slane %v2734_v54, %v6060_v32  ;;  %4349 = vrcp.f32 %v1209_v5  ;;  %v2254_v48 = vmul.f32 %v4336_v49, %v6981_v21  ;;  %v2509_v54 = vcombine.high %v2253_v38, %v2253_v38  ;;  %v6984_v5 = vld [vmem:[#allocation19_spill] sm:$0xff] }
 0x31e   :  { %2958 = vperm.xlu0 %3860, %v2625_v37   ;;  %v2629_v37 = vcombine.low %v2245_v7, %v2501_v59  ;;  %4351 = vrcp.f32 %v1210_v8  ;;  %v6985_v59 = vld [vmem:[#allocation127_spill] sm:$0xff]  ;;  %v3228_v0 = vrot.slane %v6149_v40, %v5940_v20 }
 0x31f   :  { %v6186_v53 = vpop.permute.xlu0 %2766  ;;  %v3204_v25 = vsel %vm3116_vm10, %v3203_v45, %v3199_v19  ;;  %v6983_v45 = vld [vmem:[#allocation26_spill] sm:$0xff]  ;;  %4353 = vpow2.f32 %v3854_v61  ;;  %v1196_v19 = vadd.f32 1.0, %v6984_v5  ;;  %v4344_v22 = vpop.eup %4343  ;;  %v2637_v3 = vcombine.low %v2253_v38, %v2509_v54 }
 0x320   :  { %v2740_v18 = vpop.permute.xlu1 %2739  ;;  %v3209_v23 = vsel %vm3123_vm11, %v3208_v12, %v3204_v25  ;;  %2967 = vperm.xlu1 %3861, %v2628_v13   ;;  %v1211_v14 = vadd.f32 1.0, %v6983_v45  ;;  %v2256_v25 = vmul.f32 %v4340_v36, %v6985_v59  ;;  %4355 = vrcp.f32 %v1195_v63  ;;  %v6986_v12 = vld [vmem:[#allocation117_spill] sm:$0xff]  ;;  %v6990_v45 = vld [vmem:[#allocation66_spill] sm:$0xff] }
 0x321   :  { %v3213_v17 = vrot.slane %v2740_v18, %v6077_v39  ;;  %v2511_v13 = vcombine.high %v2255_v33, %v2255_v33  ;;  %v2257_v18 = vmul.f32 %v4342_v47, %v6986_v12  ;;  %v3237_v38 = vrot.slane %v6160_v62, %v5959_v11  ;;  %v6991_v47 = vld [vmem:[#allocation71_spill] sm:$0xff] }
 0x322   :  { %2964 = vperm.xlu0 %3860, %v2627_v28   ;;  %v2510_v28 = vcombine.high %v2254_v48, %v2254_v48  ;;  %v4346_v8 = vpop.eup %4345  ;;  %4357 = vrcp.f32 %v1211_v14  ;;  %v2512_v16 = vcombine.high %v2256_v25, %v2256_v25  ;;  %v1213_v62 = vadd.f32 1.0, %v6181_v41 }
 0x323   :  { %v6198_v58 = vpop.permute.xlu0 %2772  ;;  %v3214_v55 = vsel %vm3130_vm12, %v3213_v17, %v3209_v23  ;;  %v1212_v17 = vadd.f32 1.0, %v6144_v56  ;;  %v6987_v23 = vld [vmem:[#allocation59_spill] sm:$0xff]  ;;  %4359 = vrcp.f32 %v1196_v19  ;;  %v2258_v21 = vmul.f32 %v4346_v8, %v6988_v10 }
 0x324   :  { %v2746_v6 = vpop.permute.xlu1 %2745  ;;  %v3219_v24 = vsel %vm3137_vm13, %v3218_v35, %v3214_v55  ;;  %2988 = vperm.xlu1 %3861, %v2635_v46   ;;  %v1197_v50 = vadd.f32 1.0, %v6987_v23  ;;  %v4348_v63 = vpop.eup %4347  ;;  %v2639_v36 = vcombine.low %v2255_v33, %v2511_v13  ;;  %v2513_v40 = vcombine.high %v2257_v18, %v2257_v18  ;;  %v6989_v46 = vld [vmem:[#allocation68_spill] sm:$0xff]  ;;  %v6992_v13 = vld [vmem:[#allocation126_spill] sm:$0xff] }
 0x325   :  { %v3223_v7 = vrot.slane %v2746_v6, %v6097_v1  ;;  %v2259_v54 = vmul.f32 %v4348_v63, %v6989_v46  ;;  %4361 = vrcp.f32 %v1212_v17  ;;  %v1198_v14 = vadd.f32 1.0, %v6990_v45 }
 0x326   :  { %2970 = vperm.xlu0 %3860, %v2629_v37   ;;  %v2638_v37 = vcombine.low %v2254_v48, %v2510_v28  ;;  %4363 = vrcp.f32 %v1197_v50  ;;  %v3247_v33 = vrot.slane %v6173_v34, %v5976_v9  ;;  %v2640_v5 = vcombine.low %v2256_v25, %v2512_v16 }
 0x327   :  { %v6212_v26 = vpop.permute.xlu0 %2778  ;;  %v6220_v49 = vsel %vm3144_vm14, %v3223_v7, %v3219_v24  ;;  %v4350_v55 = vpop.eup %4349  ;;  %v2514_v19 = vcombine.high %v2258_v21, %v2258_v21  ;;  %v2641_v41 = vcombine.low %v2257_v18, %v2513_v40  ;;  %4365 = vrcp.f32 %v1213_v62 }
 0x328   :  { %v2752_v31 = vpop.permute.xlu1 %2751  ;;  %2994 = vperm.xlu1 %3861, %v2637_v3   ;;  %v4352_v7 = vpop.eup %4351  ;;  %v2515_v3 = vcombine.high %v2259_v54, %v2259_v54  ;;  %4367 = vrcp.f32 %v1198_v14  ;;  %v3257_v18 = vrot.slane %v6186_v53, %v6001_v4 }
 0x329   :  { %v3232_v35 = vrot.slane %v2752_v31, %v5943_v29  ;;  %v4354_v59 = vpop.eup %4353  ;;  %v2261_v12 = vmul.f32 %v4352_v7, %v6992_v13 }
 0x32a   :  { %2991 = vperm.xlu0 %3860, %v2636_v15   ;;  %v2260_v15 = vmul.f32 %v4350_v55, %v6991_v47  ;;  %v4356_v25 = vpop.eup %4355  ;;  %v1215_v62 = vadd.f32 1.0, %v4354_v59  ;;  %v6997_v47 = vld [vmem:[#allocation72_spill] sm:$0xff] }
 0x32b   :  { %v6223_v61 = vpop.permute.xlu0 %2784  ;;  %v3233_v56 = vsel %vm3046_vm0, %v3232_v35, %v3228_v0  ;;  %v1214_v0 = vadd.f32 1.0, %v4344_v22  ;;  %v6993_v35 = vld [vmem:[#allocation61_spill] sm:$0xff]  ;;  %v2517_v55 = vcombine.high %v2261_v12, %v2261_v12 }
 0x32c   :  { %v2758_v30 = vpop.permute.xlu1 %2757  ;;  %v3238_v6 = vsel %vm3053_vm1, %v3237_v38, %v3233_v56  ;;  %3000 = vperm.xlu1 %3861, %v2639_v36   ;;  %v1199_v23 = vadd.f32 1.0, %v6993_v35  ;;  %v4358_v50 = vpop.eup %4357  ;;  %v6994_v38 = vld [vmem:[#allocation124_spill] sm:$0xff]  ;;  %v2516_v16 = vcombine.high %v2260_v15, %v2260_v15  ;;  %v2643_v56 = vcombine.low %v2259_v54, %v2515_v3  ;;  %v6995_v36 = vld [vmem:[#allocation29_spill] sm:$0xff] }
 0x32d   :  { %v3242_v48 = vrot.slane %v2758_v30, %v5970_v57  ;;  %v2246_v63 = vmul.f32 %v4356_v25, %v6994_v38  ;;  %v4360_v22 = vpop.eup %4359  ;;  %v2262_v40 = vmul.f32 %v4358_v50, %v6995_v36  ;;  %4369 = vrcp.f32 %v1214_v0  ;;  %v6996_v54 = vld [vmem:[#allocation60_spill] sm:$0xff]  ;;  %v6999_v50 = vld [vmem:[#allocation129_spill] sm:$0xff] }
 0x32e   :  { %2997 = vperm.xlu0 %3860, %v2638_v37   ;;  %v2642_v37 = vcombine.low %v2258_v21, %v2514_v19  ;;  %4371 = vrcp.f32 %v1199_v23  ;;  %v3267_v21 = vrot.slane %v6198_v58, %v6018_v60  ;;  %v2247_v45 = vmul.f32 %v4360_v22, %v6996_v54 }
 0x32f   :  { %v6236_v24 = vpop.permute.xlu0 %2790  ;;  %v3243_v28 = vsel %vm3060_vm2, %v3242_v48, %v3238_v6  ;;  %v4362_v48 = vpop.eup %4361  ;;  %v2502_v14 = vcombine.high %v2246_v63, %v2246_v63  ;;  %v2645_v19 = vcombine.low %v2261_v12, %v2517_v55  ;;  %v2518_v59 = vcombine.high %v2262_v40, %v2262_v40  ;;  %v6998_v12 = vld [vmem:[#allocation25_spill] sm:$0xff]  ;;  %v7000_v55 = vld [vmem:[#allocation10_spill] sm:$0xff] }
 0x330   :  { %v2764_v31 = vpop.permute.xlu1 %2763  ;;  %v3248_v8 = vsel %vm3067_vm3, %v3247_v33, %v3243_v28  ;;  %3006 = vperm.xlu1 %3861, %v2641_v41   ;;  %v2644_v33 = vcombine.low %v2260_v15, %v2516_v16  ;;  %v2263_v28 = vmul.f32 %v4362_v48, %v6997_v47  ;;  %4373 = vrcp.f32 %v1215_v62  ;;  %v7002_v47 = vld [vmem:[#allocation125_spill] sm:$0xff] }
 0x331   :  { %v3252_v34 = vrot.slane %v2764_v31, %v5995_v51  ;;  %v3277_v31 = vrot.slane %v6212_v26, %v6043_v52  ;;  %v2630_v0 = vcombine.low %v2246_v63, %v2502_v14  ;;  %v3287_v63 = vrot.slane %v6223_v61, %v6056_v43 }
 0x332   :  { %3003 = vperm.xlu0 %3860, %v2640_v5   ;;  %v4364_v5 = vpop.eup %4363  ;;  %v2519_v23 = vcombine.high %v2263_v28, %v2263_v28  ;;  %v3297_v61 = vrot.slane %v6236_v24, %v6081_v2 }
 0x333   :  { %v6247_v17 = vpop.permute.xlu0 %2796  ;;  %v3253_v10 = vsel %vm3074_vm4, %v3252_v34, %v3248_v8  ;;  %v4366_v15 = vpop.eup %4365  ;;  %v2503_v8 = vcombine.high %v2247_v45, %v2247_v45  ;;  %v2248_v34 = vmul.f32 %v4364_v5, %v6998_v12 }
 0x334   :  { %v2770_v46 = vpop.permute.xlu1 %2769  ;;  %v3258_v30 = vsel %vm3081_vm5, %v3257_v18, %v3253_v10  ;;  %3012 = vperm.xlu1 %3861, %v2643_v56   ;;  %v4368_v35 = vpop.eup %4367  ;;  %v2646_v18 = vcombine.low %v2262_v40, %v2518_v59  ;;  %v2264_v38 = vmul.f32 %v4366_v15, %v6999_v50  ;;  %v2647_v62 = vcombine.low %v2263_v28, %v2519_v23 }
 0x335   :  { %v3262_v53 = vrot.slane %v2770_v46, %v6022_v44  ;;  %v2631_v56 = vcombine.low %v2247_v45, %v2503_v8  ;;  %v2249_v36 = vmul.f32 %v4368_v35, %v7000_v55  ;;  %v2504_v46 = vcombine.high %v2248_v34, %v2248_v34 }
 0x336   :  { %3009 = vperm.xlu0 %3860, %v2642_v37   ;;  %v2520_v48 = vcombine.high %v2264_v38, %v2264_v38 }
 0x337   :  { %v6257_v6 = vpop.permute.xlu0 %2802  ;;  %v3263_v7 = vsel %vm3088_vm6, %v3262_v53, %v3258_v30  ;;  %v4370_v22 = vpop.eup %4369  ;;  %v7001_v53 = vld [vmem:[#allocation73_spill] sm:$0xff]  ;;  %v2505_v5 = vcombine.high %v2249_v36, %v2249_v36 }
 0x338   :  { %v2776_v41 = vpop.permute.xlu1 %2775  ;;  %v3268_v3 = vsel %vm3095_vm7, %v3267_v21, %v3263_v7  ;;  %3018 = vperm.xlu1 %3861, %v2645_v19   ;;  %v4372_v30 = vpop.eup %4371  ;;  %v2265_v21 = vmul.f32 %v4370_v22, %v7001_v53  ;;  %v2632_v19 = vcombine.low %v2248_v34, %v2504_v46 }
 0x339   :  { %v3272_v58 = vrot.slane %v2776_v41, %v6039_v42  ;;  %v2250_v59 = vmul.f32 %v4372_v30, %v7002_v47  ;;  %v2633_v24 = vcombine.low %v2249_v36, %v2505_v5 }
 0x33a   :  { %3015 = vperm.xlu0 %3860, %v2644_v33   ;;  %v4374_v45 = vpop.eup %4373  ;;  %v2521_v41 = vcombine.high %v2265_v21, %v2265_v21 }
 0x33b   :  { %v6266_v13 = vpop.permute.xlu0 %2808  ;;  %v3273_v25 = vsel %vm3102_vm8, %v3272_v58, %v3268_v3  ;;  %v2648_v3 = vcombine.low %v2264_v38, %v2520_v48  ;;  %v7003_v58 = vld [vmem:[#allocation14_spill] sm:$0xff] }
 0x33c   :  { %v2782_v37 = vpop.permute.xlu1 %2781  ;;  %v3278_v16 = vsel %vm3109_vm9, %v3277_v31, %v3273_v25  ;;  %3021 = vperm.xlu1 %3861, %v2646_v18   ;;  %v2266_v31 = vmul.f32 %v4374_v45, %v7003_v58  ;;  %v2506_v25 = vcombine.high %v2250_v59, %v2250_v59  ;;  %v2649_v35 = vcombine.low %v2265_v21, %v2521_v41 }
 0x33d   :  { %v3282_v26 = vrot.slane %v2782_v37, %v6060_v32  ;;  %v3307_v37 = vrot.slane %v6247_v17, %v5940_v20  ;;  %v3326_v17 = vrot.slane %v6266_v13, %v5976_v9 }
 0x33e   :  { %2973 = vperm.xlu0 %3860, %v2630_v0   ;;  %v2522_v23 = vcombine.high %v2266_v31, %v2266_v31 }
 0x33f   :  { %v6275_v10 = vpop.permute.xlu0 %2814  ;;  %v3283_v40 = vsel %vm3116_vm10, %v3282_v26, %v3278_v16  ;;  %v3316_v26 = vrot.slane %v6257_v6, %v5959_v11 }
 0x340   :  { %v2788_v54 = vpop.permute.xlu1 %2787  ;;  %v3288_v14 = vsel %vm3123_vm11, %v3287_v63, %v3283_v40  ;;  %3024 = vperm.xlu1 %3861, %v2647_v62   ;;  %v2634_v63 = vcombine.low %v2250_v59, %v2506_v25  ;;  %v3336_v21 = vrot.slane %v6275_v10, %v6001_v4 }
 0x341   :  { %v3292_v7 = vrot.slane %v2788_v54, %v6077_v39 }
 0x342   :  { %2976 = vperm.xlu0 %3860, %v2631_v56   ;;  %v2650_v56 = vcombine.low %v2266_v31, %v2522_v23 }
 0x343   :  { %v2821_v33 = vpop.permute.xlu0 %2820  ;;  %v3293_v28 = vsel %vm3130_vm12, %v3292_v7, %v3288_v14 }
 0x344   :  { %v2794_v15 = vpop.permute.xlu1 %2793  ;;  %v3298_v8 = vsel %vm3137_vm13, %v3297_v61, %v3293_v28  ;;  %3027 = vperm.xlu1 %3861, %v2648_v3   ;;  %v3346_v61 = vrot.slane %v2821_v33, %v6018_v60 }
 0x345   :  { %v3302_v12 = vrot.slane %v2794_v15, %v6097_v1 }
 0x346   :  { %2979 = vperm.xlu0 %3860, %v2632_v19  }
 0x347   :  { %v2827_v0 = vpop.permute.xlu0 %2826  ;;  %v3303_v34 = vsel %vm3144_vm14, %v3302_v12, %v3298_v8 }
 0x348   :  { %v6295_v18 = vsel %vm3699_vm15, %v3303_v34, %v6119_v27  ;;  %v2800_v50 = vpop.permute.xlu1 %2799  ;;  %3030 = vperm.xlu1 %3861, %v2649_v35   ;;  %v3356_v10 = vrot.slane %v2827_v0, %v6043_v52 }
 0x349   :  { %v3311_v16 = vrot.slane %v2800_v50, %v5943_v29 }
 0x34a   :  { %2982 = vperm.xlu0 %3860, %v2633_v24  }
 0x34b   :  { %v2833_v38 = vpop.permute.xlu0 %2832  ;;  %v3312_v22 = vsel %vm3046_vm0, %v3311_v16, %v3307_v37 }
 0x34c   :  { %v2806_v55 = vpop.permute.xlu1 %2805  ;;  %v3317_v27 = vsel %vm3053_vm1, %v3316_v26, %v3312_v22  ;;  %3033 = vperm.xlu1 %3861, %v2650_v56   ;;  %v3366_v33 = vrot.slane %v2833_v38, %v6056_v43 }
 0x34d   :  { %v3321_v46 = vrot.slane %v2806_v55, %v5970_v57 }
 0x34e   :  { %2985 = vperm.xlu0 %3860, %v2634_v63  }
 0x34f   :  { %v2839_v36 = vpop.permute.xlu0 %2838  ;;  %v3322_v40 = vsel %vm3060_vm2, %v3321_v46, %v3317_v27 }
 0x350   :  { %v2812_v30 = vpop.permute.xlu1 %2811  ;;  %v3327_v6 = vsel %vm3067_vm3, %v3326_v17, %v3322_v40  ;;  %v3376_v0 = vrot.slane %v2839_v36, %v6081_v2 }
 0x351   :  { %v3331_v53 = vrot.slane %v2812_v30, %v5995_v51 }
 0x353   :  { %v2845_v62 = vpop.permute.xlu0 %2844  ;;  %v3332_v48 = vsel %vm3074_vm4, %v3331_v53, %v3327_v6 }
 0x354   :  { %v2818_v54 = vpop.permute.xlu1 %2817  ;;  %v3337_v14 = vsel %vm3081_vm5, %v3336_v21, %v3332_v48  ;;  %v3386_v22 = vrot.slane %v2845_v62, %v5940_v20 }
 0x355   :  { %v3341_v13 = vrot.slane %v2818_v54, %v6022_v44 }
 0x357   :  { %v2851_v7 = vpop.permute.xlu0 %2850  ;;  %v3342_v45 = vsel %vm3088_vm6, %v3341_v13, %v3337_v14 }
 0x358   :  { %v2824_v5 = vpop.permute.xlu1 %2823  ;;  %v3347_v19 = vsel %vm3095_vm7, %v3346_v61, %v3342_v45  ;;  %v3395_v55 = vrot.slane %v2851_v7, %v5959_v11 }
 0x359   :  { %v3351_v59 = vrot.slane %v2824_v5, %v6039_v42 }
 0x35b   :  { %v2857_v47 = vpop.permute.xlu0 %2856  ;;  %v3352_v28 = vsel %vm3102_vm8, %v3351_v59, %v3347_v19 }
 0x35c   :  { %v2830_v41 = vpop.permute.xlu1 %2829  ;;  %v3357_v3 = vsel %vm3109_vm9, %v3356_v10, %v3352_v28  ;;  %v3405_v30 = vrot.slane %v2857_v47, %v5976_v9 }
 0x35d   :  { %v3361_v31 = vrot.slane %v2830_v41, %v6060_v32 }
 0x35f   :  { %v2863_v58 = vpop.permute.xlu0 %2862  ;;  %v3362_v15 = vsel %vm3116_vm10, %v3361_v31, %v3357_v3 }
 0x360   :  { %v2836_v8 = vpop.permute.xlu1 %2835  ;;  %v3367_v12 = vsel %vm3123_vm11, %v3366_v33, %v3362_v15  ;;  %v3415_v48 = vrot.slane %v2863_v58, %v6001_v4 }
 0x361   :  { %v3371_v25 = vrot.slane %v2836_v8, %v6077_v39 }
 0x363   :  { %v2869_v24 = vpop.permute.xlu0 %2868  ;;  %v3372_v34 = vsel %vm3130_vm12, %v3371_v25, %v3367_v12 }
 0x364   :  { %v2842_v35 = vpop.permute.xlu1 %2841  ;;  %v3377_v23 = vsel %vm3137_vm13, %v3376_v0, %v3372_v34  ;;  %v3425_v45 = vrot.slane %v2869_v24, %v6018_v60 }
 0x365   :  { %v3381_v37 = vrot.slane %v2842_v35, %v6097_v1 }
 0x367   :  { %v2875_v50 = vpop.permute.xlu0 %2874  ;;  %v3382_v38 = vsel %vm3144_vm14, %v3381_v37, %v3377_v23 }
 0x368   :  { %v6334_v16 = vsel %vm3699_vm15, %v3382_v38, %v6220_v49  ;;  %v2848_v26 = vpop.permute.xlu1 %2847  ;;  %v3435_v28 = vrot.slane %v2875_v50, %v6043_v52  ;;  %vm3701_vm15 = vcmask 1042434  }
 0x369   :  { %v3390_v56 = vrot.slane %v2848_v26, %v5943_v29 }
 0x36b   :  { %v2881_v63 = vpop.permute.xlu0 %2880  ;;  %v3391_v27 = vsel %vm3046_vm0, %v3390_v56, %v3386_v22 }
 0x36c   :  { %v2854_v36 = vpop.permute.xlu1 %2853  ;;  %v3396_v46 = vsel %vm3053_vm1, %v3395_v55, %v3391_v27  ;;  %v3445_v15 = vrot.slane %v2881_v63, %v6056_v43 }
 0x36d   :  { %v3400_v40 = vrot.slane %v2854_v36, %v5970_v57 }
 0x36f   :  { %v2887_v17 = vpop.permute.xlu0 %2886  ;;  %v3401_v49 = vsel %vm3060_vm2, %v3400_v40, %v3396_v46 }
 0x370   :  { %v2860_v6 = vpop.permute.xlu1 %2859  ;;  %v3406_v53 = vsel %vm3067_vm3, %v3405_v30, %v3401_v49  ;;  %v3455_v34 = vrot.slane %v2887_v17, %v6081_v2 }
 0x371   :  { %v3410_v21 = vrot.slane %v2860_v6, %v5995_v51 }
 0x373   :  { %v2893_v62 = vpop.permute.xlu0 %2892  ;;  %v3411_v54 = vsel %vm3074_vm4, %v3410_v21, %v3406_v53 }
 0x374   :  { %v2866_v14 = vpop.permute.xlu1 %2865  ;;  %v3416_v7 = vsel %vm3081_vm5, %v3415_v48, %v3411_v54  ;;  %v3465_v55 = vrot.slane %v2893_v62, %v5940_v20 }
 0x375   :  { %v3420_v61 = vrot.slane %v2866_v14, %v6022_v44 }
 0x377   :  { %v2899_v13 = vpop.permute.xlu0 %2898  ;;  %v3421_v5 = vsel %vm3088_vm6, %v3420_v61, %v3416_v7 }
 0x378   :  { %v2872_v19 = vpop.permute.xlu1 %2871  ;;  %v3426_v47 = vsel %vm3095_vm7, %v3425_v45, %v3421_v5  ;;  %v3474_v36 = vrot.slane %v2899_v13, %v5959_v11 }
 0x379   :  { %v3430_v10 = vrot.slane %v2872_v19, %v6039_v42 }
 0x37b   :  { %v2905_v59 = vpop.permute.xlu0 %2904  ;;  %v3431_v41 = vsel %vm3102_vm8, %v3430_v10, %v3426_v47 }
 0x37c   :  { %v2878_v3 = vpop.permute.xlu1 %2877  ;;  %v3436_v58 = vsel %vm3109_vm9, %v3435_v28, %v3431_v41  ;;  %v3484_v6 = vrot.slane %v2905_v59, %v5976_v9 }
 0x37d   :  { %v3440_v33 = vrot.slane %v2878_v3, %v6060_v32 }
 0x37f   :  { %v2911_v31 = vpop.permute.xlu0 %2910  ;;  %v3441_v8 = vsel %vm3116_vm10, %v3440_v33, %v3436_v58 }
 0x380   :  { %v2884_v12 = vpop.permute.xlu1 %2883  ;;  %v3446_v24 = vsel %vm3123_vm11, %v3445_v15, %v3441_v8  ;;  %v3494_v54 = vrot.slane %v2911_v31, %v6001_v4 }
 0x381   :  { %v3450_v0 = vrot.slane %v2884_v12, %v6077_v39 }
 0x383   :  { %v2917_v25 = vpop.permute.xlu0 %2916  ;;  %v3451_v35 = vsel %vm3130_vm12, %v3450_v0, %v3446_v24 }
 0x384   :  { %v2890_v23 = vpop.permute.xlu1 %2889  ;;  %v3456_v50 = vsel %vm3137_vm13, %v3455_v34, %v3451_v35  ;;  %v3504_v5 = vrot.slane %v2917_v25, %v6018_v60 }
 0x385   :  { %v3460_v38 = vrot.slane %v2890_v23, %v6097_v1 }
 0x387   :  { %v2923_v37 = vpop.permute.xlu0 %2922  ;;  %v3461_v26 = vsel %vm3144_vm14, %v3460_v38, %v3456_v50 }
 0x388   :  { %v2896_v63 = vpop.permute.xlu1 %2895  ;;  %v6369_v56 = vsel %vm3701_vm15, %v3461_v26, %v6295_v18  ;;  %v3514_v41 = vrot.slane %v2923_v37, %v6043_v52 }
 0x389   :  { %v3469_v27 = vrot.slane %v2896_v63, %v5943_v29 }
 0x38b   :  { %v2929_v22 = vpop.permute.xlu0 %2928  ;;  %v3470_v46 = vsel %vm3046_vm0, %v3469_v27, %v3465_v55 }
 0x38c   :  { %v2902_v17 = vpop.permute.xlu1 %2901  ;;  %v3475_v40 = vsel %vm3053_vm1, %v3474_v36, %v3470_v46  ;;  %v3524_v8 = vrot.slane %v2929_v22, %v6056_v43 }
 0x38d   :  { %v3479_v49 = vrot.slane %v2902_v17, %v5970_v57 }
 0x38f   :  { %v2935_v30 = vpop.permute.xlu0 %2934  ;;  %v3480_v53 = vsel %vm3060_vm2, %v3479_v49, %v3475_v40 }
 0x390   :  { %v2908_v18 = vpop.permute.xlu1 %2907  ;;  %v3485_v21 = vsel %vm3067_vm3, %v3484_v6, %v3480_v53  ;;  %v3534_v23 = vrot.slane %v2935_v30, %v6081_v2 }
 0x391   :  { %v3489_v48 = vrot.slane %v2908_v18, %v5995_v51 }
 0x393   :  { %v2941_v62 = vpop.permute.xlu0 %2940  ;;  %v3490_v14 = vsel %vm3074_vm4, %v3489_v48, %v3485_v21 }
 0x394   :  { %v2914_v7 = vpop.permute.xlu1 %2913  ;;  %v3495_v13 = vsel %vm3081_vm5, %v3494_v54, %v3490_v14 }
 0x395   :  { %v3499_v45 = vrot.slane %v2914_v7, %v6022_v44 }
 0x397   :  { %v2947_v61 = vpop.permute.xlu0 %2946  ;;  %v3500_v19 = vsel %vm3088_vm6, %v3499_v45, %v3495_v13  ;;  %v3544_v13 = vrot.slane %v2941_v62, %v5940_v20 }
 0x398   :  { %v2920_v47 = vpop.permute.xlu1 %2919  ;;  %v3505_v59 = vsel %vm3095_vm7, %v3504_v5, %v3500_v19 }
 0x399   :  { %v3509_v28 = vrot.slane %v2920_v47, %v6039_v42 }
 0x39b   :  { %v2953_v10 = vpop.permute.xlu0 %2952  ;;  %v3510_v3 = vsel %vm3102_vm8, %v3509_v28, %v3505_v59  ;;  %v3553_v59 = vrot.slane %v2947_v61, %v5959_v11 }
 0x39c   :  { %v2926_v58 = vpop.permute.xlu1 %2925  ;;  %v3515_v31 = vsel %vm3109_vm9, %v3514_v41, %v3510_v3 }
 0x39d   :  { %v3519_v15 = vrot.slane %v2926_v58, %v6060_v32 }
 0x39f   :  { %v2959_v33 = vpop.permute.xlu0 %2958  ;;  %v3520_v12 = vsel %vm3116_vm10, %v3519_v15, %v3515_v31 }
 0x3a0   :  { %v2932_v24 = vpop.permute.xlu1 %2931  ;;  %v3525_v25 = vsel %vm3123_vm11, %v3524_v8, %v3520_v12  ;;  %v3563_v8 = vrot.slane %v2953_v10, %v5976_v9 }
 0x3a1   :  { %v3529_v34 = vrot.slane %v2932_v24, %v6077_v39 }
 0x3a3   :  { %v6396_v0 = vpop.permute.xlu0 %2964  ;;  %v3530_v35 = vsel %vm3130_vm12, %v3529_v34, %v3525_v25 }
 0x3a4   :  { %v2938_v50 = vpop.permute.xlu1 %2937  ;;  %v3535_v26 = vsel %vm3137_vm13, %v3534_v23, %v3530_v35  ;;  %v3573_v23 = vrot.slane %v2959_v33, %v6001_v4 }
 0x3a5   :  { %v3539_v38 = vrot.slane %v2938_v50, %v6097_v1 }
 0x3a7   :  { %v6401_v37 = vpop.permute.xlu0 %2970  ;;  %v3540_v63 = vsel %vm3144_vm14, %v3539_v38, %v3535_v26 }
 0x3a8   :  { %v2944_v22 = vpop.permute.xlu1 %2943  ;;  %v6408_v27 = vsel %vm3701_vm15, %v3540_v63, %v6334_v16 }
 0x3a9   :  { %v3548_v7 = vrot.slane %v2944_v22, %v5943_v29 }
 0x3ab   :  { %v2992_v55 = vpop.permute.xlu0 %2991  ;;  %v3549_v5 = vsel %vm3046_vm0, %v3548_v7, %v3544_v13 }
 0x3ac   :  { %v2950_v36 = vpop.permute.xlu1 %2949  ;;  %v3627_v41 = vrot.slane %v2992_v55, %v5943_v29  ;;  %v3554_v3 = vsel %vm3053_vm1, %v3553_v59, %v3549_v5 }
 0x3ad   :  { %v3558_v19 = vrot.slane %v2950_v36, %v5970_v57  ;;  %v3583_v36 = vrot.slane %v6396_v0, %v6018_v60 }
 0x3af   :  { %v2998_v46 = vpop.permute.xlu0 %2997  ;;  %v3559_v31 = vsel %vm3060_vm2, %v3558_v19, %v3554_v3 }
 0x3b0   :  { %v2956_v17 = vpop.permute.xlu1 %2955  ;;  %v3564_v29 = vsel %vm3067_vm3, %v3563_v8, %v3559_v31 }
 0x3b1   :  { %v3568_v62 = vrot.slane %v2956_v17, %v5995_v51 }
 0x3b3   :  { %v3004_v40 = vpop.permute.xlu0 %3003  ;;  %v3569_v25 = vsel %vm3074_vm4, %v3568_v62, %v3564_v29 }
 0x3b4   :  { %v2962_v30 = vpop.permute.xlu1 %2961  ;;  %v3574_v38 = vsel %vm3081_vm5, %v3573_v23, %v3569_v25 }
 0x3b5   :  { %v3578_v34 = vrot.slane %v2962_v30, %v6022_v44 }
 0x3b7   :  { %v3010_v6 = vpop.permute.xlu0 %3009  ;;  %v3579_v63 = vsel %vm3088_vm6, %v3578_v34, %v3574_v38 }
 0x3b8   :  { %v2968_v49 = vpop.permute.xlu1 %2967 }
 0x3b9   :  { %v3588_v22 = vrot.slane %v2968_v49, %v6039_v42 }
 0x3bb   :  { %v6410_v18 = vpop.permute.xlu0 %3015 }
 0x3bc   :  { %v2989_v53 = vpop.permute.xlu1 %2988 }
 0x3bd   :  { %v3623_v47 = vrot.slane %v2989_v53, %v5940_v20  ;;  %v3593_v53 = vrot.slane %v6401_v37, %v6043_v52 }
 0x3bf   :  { %v2974_v54 = vpop.permute.xlu0 %2973  ;;  %v3628_v15 = vsel %vm3046_vm0, %v3627_v41, %v3623_v47  ;;  %vm3703_vm0 = vcmask 1043459  }
 0x3c0   :  { %v2995_v21 = vpop.permute.xlu1 %2994  ;;  %v3598_v30 = vrot.slane %v2974_v54, %v6060_v32 }
 0x3c1   :  { %v3632_v28 = vrot.slane %v2995_v21, %v5959_v11  ;;  %v3637_v11 = vrot.slane %v2998_v46, %v5970_v57 }
 0x3c3   :  { %v2977_v16 = vpop.permute.xlu0 %2976  ;;  %v3633_v12 = vsel %vm3053_vm1, %v3632_v28, %v3628_v15 }
 0x3c4   :  { %v3001_v48 = vpop.permute.xlu1 %3000  ;;  %v3638_v35 = vsel %vm3060_vm2, %v3637_v11, %v3633_v12  ;;  %v3603_v0 = vrot.slane %v2977_v16, %v6056_v43 }
 0x3c5   :  { %v3642_v20 = vrot.slane %v3001_v48, %v5976_v9  ;;  %v3647_v9 = vrot.slane %v3004_v40, %v5995_v51  ;;  %v3584_v51 = vsel %vm3095_vm7, %v3583_v36, %v3579_v63 }
 0x3c6   :  { %v3589_v40 = vsel %vm3102_vm8, %v3588_v22, %v3584_v51 }
 0x3c7   :  { %v2980_v61 = vpop.permute.xlu0 %2979  ;;  %v3643_v10 = vsel %vm3067_vm3, %v3642_v20, %v3638_v35  ;;  %v3594_v54 = vsel %vm3109_vm9, %v3593_v53, %v3589_v40 }
 0x3c8   :  { %v3007_v14 = vpop.permute.xlu1 %3006  ;;  %v3648_v55 = vsel %vm3074_vm4, %v3647_v9, %v3643_v10  ;;  %v3599_v16 = vsel %vm3116_vm10, %v3598_v30, %v3594_v54 }
 0x3c9   :  { %v3652_v50 = vrot.slane %v3007_v14, %v6001_v4  ;;  %v3657_v4 = vrot.slane %v3010_v6, %v6022_v44  ;;  %v3667_v44 = vrot.slane %v6410_v18, %v6039_v42  ;;  %v3608_v6 = vrot.slane %v2980_v61, %v6077_v39 }
 0x3ca   :  { %v3604_v42 = vsel %vm3123_vm11, %v3603_v0, %v3599_v16 }
 0x3cb   :  { %v2983_v57 = vpop.permute.xlu0 %2982  ;;  %v3653_v33 = vsel %vm3081_vm5, %v3652_v50, %v3648_v55  ;;  %v3609_v19 = vsel %vm3130_vm12, %v3608_v6, %v3604_v42 }
 0x3cc   :  { %v3013_v45 = vpop.permute.xlu1 %3012  ;;  %v3658_v49 = vsel %vm3088_vm6, %v3657_v4, %v3653_v33  ;;  %v3613_v7 = vrot.slane %v2983_v57, %v6081_v2 }
 0x3cd   :  { %v3662_v46 = vrot.slane %v3013_v45, %v6018_v60 }
 0x3cf   :  { %v3663_v21 = vsel %vm3095_vm7, %v3662_v46, %v3658_v49  ;;  %v2986_v48 = vpop.permute.xlu0 %2985 }
 0x3d0   :  { %v3019_v58 = vpop.permute.xlu1 %3018  ;;  %v3618_v45 = vrot.slane %v2986_v48, %v6097_v1 }
 0x3d1   :  { %v3672_v60 = vrot.slane %v3019_v58, %v6043_v52  ;;  %v3668_v52 = vsel %vm3102_vm8, %v3667_v44, %v3663_v21 }
 0x3d3   :  { %v3673_v18 = vsel %vm3109_vm9, %v3672_v60, %v3668_v52 }
 0x3d4   :  { %v3022_v24 = vpop.permute.xlu1 %3021 }
 0x3d5   :  { %v3677_v14 = vrot.slane %v3022_v24, %v6060_v32 }
 0x3d7   :  { %v3678_v47 = vsel %vm3116_vm10, %v3677_v14, %v3673_v18 }
 0x3d8   :  { %v3025_v26 = vpop.permute.xlu1 %3024 }
 0x3d9   :  { %v3682_v37 = vrot.slane %v3025_v26, %v6056_v43  ;;  %v3614_v43 = vsel %vm3137_vm13, %v3613_v7, %v3609_v19 }
 0x3da   :  { %v3619_v41 = vsel %vm3144_vm14, %v3618_v45, %v3614_v43 }
 0x3db   :  { %v3683_v59 = vsel %vm3123_vm11, %v3682_v37, %v3678_v47  ;;  %v3704_v31 = vsel %vm3703_vm0, %v3619_v41, %v6369_v56 }
 0x3dc   :  { %v3028_v17 = vpop.permute.xlu1 %3027 }
 0x3dd   :  { %v3687_v5 = vrot.slane %v3028_v17, %v6077_v39 }
 0x3df   :  { %v3688_v3 = vsel %vm3130_vm12, %v3687_v5, %v3683_v59 }
 0x3e0   :  { %v3031_v13 = vpop.permute.xlu1 %3030 }
 0x3e1   :  { %v3692_v32 = vrot.slane %v3031_v13, %v6081_v2 }
 0x3e3   :  { %v3693_v58 = vsel %vm3137_vm13, %v3692_v32, %v3688_v3 }
 0x3e4   :  { %v3034_v28 = vpop.permute.xlu1 %3033 }
 0x3e5   :  { %v3697_v39 = vrot.slane %v3034_v28, %v6097_v1 }
 0x3e7   :  { %v3698_v2 = vsel %vm3144_vm14, %v3697_v39, %v3693_v58 }
 0x3e8   :  { %v3707_v62 = vsel %vm3703_vm0, %v3698_v2, %v6408_v27 }
 0x3e9   :  { %v3708_v15 = vcombine.low %v3704_v31, %v3707_v62 }
 0x3eb   :  { %3710 = vst [vmem:[#allocation5] sm:$0xff] %v3708_v15 }
 0x3ec   :  { %4408 = shalt.err (!%p4405_p12)
}
 0x3ed   :  { %s4409_s10 = scalar_lea.hbm %s6495_s4, 128 }
 0x3ee   :  { %p4410_p13 = scmp.ne.s32.totalorder %s6495_s4, %s4409_s10  ;;  %p4413_p0 = scmp.lt.u32.totalorder %s4409_s10, %s6495_s4 }
 0x3f0   :  { %p4415_p1 = pnand %p4413_p0, %p4410_p13 }
 0x3f2   :  { %4418 = shalt.err (!%p4415_p1)
}
 0x3f3   :  { %3720 = dma.vmem_to_hbm [thread:$0]  %s3718_s2, 128, %s6495_s4, [#allocation4]  }
 0x3f4   :  { %4421 = dma.done.wait [#allocation4], 128  }
 0x3f5   :  { %4422 = vsyncadd [#allocation4], 4294967168 }
 0x3f6   :  { %3724 = vsyncpa [#allocation3], 1 }
 0x3f7   :  { %3725 = vsyncpa [#allocation4], 1 }

</bundles_post_ra>
